<compile_context>
chip_gen: v7x
topology: tpu7x:2x2x1
jax: 0.10.0
libtpu: 0.0.40
codegen_flags: <defaults>
</compile_context>

<pallas_src>
import functools

import jax
import jax.numpy as jnp
from jax.experimental import pallas as pl
from jax.experimental.pallas import tpu as pltpu

EPS = 1e-5                      # PyTorch InstanceNorm2d default eps
K_TILE_TARGET = 512             # reduction-axis tile target (multiple of 128)
_BUDGET_CACHE = []


def _vmem_budget():
    """Per-generation VMEM budget (bytes) with headroom for Mosaic scratch."""
    if not _BUDGET_CACHE:
        try:
            cap = int(pltpu.get_tpu_info().vmem_capacity_bytes)
        except Exception:
            cap = 64 * 1024 * 1024          # conservative (v7x-sized) fallback
        _BUDGET_CACHE.append(
            max(32 * 1024 * 1024, min((cap * 3) // 4, 112 * 1024 * 1024)))
    return _BUDGET_CACHE[0]


def _pick_tile(dim, target, align=128):
    """Largest tile <= target that divides `dim` and is a multiple of `align`,
    falling back to the full dim (always a legal BlockSpec size)."""
    if dim <= target:
        return dim
    t = (target // align) * align
    while t >= align:
        if dim % t == 0:
            return t
        t -= align
    return dim


def _stage_tiles(M, K, Cout, out_bytes, budget):
    """Pick (mt, kt) so the stage kernel's double-buffered VMEM footprint fits
    the per-generation budget while keeping the lane axis as large as possible."""
    kt = _pick_tile(K, K_TILE_TARGET)
    mt = _pick_tile(M, 4096 if budget >= (96 << 20) else 2048)

    def footprint(mt_):
        return (4 * kt * mt_                    # x  (bf16, double-buffered)
                + 4 * Cout * kt                 # w  (bf16, double-buffered)
                + 2 * Cout * mt_ * out_bytes    # y  (double-buffered)
                + 4 * Cout * mt_                # f32 accumulator scratch
                + (2 << 20))                    # misc headroom

    while footprint(mt) > budget and mt > 128:
        nxt = _pick_tile(M, max(128, mt // 2))
        if nxt >= mt:
            break
        mt = nxt
    return mt, kt


# ----------------------------------------------------------------------------
# Fused stage kernel.
#   y[n, g, co, m] = bias[co] + sum_k w[g, co, k] * act(x[n, g, k, m])
#   act(v) = SiLU(v * scale[n, k] + shift[n, k])   (apply_act=True, 1x1 stages)
#          = v                                      (apply_act=False, deconvs)
# Also emits the InstanceNorm statistics of y (per (n, co), over all g and m,
# computed from the f32 accumulator) as scale=rstd, shift=-mean*rstd.
# Grid: (n, g, m, k) — n "parallel" (megacore); g/m/k "arbitrary" because the
# statistics scratch accumulates across them.
# ----------------------------------------------------------------------------
def _stage_kernel(x_ref, scale_ref, shift_ref, w_ref, b_ref,
                  y_ref, oscale_ref, oshift_ref,
                  acc_ref, ssum_ref, ssq_ref,
                  *, apply_act, inv_spatial, eps):
    g = pl.program_id(1)
    m = pl.program_id(2)
    k = pl.program_id(3)
    n_g = pl.num_programs(1)
    n_m = pl.num_programs(2)
    n_k = pl.num_programs(3)

    @pl.when((g == 0) & (m == 0) & (k == 0))
    def _init_stats():
        ssum_ref[...] = jnp.zeros_like(ssum_ref)
        ssq_ref[...] = jnp.zeros_like(ssq_ref)

    x = x_ref[0, 0]                                       # (kt, mt) bf16
    if apply_act:
        # Producer's InstanceNorm (per-K scale/shift) + SiLU fused into this
        # matmul's input path.  f32 math on the VPU/EUP (v5e-safe).
        v = x.astype(jnp.float32) * scale_ref[0] + shift_ref[0]
        v = v * pl.reciprocal(1.0 + jnp.exp(-v), approx=True)
        x = v.astype(jnp.bfloat16)

    # bf16 MXU matmul, f32 accumulation.  (Cout, kt) @ (kt, mt) -> (Cout, mt):
    # the spatial axis mt is lane-dense.
    partial = jnp.dot(w_ref[0], x, preferred_element_type=jnp.float32)

    @pl.when(k == 0)
    def _first():
        acc_ref[...] = partial + b_ref[...]               # bias folded in here

    @pl.when(k > 0)
    def _rest():
        acc_ref[...] = acc_ref[...] + partial

    @pl.when(k == n_k - 1)
    def _finish_tile():
        y = acc_ref[...]                                  # f32 (Cout, mt)
        ssum_ref[...] += jnp.sum(y, axis=1, keepdims=True)
        ssq_ref[...] += jnp.sum(y * y, axis=1, keepdims=True)
        y_ref[0, 0] = y.astype(y_ref.dtype)               # bf16 (or f32) store

    @pl.when((g == n_g - 1) & (m == n_m - 1) & (k == n_k - 1))
    def _finalize_stats():
        mean = ssum_ref[...] * inv_spatial
        var = jnp.maximum(ssq_ref[...] * inv_spatial - mean * mean, 0.0)
        rstd = jax.lax.rsqrt(var + eps)
        oscale_ref[0] = rstd
        oshift_ref[0] = -mean * rstd


def _run_stage(x, scale, shift, w, bias, *, apply_act, out_dtype=jnp.bfloat16):
    """x: (N, G, K, M) bf16, scale/shift: (N, K, 1) f32 (used iff apply_act),
    w: (Gw, Cout, K) bf16 with Gw in {1, G}, bias: (Cout, 1) f32.
    Returns y (N, G, Cout, M) out_dtype and the InstanceNorm statistics of y
    as (rstd, -mean*rstd), each (N, Cout, 1) f32."""
    N, G, K, M = x.shape
    Gw, Cout, _ = w.shape
    budget = _vmem_budget()
    mt, kt = _stage_tiles(M, K, Cout, jnp.dtype(out_dtype).itemsize, budget)
    grid = (N, G, M // mt, K // kt)

    w_map = ((lambda n, g, m, k: (g, 0, k)) if Gw > 1
             else (lambda n, g, m, k: (0, 0, k)))

    kernel = functools.partial(_stage_kernel, apply_act=apply_act,
                               inv_spatial=1.0 / float(G * M), eps=EPS)
    return pl.pallas_call(
        kernel,
        out_shape=(
            jax.ShapeDtypeStruct((N, G, Cout, M), out_dtype),
            jax.ShapeDtypeStruct((N, Cout, 1), jnp.float32),
            jax.ShapeDtypeStruct((N, Cout, 1), jnp.float32),
        ),
        grid=grid,
        in_specs=[
            pl.BlockSpec((1, 1, kt, mt), lambda n, g, m, k: (n, g, k, m)),
            pl.BlockSpec((1, kt, 1), lambda n, g, m, k: (n, k, 0)),
            pl.BlockSpec((1, kt, 1), lambda n, g, m, k: (n, k, 0)),
            pl.BlockSpec((1, Cout, kt), w_map),
            pl.BlockSpec((Cout, 1), lambda n, g, m, k: (0, 0)),
        ],
        out_specs=(
            pl.BlockSpec((1, 1, Cout, mt), lambda n, g, m, k: (n, g, 0, m)),
            pl.BlockSpec((1, Cout, 1), lambda n, g, m, k: (n, 0, 0)),
            pl.BlockSpec((1, Cout, 1), lambda n, g, m, k: (n, 0, 0)),
        ),
        scratch_shapes=[
            pltpu.VMEM((Cout, mt), jnp.float32),   # K-reduction accumulator
            pltpu.VMEM((Cout, 1), jnp.float32),    # running sum(y)
            pltpu.VMEM((Cout, 1), jnp.float32),    # running sum(y*y)
        ],
        compiler_params=pltpu.CompilerParams(
            dimension_semantics=("parallel", "arbitrary", "arbitrary",
                                 "arbitrary"),
            vmem_limit_bytes=budget,
        ),
    )(x, scale, shift, w, bias)


# ----------------------------------------------------------------------------
# One-shot InstanceNorm + SiLU pass (elementwise, bf16 in / bf16 out).
# ----------------------------------------------------------------------------
def _norm_silu_kernel(y_ref, scale_ref, shift_ref, a_ref):
    v = y_ref[0, 0].astype(jnp.float32) * scale_ref[0] + shift_ref[0]
    a = v * pl.reciprocal(1.0 + jnp.exp(-v), approx=True)
    a_ref[0, 0] = a.astype(a_ref.dtype)


def _norm_silu(y, scale, shift):
    """y: (N, G, C, M) bf16 pre-norm, scale/shift: (N, C, 1) f32
    -> (N, G, C, M) bf16 post-activation (SiLU(InstanceNorm(y)))."""
    N, G, C, M = y.shape
    budget = _vmem_budget()
    mt = _pick_tile(M, 4096 if budget >= (96 << 20) else 2048)
    while 8 * C * mt + (2 << 20) > budget and mt > 128:
        nxt = _pick_tile(M, max(128, mt // 2))
        if nxt >= mt:
            break
        mt = nxt
    return pl.pallas_call(
        _norm_silu_kernel,
        out_shape=jax.ShapeDtypeStruct((N, G, C, M), jnp.bfloat16),
        grid=(N, G, M // mt),
        in_specs=[
            pl.BlockSpec((1, 1, C, mt), lambda n, g, m: (n, g, 0, m)),
            pl.BlockSpec((1, C, 1), lambda n, g, m: (n, 0, 0)),
            pl.BlockSpec((1, C, 1), lambda n, g, m: (n, 0, 0)),
        ],
        out_specs=pl.BlockSpec((1, 1, C, mt), lambda n, g, m: (n, g, 0, m)),
        compiler_params=pltpu.CompilerParams(
            dimension_semantics=("parallel", "parallel", "parallel"),
            vmem_limit_bytes=budget,
        ),
    )(y, scale, shift)


# ----------------------------------------------------------------------------
# Glue: exact sub-pixel decomposition of ConvTranspose2d(k=4, s=2, p=1)
# ----------------------------------------------------------------------------
def _deconv_inputs(a, w_t):
    """a: (N, Cin, H, W) bf16 *post-activation* input (zero padding is exact
    for ConvTranspose2d).  w_t: torch ConvTranspose2d weight (Cin, Cout, 4, 4).

    Output parity (py, px):
      y[2h+py, 2w+px, co] = sum_{dy,dx,ci} apad[h+py+dy, w+px+dx, ci]
                                           * w_t[ci, co, 3-py-2dy, 3-px-2dx]
    Returns patches (N, 4, 4*Cin, H*W) bf16 and weights (4, Cout, 4*Cin) bf16.
    """
    # TODO(synk): gather the 4 taps in-kernel (halo DMA) instead of
    # materializing the 16x patches tensor — the remaining dominant HBM cost.
    N, Cin, H, W = a.shape
    Cout = w_t.shape[1]
    apad = jnp.pad(a, ((0, 0), (0, 0), (1, 1), (1, 1)))
    pats, wmats = [], []
    for py in (0, 1):
        for px in (0, 1):
            taps = [apad[:, :, py + dy:py + dy + H, px + dx:px + dx + W]
                    for dy in (0, 1) for dx in (0, 1)]
            p = jnp.stack(taps, axis=1)                      # (N, 4, Cin, H, W)
            pats.append(p.reshape(N, 4 * Cin, H * W))
            # kernel taps for this parity: ky = [3-py, 1-py], kx = [3-px, 1-px]
            sub = w_t[:, :, (3 - py)::-2, (3 - px)::-2]      # (Cin, Cout, 2, 2)
            wmats.append(jnp.transpose(sub, (1, 2, 3, 0)).reshape(Cout, 4 * Cin))
    patches = jnp.stack(pats, axis=1).astype(jnp.bfloat16)   # (N, 4, 4Cin, HW)
    w = jnp.stack(wmats, axis=0).astype(jnp.bfloat16)        # (4, Cout, 4Cin)
    return patches, w


def _pixel_shuffle(y, H, W):
    """(N, 4, C, H*W) parity-blocked -> (N, C, 2H, 2W)."""
    N, _, C, _ = y.shape
    yr = y.reshape(N, 2, 2, C, H, W)                         # (py, px)
    return jnp.transpose(yr, (0, 3, 4, 1, 5, 2)).reshape(N, C, 2 * H, 2 * W)


# ----------------------------------------------------------------------------
# VitHead forward (NCHW in, NCHW out)
# ----------------------------------------------------------------------------
def vit_head_forward(x_nchw, params):
    N = x_nchw.shape[0]

    # --- deconv stages: ConvTranspose2d(4,2,1) -> InstanceNorm2d -> SiLU ----
    a = x_nchw.astype(jnp.bfloat16)              # (N, C, H, W), spatial layout
    H, W = a.shape[2], a.shape[3]
    y = scale = shift = None
    for idx, w_t in enumerate(params["deconv_weights"]):
        if idx > 0:
            # One-shot InstanceNorm+SiLU of the previous deconv output (bf16),
            # then pixel-shuffle its parity-blocked layout to spatial so this
            # stage can extract its sub-pixel taps.
            a_par = _norm_silu(y, scale, shift)              # (N,4,C,H*W) bf16
            a = _pixel_shuffle(a_par, H, W)                  # (N,C,2H,2W) bf16
            H, W = 2 * H, 2 * W
        patches, w = _deconv_inputs(a, w_t)
        Cout = w_t.shape[1]
        K = patches.shape[2]
        ones = jnp.ones((N, K, 1), jnp.float32)              # unused (no act)
        zeros = jnp.zeros((N, K, 1), jnp.float32)
        bias = jnp.zeros((Cout, 1), jnp.float32)
        y, scale, shift = _run_stage(patches, ones, zeros, w, bias,
                                     apply_act=False)
    # y: (N, 4, C_last, H*W) parity-blocked pre-norm output of the last deconv
    # (spatially a (2H, 2W) map).  The 1x1 stages are pointwise, so they run
    # directly on this layout — only the final output is pixel-shuffled.

    # --- 1x1 conv stages: Conv2d(1x1) -> InstanceNorm2d -> SiLU -------------
    # The producer's norm+SiLU is applied on the fly inside the consumer's
    # matmul kernel: each element is read exactly once, so no redundant EUP
    # work and no extra HBM pass.
    for w_c in params["conv_weights"]:
        Cout = w_c.shape[0]
        w = w_c[:, :, 0, 0][None].astype(jnp.bfloat16)       # (1, Cout, Cin)
        bias = jnp.zeros((Cout, 1), jnp.float32)
        y, scale, shift = _run_stage(y, scale, shift, w, bias, apply_act=True)

    # --- pred_conv: 1x1 conv + bias (consumes the last norm+SiLU on the fly)
    w = params["pred_w"][:, :, 0, 0][None].astype(jnp.bfloat16)
    bias = params["pred_b"].reshape(-1, 1).astype(jnp.float32)
    y, _, _ = _run_stage(y, scale, shift, w, bias, apply_act=True,
                         out_dtype=jnp.float32)
    return _pixel_shuffle(y, H, W)                           # (N, ncls, 2H, 2W)


# ----------------------------------------------------------------------------
# Deterministic parameter init (same shapes as the module, scaled-down config)
# ----------------------------------------------------------------------------
def init_params(key, inplanes, deconv_planes, conv_planes, num_classes):
    params = {"deconv_weights": [], "conv_weights": []}
    cin = inplanes
    for planes in deconv_planes:
        key, k1 = jax.random.split(key)
        w = jax.random.normal(k1, (cin, planes, 4, 4), jnp.float32)
        params["deconv_weights"].append(w * (1.0 / (cin * 16) ** 0.5))
        cin = planes
    for planes in conv_planes:
        key, k1 = jax.random.split(key)
        w = jax.random.normal(k1, (planes, cin, 1, 1), jnp.float32)
        params["conv_weights"].append(w * (1.0 / cin ** 0.5))
        cin = planes
    key, k1, k2 = jax.random.split(key, 3)
    params["pred_w"] = jax.random.normal(
        k1, (num_classes, cin, 1, 1), jnp.float32) * (1.0 / cin ** 0.5)
    params["pred_b"] = jax.random.normal(k2, (num_classes,), jnp.float32) * 0.01
    return params


if __name__ == "__main__":
    # Small config consistent with VitHead's structure:
    #   4 deconv stages (k=4, s=2, p=1) -> spatial x16, then 4 1x1 conv stages,
    #   then 1x1 pred conv with bias.
    batch = 2
    inplanes = 32
    deconv_planes = (16, 16, 8, 8)
    conv_planes = (8, 8, 8, 8)
    num_classes = 6
    H = W = 4   # input spatial -> output spatial 64x64

    key = jax.random.PRNGKey(0)
    kx, kp = jax.random.split(key)
    x = jax.random.normal(kx, (batch, inplanes, H, W), jnp.float32)  # NCHW
    params = init_params(kp, inplanes, deconv_planes, conv_planes, num_classes)

    fwd = jax.jit(vit_head_forward)
    out = jax.block_until_ready(fwd(x, params))
    assert out.shape == (batch, num_classes, H * 16, W * 16), out.shape
    assert bool(jnp.all(jnp.isfinite(out)))
    print("KERNEL_OK")
</pallas_src>

<mosaic_0001>
module attributes {stable_mosaic.version = 11 : i64} {
  func.func @_norm_silu_kernel(%arg0: i32, %arg1: i32, %arg2: i32, %arg3: memref<1x1x16x16xbf16, #tpu.memory_space<vmem>>, %arg4: memref<1x16x1xf32, #tpu.memory_space<vmem>>, %arg5: memref<1x16x1xf32, #tpu.memory_space<vmem>>, %arg6: memref<1x1x16x16xbf16, #tpu.memory_space<vmem>>) attributes {dimension_semantics = [#tpu.dimension_semantics<parallel>, #tpu.dimension_semantics<parallel>, #tpu.dimension_semantics<parallel>], iteration_bounds = array<i64: 2, 4, 1>, scalar_prefetch = 0 : i64, scratch_operands = 0 : i64, tpu.core_type = #tpu.core_type<tc>, window_params = [{transform_indices = @transform_0, window_bounds = array<i64: 1, 1, 16, 16>}, {transform_indices = @transform_1, window_bounds = array<i64: 1, 16, 1>}, {transform_indices = @transform_2, window_bounds = array<i64: 1, 16, 1>}, {transform_indices = @transform_3, window_bounds = array<i64: 1, 1, 16, 16>}]} {
    %c0 = arith.constant 0 : index
    %c0_0 = arith.constant 0 : index
    %c0_1 = arith.constant 0 : index
    %c0_2 = arith.constant 0 : index
    %0 = vector.load %arg3[%c0, %c0_0, %c0_1, %c0_2] : memref<1x1x16x16xbf16, #tpu.memory_space<vmem>>, vector<1x1x16x16xbf16>
    %1 = vector.shape_cast %0 : vector<1x1x16x16xbf16> to vector<16x16xbf16>
    %2 = arith.extf %1 : vector<16x16xbf16> to vector<16x16xf32>
    %c0_3 = arith.constant 0 : index
    %c0_4 = arith.constant 0 : index
    %c0_5 = arith.constant 0 : index
    %3 = vector.load %arg4[%c0_3, %c0_4, %c0_5] : memref<1x16x1xf32, #tpu.memory_space<vmem>>, vector<1x16x1xf32>
    %4 = vector.shape_cast %3 : vector<1x16x1xf32> to vector<16x1xf32>
    %5 = vector.broadcast %4 : vector<16x1xf32> to vector<16x16xf32>
    %6 = arith.mulf %2, %5 : vector<16x16xf32>
    %c0_6 = arith.constant 0 : index
    %c0_7 = arith.constant 0 : index
    %c0_8 = arith.constant 0 : index
    %7 = vector.load %arg5[%c0_6, %c0_7, %c0_8] : memref<1x16x1xf32, #tpu.memory_space<vmem>>, vector<1x16x1xf32>
    %8 = vector.shape_cast %7 : vector<1x16x1xf32> to vector<16x1xf32>
    %9 = vector.broadcast %8 : vector<16x1xf32> to vector<16x16xf32>
    %10 = arith.addf %6, %9 : vector<16x16xf32>
    %cst = arith.constant 0.000000e+00 : f32
    %11 = vector.broadcast %cst : f32 to vector<16x16xf32>
    %12 = arith.subf %11, %10 : vector<16x16xf32>
    %13 = math.exp %12 : vector<16x16xf32>
    %cst_9 = arith.constant 1.000000e+00 : f32
    %14 = vector.broadcast %cst_9 : f32 to vector<16x16xf32>
    %15 = arith.addf %14, %13 : vector<16x16xf32>
    %16 = tpu.reciprocal %15 {approx = true} : vector<16x16xf32> -> vector<16x16xf32>
    %17 = arith.mulf %10, %16 : vector<16x16xf32>
    %18 = arith.truncf %17 : vector<16x16xf32> to vector<16x16xbf16>
    %c0_10 = arith.constant 0 : index
    %c0_11 = arith.constant 0 : index
    %c0_12 = arith.constant 0 : index
    %c0_13 = arith.constant 0 : index
    %19 = vector.load %arg6[%c0_10, %c0_11, %c0_12, %c0_13] : memref<1x1x16x16xbf16, #tpu.memory_space<vmem>>, vector<1x1x16x16xbf16>
    %20 = vector.shape_cast %19 : vector<1x1x16x16xbf16> to vector<16x16xbf16>
    %21 = vector.shape_cast %18 : vector<16x16xbf16> to vector<1x1x16x16xbf16>
    tpu.vector_store %arg6[%c0_10, %c0_11, %c0_12, %c0_13], %21 {strides = array<i32>} : memref<1x1x16x16xbf16, #tpu.memory_space<vmem>>, vector<1x1x16x16xbf16>,
    return
  }
  func.func @transform_0(%arg0: i32, %arg1: i32, %arg2: i32) -> (i32, i32, i32, i32) {
    %c0_i32 = arith.constant 0 : i32
    %c0_i32_0 = arith.constant 0 : i32
    return %arg0, %arg1, %c0_i32, %arg2 : i32, i32, i32, i32
  }
  func.func @transform_1(%arg0: i32, %arg1: i32, %arg2: i32) -> (i32, i32, i32) {
    %c0_i32 = arith.constant 0 : i32
    %c0_i32_0 = arith.constant 0 : i32
    %c0_i32_1 = arith.constant 0 : i32
    return %arg0, %c0_i32, %c0_i32_0 : i32, i32, i32
  }
  func.func @transform_2(%arg0: i32, %arg1: i32, %arg2: i32) -> (i32, i32, i32) {
    %c0_i32 = arith.constant 0 : i32
    %c0_i32_0 = arith.constant 0 : i32
    %c0_i32_1 = arith.constant 0 : i32
    return %arg0, %c0_i32, %c0_i32_0 : i32, i32, i32
  }
  func.func @transform_3(%arg0: i32, %arg1: i32, %arg2: i32) -> (i32, i32, i32, i32) {
    %c0_i32 = arith.constant 0 : i32
    %c0_i32_0 = arith.constant 0 : i32
    return %arg0, %arg1, %c0_i32, %arg2 : i32, i32, i32, i32
  }
}

module attributes {stable_mosaic.version = 11 : i64} {
  func.func @_stage_kernel(%arg0: i32, %arg1: i32, %arg2: i32, %arg3: i32, %arg4: memref<1x1x128x16xbf16, #tpu.memory_space<vmem>>, %arg5: memref<1x128x1xf32, #tpu.memory_space<vmem>>, %arg6: memref<1x128x1xf32, #tpu.memory_space<vmem>>, %arg7: memref<1x16x128xbf16, #tpu.memory_space<vmem>>, %arg8: memref<16x1xf32, #tpu.memory_space<vmem>>, %arg9: memref<1x1x16x16xbf16, #tpu.memory_space<vmem>>, %arg10: memref<1x16x1xf32, #tpu.memory_space<vmem>>, %arg11: memref<1x16x1xf32, #tpu.memory_space<vmem>>, %arg12: memref<16x16xf32, #tpu.memory_space<vmem>>, %arg13: memref<16x1xf32, #tpu.memory_space<vmem>>, %arg14: memref<16x1xf32, #tpu.memory_space<vmem>>) attributes {dimension_semantics = [#tpu.dimension_semantics<parallel>, #tpu.dimension_semantics<arbitrary>, #tpu.dimension_semantics<arbitrary>, #tpu.dimension_semantics<arbitrary>], iteration_bounds = array<i64: 2, 4, 1, 1>, scalar_prefetch = 0 : i64, scratch_operands = 3 : i64, tpu.core_type = #tpu.core_type<tc>, window_params = [{transform_indices = @transform_0, window_bounds = array<i64: 1, 1, 128, 16>}, {transform_indices = @transform_1, window_bounds = array<i64: 1, 128, 1>}, {transform_indices = @transform_2, window_bounds = array<i64: 1, 128, 1>}, {transform_indices = @transform_3, window_bounds = array<i64: 1, 16, 128>}, {pipeline_mode = #tpu.pipeline_mode<synchronous>, transform_indices = @transform_4, window_bounds = array<i64: 16, 1>}, {transform_indices = @transform_5, window_bounds = array<i64: 1, 1, 16, 16>}, {transform_indices = @transform_6, window_bounds = array<i64: 1, 16, 1>}, {transform_indices = @transform_7, window_bounds = array<i64: 1, 16, 1>}]} {
    %c0_i32 = arith.constant 0 : i32
    %0 = arith.cmpi eq, %arg1, %c0_i32 : i32
    %c0_i32_0 = arith.constant 0 : i32
    %1 = arith.cmpi eq, %arg2, %c0_i32_0 : i32
    %2 = arith.andi %0, %1 : i1
    %c0_i32_1 = arith.constant 0 : i32
    %3 = arith.cmpi eq, %arg3, %c0_i32_1 : i32
    %4 = arith.andi %2, %3 : i1
    %5 = arith.extui %4 : i1 to i32
    %c0_i32_2 = arith.constant 0 : i32
    %6 = arith.cmpi ne, %5, %c0_i32_2 : i32
    scf.if %6 {
      %cst_18 = arith.constant 0.000000e+00 : f32
      %28 = vector.broadcast %cst_18 : f32 to vector<16x1xf32>
      %c0_19 = arith.constant 0 : index
      %c0_20 = arith.constant 0 : index
      %29 = vector.load %arg13[%c0_19, %c0_20] : memref<16x1xf32, #tpu.memory_space<vmem>>, vector<16x1xf32>
      tpu.vector_store %arg13[%c0_19, %c0_20], %28 {strides = array<i32>} : memref<16x1xf32, #tpu.memory_space<vmem>>, vector<16x1xf32>,
      %cst_21 = arith.constant 0.000000e+00 : f32
      %30 = vector.broadcast %cst_21 : f32 to vector<16x1xf32>
      %c0_22 = arith.constant 0 : index
      %c0_23 = arith.constant 0 : index
      %31 = vector.load %arg14[%c0_22, %c0_23] : memref<16x1xf32, #tpu.memory_space<vmem>>, vector<16x1xf32>
      tpu.vector_store %arg14[%c0_22, %c0_23], %30 {strides = array<i32>} : memref<16x1xf32, #tpu.memory_space<vmem>>, vector<16x1xf32>,
    } else {
    }
    %c0 = arith.constant 0 : index
    %c0_3 = arith.constant 0 : index
    %c0_4 = arith.constant 0 : index
    %c0_5 = arith.constant 0 : index
    %7 = vector.load %arg4[%c0, %c0_3, %c0_4, %c0_5] : memref<1x1x128x16xbf16, #tpu.memory_space<vmem>>, vector<1x1x128x16xbf16>
    %8 = vector.shape_cast %7 : vector<1x1x128x16xbf16> to vector<128x16xbf16>
    %c0_6 = arith.constant 0 : index
    %c0_7 = arith.constant 0 : index
    %c0_8 = arith.constant 0 : index
    %9 = vector.load %arg7[%c0_6, %c0_7, %c0_8] : memref<1x16x128xbf16, #tpu.memory_space<vmem>>, vector<1x16x128xbf16>
    %10 = vector.shape_cast %9 : vector<1x16x128xbf16> to vector<16x128xbf16>
    %cst = arith.constant dense<0.000000e+00> : vector<16x16xf32>
    %11 = tpu.matmul %10, %8, %cst {dimension_numbers = #tpu.dot_dimension_numbers<[1], [0], [0], [1], [0, 0, 1, 1], [], []>} : vector<16x128xbf16>, vector<128x16xbf16>, vector<16x16xf32> -> vector<16x16xf32>
    %c0_i32_9 = arith.constant 0 : i32
    %12 = arith.cmpi eq, %arg3, %c0_i32_9 : i32
    %13 = arith.extui %12 : i1 to i32
    %c0_i32_10 = arith.constant 0 : i32
    %14 = arith.cmpi ne, %13, %c0_i32_10 : i32
    scf.if %14 {
      %c0_18 = arith.constant 0 : index
      %c0_19 = arith.constant 0 : index
      %28 = vector.load %arg8[%c0_18, %c0_19] : memref<16x1xf32, #tpu.memory_space<vmem>>, vector<16x1xf32>
      %29 = vector.broadcast %28 : vector<16x1xf32> to vector<16x16xf32>
      %30 = arith.addf %11, %29 : vector<16x16xf32>
      %c0_20 = arith.constant 0 : index
      %c0_21 = arith.constant 0 : index
      %31 = vector.load %arg12[%c0_20, %c0_21] : memref<16x16xf32, #tpu.memory_space<vmem>>, vector<16x16xf32>
      tpu.vector_store %arg12[%c0_20, %c0_21], %30 {strides = array<i32>} : memref<16x16xf32, #tpu.memory_space<vmem>>, vector<16x16xf32>,
    } else {
    }
    %c0_i32_11 = arith.constant 0 : i32
    %15 = arith.cmpi sgt, %arg3, %c0_i32_11 : i32
    %16 = arith.extui %15 : i1 to i32
    %c0_i32_12 = arith.constant 0 : i32
    %17 = arith.cmpi ne, %16, %c0_i32_12 : i32
    scf.if %17 {
      %c0_18 = arith.constant 0 : index
      %c0_19 = arith.constant 0 : index
      %28 = vector.load %arg12[%c0_18, %c0_19] : memref<16x16xf32, #tpu.memory_space<vmem>>, vector<16x16xf32>
      %29 = arith.addf %28, %11 : vector<16x16xf32>
      %c0_20 = arith.constant 0 : index
      %c0_21 = arith.constant 0 : index
      %30 = vector.load %arg12[%c0_20, %c0_21] : memref<16x16xf32, #tpu.memory_space<vmem>>, vector<16x16xf32>
      tpu.vector_store %arg12[%c0_20, %c0_21], %29 {strides = array<i32>} : memref<16x16xf32, #tpu.memory_space<vmem>>, vector<16x16xf32>,
    } else {
    }
    %c0_i32_13 = arith.constant 0 : i32
    %18 = arith.cmpi eq, %arg3, %c0_i32_13 : i32
    %19 = arith.extui %18 : i1 to i32
    %c0_i32_14 = arith.constant 0 : i32
    %20 = arith.cmpi ne, %19, %c0_i32_14 : i32
    scf.if %20 {
      %c0_18 = arith.constant 0 : index
      %c0_19 = arith.constant 0 : index
      %28 = vector.load %arg12[%c0_18, %c0_19] : memref<16x16xf32, #tpu.memory_space<vmem>>, vector<16x16xf32>
      %c0_20 = arith.constant 0 : index
      %c0_21 = arith.constant 0 : index
      %29 = vector.load %arg13[%c0_20, %c0_21] : memref<16x1xf32, #tpu.memory_space<vmem>>, vector<16x1xf32>
      %cst_22 = arith.constant dense<0.000000e+00> : vector<16xf32>
      %30 = vector.multi_reduction <add>, %28, %cst_22 [1] : vector<16x16xf32> to vector<16xf32>
      %31 = vector.shape_cast %30 : vector<16xf32> to vector<16x1xf32>
      %32 = arith.addf %29, %31 : vector<16x1xf32>
      %c0_23 = arith.constant 0 : index
      %c0_24 = arith.constant 0 : index
      %33 = vector.load %arg13[%c0_23, %c0_24] : memref<16x1xf32, #tpu.memory_space<vmem>>, vector<16x1xf32>
      tpu.vector_store %arg13[%c0_23, %c0_24], %32 {strides = array<i32>} : memref<16x1xf32, #tpu.memory_space<vmem>>, vector<16x1xf32>,
      %c0_25 = arith.constant 0 : index
      %c0_26 = arith.constant 0 : index
      %34 = vector.load %arg14[%c0_25, %c0_26] : memref<16x1xf32, #tpu.memory_space<vmem>>, vector<16x1xf32>
      %35 = arith.mulf %28, %28 : vector<16x16xf32>
      %cst_27 = arith.constant dense<0.000000e+00> : vector<16xf32>
      %36 = vector.multi_reduction <add>, %35, %cst_27 [1] : vector<16x16xf32> to vector<16xf32>
      %37 = vector.shape_cast %36 : vector<16xf32> to vector<16x1xf32>
      %38 = arith.addf %34, %37 : vector<16x1xf32>
      %c0_28 = arith.constant 0 : index
      %c0_29 = arith.constant 0 : index
      %39 = vector.load %arg14[%c0_28, %c0_29] : memref<16x1xf32, #tpu.memory_space<vmem>>, vector<16x1xf32>
      tpu.vector_store %arg14[%c0_28, %c0_29], %38 {strides = array<i32>} : memref<16x1xf32, #tpu.memory_space<vmem>>, vector<16x1xf32>,
      %40 = arith.truncf %28 : vector<16x16xf32> to vector<16x16xbf16>
      %c0_30 = arith.constant 0 : index
      %c0_31 = arith.constant 0 : index
      %c0_32 = arith.constant 0 : index
      %c0_33 = arith.constant 0 : index
      %41 = vector.load %arg9[%c0_30, %c0_31, %c0_32, %c0_33] : memref<1x1x16x16xbf16, #tpu.memory_space<vmem>>, vector<1x1x16x16xbf16>
      %42 = vector.shape_cast %41 : vector<1x1x16x16xbf16> to vector<16x16xbf16>
      %43 = vector.shape_cast %40 : vector<16x16xbf16> to vector<1x1x16x16xbf16>
      tpu.vector_store %arg9[%c0_30, %c0_31, %c0_32, %c0_33], %43 {strides = array<i32>} : memref<1x1x16x16xbf16, #tpu.memory_space<vmem>>, vector<1x1x16x16xbf16>,
    } else {
    }
    %c3_i32 = arith.constant 3 : i32
    %21 = arith.cmpi eq, %arg1, %c3_i32 : i32
    %c0_i32_15 = arith.constant 0 : i32
    %22 = arith.cmpi eq, %arg2, %c0_i32_15 : i32
    %23 = arith.andi %21, %22 : i1
    %c0_i32_16 = arith.constant 0 : i32
    %24 = arith.cmpi eq, %arg3, %c0_i32_16 : i32
    %25 = arith.andi %23, %24 : i1
    %26 = arith.extui %25 : i1 to i32
    %c0_i32_17 = arith.constant 0 : i32
    %27 = arith.cmpi ne, %26, %c0_i32_17 : i32
    scf.if %27 {
      %c0_18 = arith.constant 0 : index
      %c0_19 = arith.constant 0 : index
      %28 = vector.load %arg13[%c0_18, %c0_19] : memref<16x1xf32, #tpu.memory_space<vmem>>, vector<16x1xf32>
      %cst_20 = arith.constant 1.562500e-02 : f32
      %29 = vector.broadcast %cst_20 : f32 to vector<16x1xf32>
      %30 = arith.mulf %28, %29 : vector<16x1xf32>
      %c0_21 = arith.constant 0 : index
      %c0_22 = arith.constant 0 : index
      %31 = vector.load %arg14[%c0_21, %c0_22] : memref<16x1xf32, #tpu.memory_space<vmem>>, vector<16x1xf32>
      %cst_23 = arith.constant 1.562500e-02 : f32
      %32 = vector.broadcast %cst_23 : f32 to vector<16x1xf32>
      %33 = arith.mulf %31, %32 : vector<16x1xf32>
      %34 = arith.mulf %30, %30 : vector<16x1xf32>
      %35 = arith.subf %33, %34 : vector<16x1xf32>
      %cst_24 = arith.constant 0.000000e+00 : f32
      %36 = vector.broadcast %cst_24 : f32 to vector<16x1xf32>
      %37 = arith.maximumf %35, %36 : vector<16x1xf32>
      %cst_25 = arith.constant 9.99999974E-6 : f32
      %38 = vector.broadcast %cst_25 : f32 to vector<16x1xf32>
      %39 = arith.addf %37, %38 : vector<16x1xf32>
      %40 = math.rsqrt %39 : vector<16x1xf32>
      %c0_26 = arith.constant 0 : index
      %c0_27 = arith.constant 0 : index
      %c0_28 = arith.constant 0 : index
      %41 = vector.load %arg10[%c0_26, %c0_27, %c0_28] : memref<1x16x1xf32, #tpu.memory_space<vmem>>, vector<1x16x1xf32>
      %42 = vector.shape_cast %41 : vector<1x16x1xf32> to vector<16x1xf32>
      %43 = vector.shape_cast %40 : vector<16x1xf32> to vector<1x16x1xf32>
      tpu.vector_store %arg10[%c0_26, %c0_27, %c0_28], %43 {strides = array<i32>} : memref<1x16x1xf32, #tpu.memory_space<vmem>>, vector<1x16x1xf32>,
      %cst_29 = arith.constant 0.000000e+00 : f32
      %44 = vector.broadcast %cst_29 : f32 to vector<16x1xf32>
      %45 = arith.subf %44, %30 : vector<16x1xf32>
      %46 = arith.mulf %45, %40 : vector<16x1xf32>
      %c0_30 = arith.constant 0 : index
      %c0_31 = arith.constant 0 : index
      %c0_32 = arith.constant 0 : index
      %47 = vector.load %arg11[%c0_30, %c0_31, %c0_32] : memref<1x16x1xf32, #tpu.memory_space<vmem>>, vector<1x16x1xf32>
      %48 = vector.shape_cast %47 : vector<1x16x1xf32> to vector<16x1xf32>
      %49 = vector.shape_cast %46 : vector<16x1xf32> to vector<1x16x1xf32>
      tpu.vector_store %arg11[%c0_30, %c0_31, %c0_32], %49 {strides = array<i32>} : memref<1x16x1xf32, #tpu.memory_space<vmem>>, vector<1x16x1xf32>,
    } else {
    }
    return
  }
  func.func @transform_0(%arg0: i32, %arg1: i32, %arg2: i32, %arg3: i32) -> (i32, i32, i32, i32) {
    %c0_i32 = arith.constant 0 : i32
    return %arg0, %arg1, %arg3, %arg2 : i32, i32, i32, i32
  }
  func.func @transform_1(%arg0: i32, %arg1: i32, %arg2: i32, %arg3: i32) -> (i32, i32, i32) {
    %c0_i32 = arith.constant 0 : i32
    %c0_i32_0 = arith.constant 0 : i32
    return %arg0, %arg3, %c0_i32 : i32, i32, i32
  }
  func.func @transform_2(%arg0: i32, %arg1: i32, %arg2: i32, %arg3: i32) -> (i32, i32, i32) {
    %c0_i32 = arith.constant 0 : i32
    %c0_i32_0 = arith.constant 0 : i32
    return %arg0, %arg3, %c0_i32 : i32, i32, i32
  }
  func.func @transform_3(%arg0: i32, %arg1: i32, %arg2: i32, %arg3: i32) -> (i32, i32, i32) {
    %c0_i32 = arith.constant 0 : i32
    %c0_i32_0 = arith.constant 0 : i32
    return %arg1, %c0_i32, %arg3 : i32, i32, i32
  }
  func.func @transform_4(%arg0: i32, %arg1: i32, %arg2: i32, %arg3: i32) -> (i32, i32) {
    %c0_i32 = arith.constant 0 : i32
    %c0_i32_0 = arith.constant 0 : i32
    %c0_i32_1 = arith.constant 0 : i32
    return %c0_i32, %c0_i32_0 : i32, i32
  }
  func.func @transform_5(%arg0: i32, %arg1: i32, %arg2: i32, %arg3: i32) -> (i32, i32, i32, i32) {
    %c0_i32 = arith.constant 0 : i32
    %c0_i32_0 = arith.constant 0 : i32
    return %arg0, %arg1, %c0_i32, %arg2 : i32, i32, i32, i32
  }
  func.func @transform_6(%arg0: i32, %arg1: i32, %arg2: i32, %arg3: i32) -> (i32, i32, i32) {
    %c0_i32 = arith.constant 0 : i32
    %c0_i32_0 = arith.constant 0 : i32
    %c0_i32_1 = arith.constant 0 : i32
    return %arg0, %c0_i32, %c0_i32_0 : i32, i32, i32
  }
  func.func @transform_7(%arg0: i32, %arg1: i32, %arg2: i32, %arg3: i32) -> (i32, i32, i32) {
    %c0_i32 = arith.constant 0 : i32
    %c0_i32_0 = arith.constant 0 : i32
    %c0_i32_1 = arith.constant 0 : i32
    return %arg0, %c0_i32, %c0_i32_0 : i32, i32, i32
  }
}

module attributes {stable_mosaic.version = 11 : i64} {
  func.func @_stage_kernel(%arg0: i32, %arg1: i32, %arg2: i32, %arg3: i32, %arg4: memref<1x1x64x64xbf16, #tpu.memory_space<vmem>>, %arg5: memref<1x64x1xf32, #tpu.memory_space<vmem>>, %arg6: memref<1x64x1xf32, #tpu.memory_space<vmem>>, %arg7: memref<1x16x64xbf16, #tpu.memory_space<vmem>>, %arg8: memref<16x1xf32, #tpu.memory_space<vmem>>, %arg9: memref<1x1x16x64xbf16, #tpu.memory_space<vmem>>, %arg10: memref<1x16x1xf32, #tpu.memory_space<vmem>>, %arg11: memref<1x16x1xf32, #tpu.memory_space<vmem>>, %arg12: memref<16x64xf32, #tpu.memory_space<vmem>>, %arg13: memref<16x1xf32, #tpu.memory_space<vmem>>, %arg14: memref<16x1xf32, #tpu.memory_space<vmem>>) attributes {dimension_semantics = [#tpu.dimension_semantics<parallel>, #tpu.dimension_semantics<arbitrary>, #tpu.dimension_semantics<arbitrary>, #tpu.dimension_semantics<arbitrary>], iteration_bounds = array<i64: 2, 4, 1, 1>, scalar_prefetch = 0 : i64, scratch_operands = 3 : i64, tpu.core_type = #tpu.core_type<tc>, window_params = [{transform_indices = @transform_0, window_bounds = array<i64: 1, 1, 64, 64>}, {transform_indices = @transform_1, window_bounds = array<i64: 1, 64, 1>}, {transform_indices = @transform_2, window_bounds = array<i64: 1, 64, 1>}, {transform_indices = @transform_3, window_bounds = array<i64: 1, 16, 64>}, {pipeline_mode = #tpu.pipeline_mode<synchronous>, transform_indices = @transform_4, window_bounds = array<i64: 16, 1>}, {transform_indices = @transform_5, window_bounds = array<i64: 1, 1, 16, 64>}, {transform_indices = @transform_6, window_bounds = array<i64: 1, 16, 1>}, {transform_indices = @transform_7, window_bounds = array<i64: 1, 16, 1>}]} {
    %c0_i32 = arith.constant 0 : i32
    %0 = arith.cmpi eq, %arg1, %c0_i32 : i32
    %c0_i32_0 = arith.constant 0 : i32
    %1 = arith.cmpi eq, %arg2, %c0_i32_0 : i32
    %2 = arith.andi %0, %1 : i1
    %c0_i32_1 = arith.constant 0 : i32
    %3 = arith.cmpi eq, %arg3, %c0_i32_1 : i32
    %4 = arith.andi %2, %3 : i1
    %5 = arith.extui %4 : i1 to i32
    %c0_i32_2 = arith.constant 0 : i32
    %6 = arith.cmpi ne, %5, %c0_i32_2 : i32
    scf.if %6 {
      %cst_18 = arith.constant 0.000000e+00 : f32
      %28 = vector.broadcast %cst_18 : f32 to vector<16x1xf32>
      %c0_19 = arith.constant 0 : index
      %c0_20 = arith.constant 0 : index
      %29 = vector.load %arg13[%c0_19, %c0_20] : memref<16x1xf32, #tpu.memory_space<vmem>>, vector<16x1xf32>
      tpu.vector_store %arg13[%c0_19, %c0_20], %28 {strides = array<i32>} : memref<16x1xf32, #tpu.memory_space<vmem>>, vector<16x1xf32>,
      %cst_21 = arith.constant 0.000000e+00 : f32
      %30 = vector.broadcast %cst_21 : f32 to vector<16x1xf32>
      %c0_22 = arith.constant 0 : index
      %c0_23 = arith.constant 0 : index
      %31 = vector.load %arg14[%c0_22, %c0_23] : memref<16x1xf32, #tpu.memory_space<vmem>>, vector<16x1xf32>
      tpu.vector_store %arg14[%c0_22, %c0_23], %30 {strides = array<i32>} : memref<16x1xf32, #tpu.memory_space<vmem>>, vector<16x1xf32>,
    } else {
    }
    %c0 = arith.constant 0 : index
    %c0_3 = arith.constant 0 : index
    %c0_4 = arith.constant 0 : index
    %c0_5 = arith.constant 0 : index
    %7 = vector.load %arg4[%c0, %c0_3, %c0_4, %c0_5] : memref<1x1x64x64xbf16, #tpu.memory_space<vmem>>, vector<1x1x64x64xbf16>
    %8 = vector.shape_cast %7 : vector<1x1x64x64xbf16> to vector<64x64xbf16>
    %c0_6 = arith.constant 0 : index
    %c0_7 = arith.constant 0 : index
    %c0_8 = arith.constant 0 : index
    %9 = vector.load %arg7[%c0_6, %c0_7, %c0_8] : memref<1x16x64xbf16, #tpu.memory_space<vmem>>, vector<1x16x64xbf16>
    %10 = vector.shape_cast %9 : vector<1x16x64xbf16> to vector<16x64xbf16>
    %cst = arith.constant dense<0.000000e+00> : vector<16x64xf32>
    %11 = tpu.matmul %10, %8, %cst {dimension_numbers = #tpu.dot_dimension_numbers<[1], [0], [0], [1], [0, 0, 1, 1], [], []>} : vector<16x64xbf16>, vector<64x64xbf16>, vector<16x64xf32> -> vector<16x64xf32>
    %c0_i32_9 = arith.constant 0 : i32
    %12 = arith.cmpi eq, %arg3, %c0_i32_9 : i32
    %13 = arith.extui %12 : i1 to i32
    %c0_i32_10 = arith.constant 0 : i32
    %14 = arith.cmpi ne, %13, %c0_i32_10 : i32
    scf.if %14 {
      %c0_18 = arith.constant 0 : index
      %c0_19 = arith.constant 0 : index
      %28 = vector.load %arg8[%c0_18, %c0_19] : memref<16x1xf32, #tpu.memory_space<vmem>>, vector<16x1xf32>
      %29 = vector.broadcast %28 : vector<16x1xf32> to vector<16x64xf32>
      %30 = arith.addf %11, %29 : vector<16x64xf32>
      %c0_20 = arith.constant 0 : index
      %c0_21 = arith.constant 0 : index
      %31 = vector.load %arg12[%c0_20, %c0_21] : memref<16x64xf32, #tpu.memory_space<vmem>>, vector<16x64xf32>
      tpu.vector_store %arg12[%c0_20, %c0_21], %30 {strides = array<i32>} : memref<16x64xf32, #tpu.memory_space<vmem>>, vector<16x64xf32>,
    } else {
    }
    %c0_i32_11 = arith.constant 0 : i32
    %15 = arith.cmpi sgt, %arg3, %c0_i32_11 : i32
    %16 = arith.extui %15 : i1 to i32
    %c0_i32_12 = arith.constant 0 : i32
    %17 = arith.cmpi ne, %16, %c0_i32_12 : i32
    scf.if %17 {
      %c0_18 = arith.constant 0 : index
      %c0_19 = arith.constant 0 : index
      %28 = vector.load %arg12[%c0_18, %c0_19] : memref<16x64xf32, #tpu.memory_space<vmem>>, vector<16x64xf32>
      %29 = arith.addf %28, %11 : vector<16x64xf32>
      %c0_20 = arith.constant 0 : index
      %c0_21 = arith.constant 0 : index
      %30 = vector.load %arg12[%c0_20, %c0_21] : memref<16x64xf32, #tpu.memory_space<vmem>>, vector<16x64xf32>
      tpu.vector_store %arg12[%c0_20, %c0_21], %29 {strides = array<i32>} : memref<16x64xf32, #tpu.memory_space<vmem>>, vector<16x64xf32>,
    } else {
    }
    %c0_i32_13 = arith.constant 0 : i32
    %18 = arith.cmpi eq, %arg3, %c0_i32_13 : i32
    %19 = arith.extui %18 : i1 to i32
    %c0_i32_14 = arith.constant 0 : i32
    %20 = arith.cmpi ne, %19, %c0_i32_14 : i32
    scf.if %20 {
      %c0_18 = arith.constant 0 : index
      %c0_19 = arith.constant 0 : index
      %28 = vector.load %arg12[%c0_18, %c0_19] : memref<16x64xf32, #tpu.memory_space<vmem>>, vector<16x64xf32>
      %c0_20 = arith.constant 0 : index
      %c0_21 = arith.constant 0 : index
      %29 = vector.load %arg13[%c0_20, %c0_21] : memref<16x1xf32, #tpu.memory_space<vmem>>, vector<16x1xf32>
      %cst_22 = arith.constant dense<0.000000e+00> : vector<16xf32>
      %30 = vector.multi_reduction <add>, %28, %cst_22 [1] : vector<16x64xf32> to vector<16xf32>
      %31 = vector.shape_cast %30 : vector<16xf32> to vector<16x1xf32>
      %32 = arith.addf %29, %31 : vector<16x1xf32>
      %c0_23 = arith.constant 0 : index
      %c0_24 = arith.constant 0 : index
      %33 = vector.load %arg13[%c0_23, %c0_24] : memref<16x1xf32, #tpu.memory_space<vmem>>, vector<16x1xf32>
      tpu.vector_store %arg13[%c0_23, %c0_24], %32 {strides = array<i32>} : memref<16x1xf32, #tpu.memory_space<vmem>>, vector<16x1xf32>,
      %c0_25 = arith.constant 0 : index
      %c0_26 = arith.constant 0 : index
      %34 = vector.load %arg14[%c0_25, %c0_26] : memref<16x1xf32, #tpu.memory_space<vmem>>, vector<16x1xf32>
      %35 = arith.mulf %28, %28 : vector<16x64xf32>
      %cst_27 = arith.constant dense<0.000000e+00> : vector<16xf32>
      %36 = vector.multi_reduction <add>, %35, %cst_27 [1] : vector<16x64xf32> to vector<16xf32>
      %37 = vector.shape_cast %36 : vector<16xf32> to vector<16x1xf32>
      %38 = arith.addf %34, %37 : vector<16x1xf32>
      %c0_28 = arith.constant 0 : index
      %c0_29 = arith.constant 0 : index
      %39 = vector.load %arg14[%c0_28, %c0_29] : memref<16x1xf32, #tpu.memory_space<vmem>>, vector<16x1xf32>
      tpu.vector_store %arg14[%c0_28, %c0_29], %38 {strides = array<i32>} : memref<16x1xf32, #tpu.memory_space<vmem>>, vector<16x1xf32>,
      %40 = arith.truncf %28 : vector<16x64xf32> to vector<16x64xbf16>
      %c0_30 = arith.constant 0 : index
      %c0_31 = arith.constant 0 : index
      %c0_32 = arith.constant 0 : index
      %c0_33 = arith.constant 0 : index
      %41 = vector.load %arg9[%c0_30, %c0_31, %c0_32, %c0_33] : memref<1x1x16x64xbf16, #tpu.memory_space<vmem>>, vector<1x1x16x64xbf16>
      %42 = vector.shape_cast %41 : vector<1x1x16x64xbf16> to vector<16x64xbf16>
      %43 = vector.shape_cast %40 : vector<16x64xbf16> to vector<1x1x16x64xbf16>
      tpu.vector_store %arg9[%c0_30, %c0_31, %c0_32, %c0_33], %43 {strides = array<i32>} : memref<1x1x16x64xbf16, #tpu.memory_space<vmem>>, vector<1x1x16x64xbf16>,
    } else {
    }
    %c3_i32 = arith.constant 3 : i32
    %21 = arith.cmpi eq, %arg1, %c3_i32 : i32
    %c0_i32_15 = arith.constant 0 : i32
    %22 = arith.cmpi eq, %arg2, %c0_i32_15 : i32
    %23 = arith.andi %21, %22 : i1
    %c0_i32_16 = arith.constant 0 : i32
    %24 = arith.cmpi eq, %arg3, %c0_i32_16 : i32
    %25 = arith.andi %23, %24 : i1
    %26 = arith.extui %25 : i1 to i32
    %c0_i32_17 = arith.constant 0 : i32
    %27 = arith.cmpi ne, %26, %c0_i32_17 : i32
    scf.if %27 {
      %c0_18 = arith.constant 0 : index
      %c0_19 = arith.constant 0 : index
      %28 = vector.load %arg13[%c0_18, %c0_19] : memref<16x1xf32, #tpu.memory_space<vmem>>, vector<16x1xf32>
      %cst_20 = arith.constant 3.906250e-03 : f32
      %29 = vector.broadcast %cst_20 : f32 to vector<16x1xf32>
      %30 = arith.mulf %28, %29 : vector<16x1xf32>
      %c0_21 = arith.constant 0 : index
      %c0_22 = arith.constant 0 : index
      %31 = vector.load %arg14[%c0_21, %c0_22] : memref<16x1xf32, #tpu.memory_space<vmem>>, vector<16x1xf32>
      %cst_23 = arith.constant 3.906250e-03 : f32
      %32 = vector.broadcast %cst_23 : f32 to vector<16x1xf32>
      %33 = arith.mulf %31, %32 : vector<16x1xf32>
      %34 = arith.mulf %30, %30 : vector<16x1xf32>
      %35 = arith.subf %33, %34 : vector<16x1xf32>
      %cst_24 = arith.constant 0.000000e+00 : f32
      %36 = vector.broadcast %cst_24 : f32 to vector<16x1xf32>
      %37 = arith.maximumf %35, %36 : vector<16x1xf32>
      %cst_25 = arith.constant 9.99999974E-6 : f32
      %38 = vector.broadcast %cst_25 : f32 to vector<16x1xf32>
      %39 = arith.addf %37, %38 : vector<16x1xf32>
      %40 = math.rsqrt %39 : vector<16x1xf32>
      %c0_26 = arith.constant 0 : index
      %c0_27 = arith.constant 0 : index
      %c0_28 = arith.constant 0 : index
      %41 = vector.load %arg10[%c0_26, %c0_27, %c0_28] : memref<1x16x1xf32, #tpu.memory_space<vmem>>, vector<1x16x1xf32>
      %42 = vector.shape_cast %41 : vector<1x16x1xf32> to vector<16x1xf32>
      %43 = vector.shape_cast %40 : vector<16x1xf32> to vector<1x16x1xf32>
      tpu.vector_store %arg10[%c0_26, %c0_27, %c0_28], %43 {strides = array<i32>} : memref<1x16x1xf32, #tpu.memory_space<vmem>>, vector<1x16x1xf32>,
      %cst_29 = arith.constant 0.000000e+00 : f32
      %44 = vector.broadcast %cst_29 : f32 to vector<16x1xf32>
      %45 = arith.subf %44, %30 : vector<16x1xf32>
      %46 = arith.mulf %45, %40 : vector<16x1xf32>
      %c0_30 = arith.constant 0 : index
      %c0_31 = arith.constant 0 : index
      %c0_32 = arith.constant 0 : index
      %47 = vector.load %arg11[%c0_30, %c0_31, %c0_32] : memref<1x16x1xf32, #tpu.memory_space<vmem>>, vector<1x16x1xf32>
      %48 = vector.shape_cast %47 : vector<1x16x1xf32> to vector<16x1xf32>
      %49 = vector.shape_cast %46 : vector<16x1xf32> to vector<1x16x1xf32>
      tpu.vector_store %arg11[%c0_30, %c0_31, %c0_32], %49 {strides = array<i32>} : memref<1x16x1xf32, #tpu.memory_space<vmem>>, vector<1x16x1xf32>,
    } else {
    }
    return
  }
  func.func @transform_0(%arg0: i32, %arg1: i32, %arg2: i32, %arg3: i32) -> (i32, i32, i32, i32) {
    %c0_i32 = arith.constant 0 : i32
    return %arg0, %arg1, %arg3, %arg2 : i32, i32, i32, i32
  }
  func.func @transform_1(%arg0: i32, %arg1: i32, %arg2: i32, %arg3: i32) -> (i32, i32, i32) {
    %c0_i32 = arith.constant 0 : i32
    %c0_i32_0 = arith.constant 0 : i32
    return %arg0, %arg3, %c0_i32 : i32, i32, i32
  }
  func.func @transform_2(%arg0: i32, %arg1: i32, %arg2: i32, %arg3: i32) -> (i32, i32, i32) {
    %c0_i32 = arith.constant 0 : i32
    %c0_i32_0 = arith.constant 0 : i32
    return %arg0, %arg3, %c0_i32 : i32, i32, i32
  }
  func.func @transform_3(%arg0: i32, %arg1: i32, %arg2: i32, %arg3: i32) -> (i32, i32, i32) {
    %c0_i32 = arith.constant 0 : i32
    %c0_i32_0 = arith.constant 0 : i32
    return %arg1, %c0_i32, %arg3 : i32, i32, i32
  }
  func.func @transform_4(%arg0: i32, %arg1: i32, %arg2: i32, %arg3: i32) -> (i32, i32) {
    %c0_i32 = arith.constant 0 : i32
    %c0_i32_0 = arith.constant 0 : i32
    %c0_i32_1 = arith.constant 0 : i32
    return %c0_i32, %c0_i32_0 : i32, i32
  }
  func.func @transform_5(%arg0: i32, %arg1: i32, %arg2: i32, %arg3: i32) -> (i32, i32, i32, i32) {
    %c0_i32 = arith.constant 0 : i32
    %c0_i32_0 = arith.constant 0 : i32
    return %arg0, %arg1, %c0_i32, %arg2 : i32, i32, i32, i32
  }
  func.func @transform_6(%arg0: i32, %arg1: i32, %arg2: i32, %arg3: i32) -> (i32, i32, i32) {
    %c0_i32 = arith.constant 0 : i32
    %c0_i32_0 = arith.constant 0 : i32
    %c0_i32_1 = arith.constant 0 : i32
    return %arg0, %c0_i32, %c0_i32_0 : i32, i32, i32
  }
  func.func @transform_7(%arg0: i32, %arg1: i32, %arg2: i32, %arg3: i32) -> (i32, i32, i32) {
    %c0_i32 = arith.constant 0 : i32
    %c0_i32_0 = arith.constant 0 : i32
    %c0_i32_1 = arith.constant 0 : i32
    return %arg0, %c0_i32, %c0_i32_0 : i32, i32, i32
  }
}

module attributes {stable_mosaic.version = 11 : i64} {
  func.func @_norm_silu_kernel(%arg0: i32, %arg1: i32, %arg2: i32, %arg3: memref<1x1x16x64xbf16, #tpu.memory_space<vmem>>, %arg4: memref<1x16x1xf32, #tpu.memory_space<vmem>>, %arg5: memref<1x16x1xf32, #tpu.memory_space<vmem>>, %arg6: memref<1x1x16x64xbf16, #tpu.memory_space<vmem>>) attributes {dimension_semantics = [#tpu.dimension_semantics<parallel>, #tpu.dimension_semantics<parallel>, #tpu.dimension_semantics<parallel>], iteration_bounds = array<i64: 2, 4, 1>, scalar_prefetch = 0 : i64, scratch_operands = 0 : i64, tpu.core_type = #tpu.core_type<tc>, window_params = [{transform_indices = @transform_0, window_bounds = array<i64: 1, 1, 16, 64>}, {transform_indices = @transform_1, window_bounds = array<i64: 1, 16, 1>}, {transform_indices = @transform_2, window_bounds = array<i64: 1, 16, 1>}, {transform_indices = @transform_3, window_bounds = array<i64: 1, 1, 16, 64>}]} {
    %c0 = arith.constant 0 : index
    %c0_0 = arith.constant 0 : index
    %c0_1 = arith.constant 0 : index
    %c0_2 = arith.constant 0 : index
    %0 = vector.load %arg3[%c0, %c0_0, %c0_1, %c0_2] : memref<1x1x16x64xbf16, #tpu.memory_space<vmem>>, vector<1x1x16x64xbf16>
    %1 = vector.shape_cast %0 : vector<1x1x16x64xbf16> to vector<16x64xbf16>
    %2 = arith.extf %1 : vector<16x64xbf16> to vector<16x64xf32>
    %c0_3 = arith.constant 0 : index
    %c0_4 = arith.constant 0 : index
    %c0_5 = arith.constant 0 : index
    %3 = vector.load %arg4[%c0_3, %c0_4, %c0_5] : memref<1x16x1xf32, #tpu.memory_space<vmem>>, vector<1x16x1xf32>
    %4 = vector.shape_cast %3 : vector<1x16x1xf32> to vector<16x1xf32>
    %5 = vector.broadcast %4 : vector<16x1xf32> to vector<16x64xf32>
    %6 = arith.mulf %2, %5 : vector<16x64xf32>
    %c0_6 = arith.constant 0 : index
    %c0_7 = arith.constant 0 : index
    %c0_8 = arith.constant 0 : index
    %7 = vector.load %arg5[%c0_6, %c0_7, %c0_8] : memref<1x16x1xf32, #tpu.memory_space<vmem>>, vector<1x16x1xf32>
    %8 = vector.shape_cast %7 : vector<1x16x1xf32> to vector<16x1xf32>
    %9 = vector.broadcast %8 : vector<16x1xf32> to vector<16x64xf32>
    %10 = arith.addf %6, %9 : vector<16x64xf32>
    %cst = arith.constant 0.000000e+00 : f32
    %11 = vector.broadcast %cst : f32 to vector<16x64xf32>
    %12 = arith.subf %11, %10 : vector<16x64xf32>
    %13 = math.exp %12 : vector<16x64xf32>
    %cst_9 = arith.constant 1.000000e+00 : f32
    %14 = vector.broadcast %cst_9 : f32 to vector<16x64xf32>
    %15 = arith.addf %14, %13 : vector<16x64xf32>
    %16 = tpu.reciprocal %15 {approx = true} : vector<16x64xf32> -> vector<16x64xf32>
    %17 = arith.mulf %10, %16 : vector<16x64xf32>
    %18 = arith.truncf %17 : vector<16x64xf32> to vector<16x64xbf16>
    %c0_10 = arith.constant 0 : index
    %c0_11 = arith.constant 0 : index
    %c0_12 = arith.constant 0 : index
    %c0_13 = arith.constant 0 : index
    %19 = vector.load %arg6[%c0_10, %c0_11, %c0_12, %c0_13] : memref<1x1x16x64xbf16, #tpu.memory_space<vmem>>, vector<1x1x16x64xbf16>
    %20 = vector.shape_cast %19 : vector<1x1x16x64xbf16> to vector<16x64xbf16>
    %21 = vector.shape_cast %18 : vector<16x64xbf16> to vector<1x1x16x64xbf16>
    tpu.vector_store %arg6[%c0_10, %c0_11, %c0_12, %c0_13], %21 {strides = array<i32>} : memref<1x1x16x64xbf16, #tpu.memory_space<vmem>>, vector<1x1x16x64xbf16>,
    return
  }
  func.func @transform_0(%arg0: i32, %arg1: i32, %arg2: i32) -> (i32, i32, i32, i32) {
    %c0_i32 = arith.constant 0 : i32
    %c0_i32_0 = arith.constant 0 : i32
    return %arg0, %arg1, %c0_i32, %arg2 : i32, i32, i32, i32
  }
  func.func @transform_1(%arg0: i32, %arg1: i32, %arg2: i32) -> (i32, i32, i32) {
    %c0_i32 = arith.constant 0 : i32
    %c0_i32_0 = arith.constant 0 : i32
    %c0_i32_1 = arith.constant 0 : i32
    return %arg0, %c0_i32, %c0_i32_0 : i32, i32, i32
  }
  func.func @transform_2(%arg0: i32, %arg1: i32, %arg2: i32) -> (i32, i32, i32) {
    %c0_i32 = arith.constant 0 : i32
    %c0_i32_0 = arith.constant 0 : i32
    %c0_i32_1 = arith.constant 0 : i32
    return %arg0, %c0_i32, %c0_i32_0 : i32, i32, i32
  }
  func.func @transform_3(%arg0: i32, %arg1: i32, %arg2: i32) -> (i32, i32, i32, i32) {
    %c0_i32 = arith.constant 0 : i32
    %c0_i32_0 = arith.constant 0 : i32
    return %arg0, %arg1, %c0_i32, %arg2 : i32, i32, i32, i32
  }
}

module attributes {stable_mosaic.version = 11 : i64} {
  func.func @_stage_kernel(%arg0: i32, %arg1: i32, %arg2: i32, %arg3: i32, %arg4: memref<1x1x64x256xbf16, #tpu.memory_space<vmem>>, %arg5: memref<1x64x1xf32, #tpu.memory_space<vmem>>, %arg6: memref<1x64x1xf32, #tpu.memory_space<vmem>>, %arg7: memref<1x8x64xbf16, #tpu.memory_space<vmem>>, %arg8: memref<8x1xf32, #tpu.memory_space<vmem>>, %arg9: memref<1x1x8x256xbf16, #tpu.memory_space<vmem>>, %arg10: memref<1x8x1xf32, #tpu.memory_space<vmem>>, %arg11: memref<1x8x1xf32, #tpu.memory_space<vmem>>, %arg12: memref<8x256xf32, #tpu.memory_space<vmem>>, %arg13: memref<8x1xf32, #tpu.memory_space<vmem>>, %arg14: memref<8x1xf32, #tpu.memory_space<vmem>>) attributes {dimension_semantics = [#tpu.dimension_semantics<parallel>, #tpu.dimension_semantics<arbitrary>, #tpu.dimension_semantics<arbitrary>, #tpu.dimension_semantics<arbitrary>], iteration_bounds = array<i64: 2, 4, 1, 1>, scalar_prefetch = 0 : i64, scratch_operands = 3 : i64, tpu.core_type = #tpu.core_type<tc>, window_params = [{transform_indices = @transform_0, window_bounds = array<i64: 1, 1, 64, 256>}, {transform_indices = @transform_1, window_bounds = array<i64: 1, 64, 1>}, {transform_indices = @transform_2, window_bounds = array<i64: 1, 64, 1>}, {transform_indices = @transform_3, window_bounds = array<i64: 1, 8, 64>}, {pipeline_mode = #tpu.pipeline_mode<synchronous>, transform_indices = @transform_4, window_bounds = array<i64: 8, 1>}, {transform_indices = @transform_5, window_bounds = array<i64: 1, 1, 8, 256>}, {transform_indices = @transform_6, window_bounds = array<i64: 1, 8, 1>}, {transform_indices = @transform_7, window_bounds = array<i64: 1, 8, 1>}]} {
    %c0_i32 = arith.constant 0 : i32
    %0 = arith.cmpi eq, %arg1, %c0_i32 : i32
    %c0_i32_0 = arith.constant 0 : i32
    %1 = arith.cmpi eq, %arg2, %c0_i32_0 : i32
    %2 = arith.andi %0, %1 : i1
    %c0_i32_1 = arith.constant 0 : i32
    %3 = arith.cmpi eq, %arg3, %c0_i32_1 : i32
    %4 = arith.andi %2, %3 : i1
    %5 = arith.extui %4 : i1 to i32
    %c0_i32_2 = arith.constant 0 : i32
    %6 = arith.cmpi ne, %5, %c0_i32_2 : i32
    scf.if %6 {
      %cst_18 = arith.constant 0.000000e+00 : f32
      %28 = vector.broadcast %cst_18 : f32 to vector<8x1xf32>
      %c0_19 = arith.constant 0 : index
      %c0_20 = arith.constant 0 : index
      %29 = vector.load %arg13[%c0_19, %c0_20] : memref<8x1xf32, #tpu.memory_space<vmem>>, vector<8x1xf32>
      tpu.vector_store %arg13[%c0_19, %c0_20], %28 {strides = array<i32>} : memref<8x1xf32, #tpu.memory_space<vmem>>, vector<8x1xf32>,
      %cst_21 = arith.constant 0.000000e+00 : f32
      %30 = vector.broadcast %cst_21 : f32 to vector<8x1xf32>
      %c0_22 = arith.constant 0 : index
      %c0_23 = arith.constant 0 : index
      %31 = vector.load %arg14[%c0_22, %c0_23] : memref<8x1xf32, #tpu.memory_space<vmem>>, vector<8x1xf32>
      tpu.vector_store %arg14[%c0_22, %c0_23], %30 {strides = array<i32>} : memref<8x1xf32, #tpu.memory_space<vmem>>, vector<8x1xf32>,
    } else {
    }
    %c0 = arith.constant 0 : index
    %c0_3 = arith.constant 0 : index
    %c0_4 = arith.constant 0 : index
    %c0_5 = arith.constant 0 : index
    %7 = vector.load %arg4[%c0, %c0_3, %c0_4, %c0_5] : memref<1x1x64x256xbf16, #tpu.memory_space<vmem>>, vector<1x1x64x256xbf16>
    %8 = vector.shape_cast %7 : vector<1x1x64x256xbf16> to vector<64x256xbf16>
    %c0_6 = arith.constant 0 : index
    %c0_7 = arith.constant 0 : index
    %c0_8 = arith.constant 0 : index
    %9 = vector.load %arg7[%c0_6, %c0_7, %c0_8] : memref<1x8x64xbf16, #tpu.memory_space<vmem>>, vector<1x8x64xbf16>
    %10 = vector.shape_cast %9 : vector<1x8x64xbf16> to vector<8x64xbf16>
    %cst = arith.constant dense<0.000000e+00> : vector<8x256xf32>
    %11 = tpu.matmul %10, %8, %cst {dimension_numbers = #tpu.dot_dimension_numbers<[1], [0], [0], [1], [0, 0, 1, 1], [], []>} : vector<8x64xbf16>, vector<64x256xbf16>, vector<8x256xf32> -> vector<8x256xf32>
    %c0_i32_9 = arith.constant 0 : i32
    %12 = arith.cmpi eq, %arg3, %c0_i32_9 : i32
    %13 = arith.extui %12 : i1 to i32
    %c0_i32_10 = arith.constant 0 : i32
    %14 = arith.cmpi ne, %13, %c0_i32_10 : i32
    scf.if %14 {
      %c0_18 = arith.constant 0 : index
      %c0_19 = arith.constant 0 : index
      %28 = vector.load %arg8[%c0_18, %c0_19] : memref<8x1xf32, #tpu.memory_space<vmem>>, vector<8x1xf32>
      %29 = vector.broadcast %28 : vector<8x1xf32> to vector<8x256xf32>
      %30 = arith.addf %11, %29 : vector<8x256xf32>
      %c0_20 = arith.constant 0 : index
      %c0_21 = arith.constant 0 : index
      %31 = vector.load %arg12[%c0_20, %c0_21] : memref<8x256xf32, #tpu.memory_space<vmem>>, vector<8x256xf32>
      tpu.vector_store %arg12[%c0_20, %c0_21], %30 {strides = array<i32>} : memref<8x256xf32, #tpu.memory_space<vmem>>, vector<8x256xf32>,
    } else {
    }
    %c0_i32_11 = arith.constant 0 : i32
    %15 = arith.cmpi sgt, %arg3, %c0_i32_11 : i32
    %16 = arith.extui %15 : i1 to i32
    %c0_i32_12 = arith.constant 0 : i32
    %17 = arith.cmpi ne, %16, %c0_i32_12 : i32
    scf.if %17 {
      %c0_18 = arith.constant 0 : index
      %c0_19 = arith.constant 0 : index
      %28 = vector.load %arg12[%c0_18, %c0_19] : memref<8x256xf32, #tpu.memory_space<vmem>>, vector<8x256xf32>
      %29 = arith.addf %28, %11 : vector<8x256xf32>
      %c0_20 = arith.constant 0 : index
      %c0_21 = arith.constant 0 : index
      %30 = vector.load %arg12[%c0_20, %c0_21] : memref<8x256xf32, #tpu.memory_space<vmem>>, vector<8x256xf32>
      tpu.vector_store %arg12[%c0_20, %c0_21], %29 {strides = array<i32>} : memref<8x256xf32, #tpu.memory_space<vmem>>, vector<8x256xf32>,
    } else {
    }
    %c0_i32_13 = arith.constant 0 : i32
    %18 = arith.cmpi eq, %arg3, %c0_i32_13 : i32
    %19 = arith.extui %18 : i1 to i32
    %c0_i32_14 = arith.constant 0 : i32
    %20 = arith.cmpi ne, %19, %c0_i32_14 : i32
    scf.if %20 {
      %c0_18 = arith.constant 0 : index
      %c0_19 = arith.constant 0 : index
      %28 = vector.load %arg12[%c0_18, %c0_19] : memref<8x256xf32, #tpu.memory_space<vmem>>, vector<8x256xf32>
      %c0_20 = arith.constant 0 : index
      %c0_21 = arith.constant 0 : index
      %29 = vector.load %arg13[%c0_20, %c0_21] : memref<8x1xf32, #tpu.memory_space<vmem>>, vector<8x1xf32>
      %cst_22 = arith.constant dense<0.000000e+00> : vector<8xf32>
      %30 = vector.multi_reduction <add>, %28, %cst_22 [1] : vector<8x256xf32> to vector<8xf32>
      %31 = vector.shape_cast %30 : vector<8xf32> to vector<8x1xf32>
      %32 = arith.addf %29, %31 : vector<8x1xf32>
      %c0_23 = arith.constant 0 : index
      %c0_24 = arith.constant 0 : index
      %33 = vector.load %arg13[%c0_23, %c0_24] : memref<8x1xf32, #tpu.memory_space<vmem>>, vector<8x1xf32>
      tpu.vector_store %arg13[%c0_23, %c0_24], %32 {strides = array<i32>} : memref<8x1xf32, #tpu.memory_space<vmem>>, vector<8x1xf32>,
      %c0_25 = arith.constant 0 : index
      %c0_26 = arith.constant 0 : index
      %34 = vector.load %arg14[%c0_25, %c0_26] : memref<8x1xf32, #tpu.memory_space<vmem>>, vector<8x1xf32>
      %35 = arith.mulf %28, %28 : vector<8x256xf32>
      %cst_27 = arith.constant dense<0.000000e+00> : vector<8xf32>
      %36 = vector.multi_reduction <add>, %35, %cst_27 [1] : vector<8x256xf32> to vector<8xf32>
      %37 = vector.shape_cast %36 : vector<8xf32> to vector<8x1xf32>
      %38 = arith.addf %34, %37 : vector<8x1xf32>
      %c0_28 = arith.constant 0 : index
      %c0_29 = arith.constant 0 : index
      %39 = vector.load %arg14[%c0_28, %c0_29] : memref<8x1xf32, #tpu.memory_space<vmem>>, vector<8x1xf32>
      tpu.vector_store %arg14[%c0_28, %c0_29], %38 {strides = array<i32>} : memref<8x1xf32, #tpu.memory_space<vmem>>, vector<8x1xf32>,
      %40 = arith.truncf %28 : vector<8x256xf32> to vector<8x256xbf16>
      %c0_30 = arith.constant 0 : index
      %c0_31 = arith.constant 0 : index
      %c0_32 = arith.constant 0 : index
      %c0_33 = arith.constant 0 : index
      %41 = vector.load %arg9[%c0_30, %c0_31, %c0_32, %c0_33] : memref<1x1x8x256xbf16, #tpu.memory_space<vmem>>, vector<1x1x8x256xbf16>
      %42 = vector.shape_cast %41 : vector<1x1x8x256xbf16> to vector<8x256xbf16>
      %43 = vector.shape_cast %40 : vector<8x256xbf16> to vector<1x1x8x256xbf16>
      tpu.vector_store %arg9[%c0_30, %c0_31, %c0_32, %c0_33], %43 {strides = array<i32>} : memref<1x1x8x256xbf16, #tpu.memory_space<vmem>>, vector<1x1x8x256xbf16>,
    } else {
    }
    %c3_i32 = arith.constant 3 : i32
    %21 = arith.cmpi eq, %arg1, %c3_i32 : i32
    %c0_i32_15 = arith.constant 0 : i32
    %22 = arith.cmpi eq, %arg2, %c0_i32_15 : i32
    %23 = arith.andi %21, %22 : i1
    %c0_i32_16 = arith.constant 0 : i32
    %24 = arith.cmpi eq, %arg3, %c0_i32_16 : i32
    %25 = arith.andi %23, %24 : i1
    %26 = arith.extui %25 : i1 to i32
    %c0_i32_17 = arith.constant 0 : i32
    %27 = arith.cmpi ne, %26, %c0_i32_17 : i32
    scf.if %27 {
      %c0_18 = arith.constant 0 : index
      %c0_19 = arith.constant 0 : index
      %28 = vector.load %arg13[%c0_18, %c0_19] : memref<8x1xf32, #tpu.memory_space<vmem>>, vector<8x1xf32>
      %cst_20 = arith.constant 9.765625E-4 : f32
      %29 = vector.broadcast %cst_20 : f32 to vector<8x1xf32>
      %30 = arith.mulf %28, %29 : vector<8x1xf32>
      %c0_21 = arith.constant 0 : index
      %c0_22 = arith.constant 0 : index
      %31 = vector.load %arg14[%c0_21, %c0_22] : memref<8x1xf32, #tpu.memory_space<vmem>>, vector<8x1xf32>
      %cst_23 = arith.constant 9.765625E-4 : f32
      %32 = vector.broadcast %cst_23 : f32 to vector<8x1xf32>
      %33 = arith.mulf %31, %32 : vector<8x1xf32>
      %34 = arith.mulf %30, %30 : vector<8x1xf32>
      %35 = arith.subf %33, %34 : vector<8x1xf32>
      %cst_24 = arith.constant 0.000000e+00 : f32
      %36 = vector.broadcast %cst_24 : f32 to vector<8x1xf32>
      %37 = arith.maximumf %35, %36 : vector<8x1xf32>
      %cst_25 = arith.constant 9.99999974E-6 : f32
      %38 = vector.broadcast %cst_25 : f32 to vector<8x1xf32>
      %39 = arith.addf %37, %38 : vector<8x1xf32>
      %40 = math.rsqrt %39 : vector<8x1xf32>
      %c0_26 = arith.constant 0 : index
      %c0_27 = arith.constant 0 : index
      %c0_28 = arith.constant 0 : index
      %41 = vector.load %arg10[%c0_26, %c0_27, %c0_28] : memref<1x8x1xf32, #tpu.memory_space<vmem>>, vector<1x8x1xf32>
      %42 = vector.shape_cast %41 : vector<1x8x1xf32> to vector<8x1xf32>
      %43 = vector.shape_cast %40 : vector<8x1xf32> to vector<1x8x1xf32>
      tpu.vector_store %arg10[%c0_26, %c0_27, %c0_28], %43 {strides = array<i32>} : memref<1x8x1xf32, #tpu.memory_space<vmem>>, vector<1x8x1xf32>,
      %cst_29 = arith.constant 0.000000e+00 : f32
      %44 = vector.broadcast %cst_29 : f32 to vector<8x1xf32>
      %45 = arith.subf %44, %30 : vector<8x1xf32>
      %46 = arith.mulf %45, %40 : vector<8x1xf32>
      %c0_30 = arith.constant 0 : index
      %c0_31 = arith.constant 0 : index
      %c0_32 = arith.constant 0 : index
      %47 = vector.load %arg11[%c0_30, %c0_31, %c0_32] : memref<1x8x1xf32, #tpu.memory_space<vmem>>, vector<1x8x1xf32>
      %48 = vector.shape_cast %47 : vector<1x8x1xf32> to vector<8x1xf32>
      %49 = vector.shape_cast %46 : vector<8x1xf32> to vector<1x8x1xf32>
      tpu.vector_store %arg11[%c0_30, %c0_31, %c0_32], %49 {strides = array<i32>} : memref<1x8x1xf32, #tpu.memory_space<vmem>>, vector<1x8x1xf32>,
    } else {
    }
    return
  }
  func.func @transform_0(%arg0: i32, %arg1: i32, %arg2: i32, %arg3: i32) -> (i32, i32, i32, i32) {
    %c0_i32 = arith.constant 0 : i32
    return %arg0, %arg1, %arg3, %arg2 : i32, i32, i32, i32
  }
  func.func @transform_1(%arg0: i32, %arg1: i32, %arg2: i32, %arg3: i32) -> (i32, i32, i32) {
    %c0_i32 = arith.constant 0 : i32
    %c0_i32_0 = arith.constant 0 : i32
    return %arg0, %arg3, %c0_i32 : i32, i32, i32
  }
  func.func @transform_2(%arg0: i32, %arg1: i32, %arg2: i32, %arg3: i32) -> (i32, i32, i32) {
    %c0_i32 = arith.constant 0 : i32
    %c0_i32_0 = arith.constant 0 : i32
    return %arg0, %arg3, %c0_i32 : i32, i32, i32
  }
  func.func @transform_3(%arg0: i32, %arg1: i32, %arg2: i32, %arg3: i32) -> (i32, i32, i32) {
    %c0_i32 = arith.constant 0 : i32
    %c0_i32_0 = arith.constant 0 : i32
    return %arg1, %c0_i32, %arg3 : i32, i32, i32
  }
  func.func @transform_4(%arg0: i32, %arg1: i32, %arg2: i32, %arg3: i32) -> (i32, i32) {
    %c0_i32 = arith.constant 0 : i32
    %c0_i32_0 = arith.constant 0 : i32
    %c0_i32_1 = arith.constant 0 : i32
    return %c0_i32, %c0_i32_0 : i32, i32
  }
  func.func @transform_5(%arg0: i32, %arg1: i32, %arg2: i32, %arg3: i32) -> (i32, i32, i32, i32) {
    %c0_i32 = arith.constant 0 : i32
    %c0_i32_0 = arith.constant 0 : i32
    return %arg0, %arg1, %c0_i32, %arg2 : i32, i32, i32, i32
  }
  func.func @transform_6(%arg0: i32, %arg1: i32, %arg2: i32, %arg3: i32) -> (i32, i32, i32) {
    %c0_i32 = arith.constant 0 : i32
    %c0_i32_0 = arith.constant 0 : i32
    %c0_i32_1 = arith.constant 0 : i32
    return %arg0, %c0_i32, %c0_i32_0 : i32, i32, i32
  }
  func.func @transform_7(%arg0: i32, %arg1: i32, %arg2: i32, %arg3: i32) -> (i32, i32, i32) {
    %c0_i32 = arith.constant 0 : i32
    %c0_i32_0 = arith.constant 0 : i32
    %c0_i32_1 = arith.constant 0 : i32
    return %arg0, %c0_i32, %c0_i32_0 : i32, i32, i32
  }
}

module attributes {stable_mosaic.version = 11 : i64} {
  func.func @_norm_silu_kernel(%arg0: i32, %arg1: i32, %arg2: i32, %arg3: memref<1x1x8x256xbf16, #tpu.memory_space<vmem>>, %arg4: memref<1x8x1xf32, #tpu.memory_space<vmem>>, %arg5: memref<1x8x1xf32, #tpu.memory_space<vmem>>, %arg6: memref<1x1x8x256xbf16, #tpu.memory_space<vmem>>) attributes {dimension_semantics = [#tpu.dimension_semantics<parallel>, #tpu.dimension_semantics<parallel>, #tpu.dimension_semantics<parallel>], iteration_bounds = array<i64: 2, 4, 1>, scalar_prefetch = 0 : i64, scratch_operands = 0 : i64, tpu.core_type = #tpu.core_type<tc>, window_params = [{transform_indices = @transform_0, window_bounds = array<i64: 1, 1, 8, 256>}, {transform_indices = @transform_1, window_bounds = array<i64: 1, 8, 1>}, {transform_indices = @transform_2, window_bounds = array<i64: 1, 8, 1>}, {transform_indices = @transform_3, window_bounds = array<i64: 1, 1, 8, 256>}]} {
    %c0 = arith.constant 0 : index
    %c0_0 = arith.constant 0 : index
    %c0_1 = arith.constant 0 : index
    %c0_2 = arith.constant 0 : index
    %0 = vector.load %arg3[%c0, %c0_0, %c0_1, %c0_2] : memref<1x1x8x256xbf16, #tpu.memory_space<vmem>>, vector<1x1x8x256xbf16>
    %1 = vector.shape_cast %0 : vector<1x1x8x256xbf16> to vector<8x256xbf16>
    %2 = arith.extf %1 : vector<8x256xbf16> to vector<8x256xf32>
    %c0_3 = arith.constant 0 : index
    %c0_4 = arith.constant 0 : index
    %c0_5 = arith.constant 0 : index
    %3 = vector.load %arg4[%c0_3, %c0_4, %c0_5] : memref<1x8x1xf32, #tpu.memory_space<vmem>>, vector<1x8x1xf32>
    %4 = vector.shape_cast %3 : vector<1x8x1xf32> to vector<8x1xf32>
    %5 = vector.broadcast %4 : vector<8x1xf32> to vector<8x256xf32>
    %6 = arith.mulf %2, %5 : vector<8x256xf32>
    %c0_6 = arith.constant 0 : index
    %c0_7 = arith.constant 0 : index
    %c0_8 = arith.constant 0 : index
    %7 = vector.load %arg5[%c0_6, %c0_7, %c0_8] : memref<1x8x1xf32, #tpu.memory_space<vmem>>, vector<1x8x1xf32>
    %8 = vector.shape_cast %7 : vector<1x8x1xf32> to vector<8x1xf32>
    %9 = vector.broadcast %8 : vector<8x1xf32> to vector<8x256xf32>
    %10 = arith.addf %6, %9 : vector<8x256xf32>
    %cst = arith.constant 0.000000e+00 : f32
    %11 = vector.broadcast %cst : f32 to vector<8x256xf32>
    %12 = arith.subf %11, %10 : vector<8x256xf32>
    %13 = math.exp %12 : vector<8x256xf32>
    %cst_9 = arith.constant 1.000000e+00 : f32
    %14 = vector.broadcast %cst_9 : f32 to vector<8x256xf32>
    %15 = arith.addf %14, %13 : vector<8x256xf32>
    %16 = tpu.reciprocal %15 {approx = true} : vector<8x256xf32> -> vector<8x256xf32>
    %17 = arith.mulf %10, %16 : vector<8x256xf32>
    %18 = arith.truncf %17 : vector<8x256xf32> to vector<8x256xbf16>
    %c0_10 = arith.constant 0 : index
    %c0_11 = arith.constant 0 : index
    %c0_12 = arith.constant 0 : index
    %c0_13 = arith.constant 0 : index
    %19 = vector.load %arg6[%c0_10, %c0_11, %c0_12, %c0_13] : memref<1x1x8x256xbf16, #tpu.memory_space<vmem>>, vector<1x1x8x256xbf16>
    %20 = vector.shape_cast %19 : vector<1x1x8x256xbf16> to vector<8x256xbf16>
    %21 = vector.shape_cast %18 : vector<8x256xbf16> to vector<1x1x8x256xbf16>
    tpu.vector_store %arg6[%c0_10, %c0_11, %c0_12, %c0_13], %21 {strides = array<i32>} : memref<1x1x8x256xbf16, #tpu.memory_space<vmem>>, vector<1x1x8x256xbf16>,
    return
  }
  func.func @transform_0(%arg0: i32, %arg1: i32, %arg2: i32) -> (i32, i32, i32, i32) {
    %c0_i32 = arith.constant 0 : i32
    %c0_i32_0 = arith.constant 0 : i32
    return %arg0, %arg1, %c0_i32, %arg2 : i32, i32, i32, i32
  }
  func.func @transform_1(%arg0: i32, %arg1: i32, %arg2: i32) -> (i32, i32, i32) {
    %c0_i32 = arith.constant 0 : i32
    %c0_i32_0 = arith.constant 0 : i32
    %c0_i32_1 = arith.constant 0 : i32
    return %arg0, %c0_i32, %c0_i32_0 : i32, i32, i32
  }
  func.func @transform_2(%arg0: i32, %arg1: i32, %arg2: i32) -> (i32, i32, i32) {
    %c0_i32 = arith.constant 0 : i32
    %c0_i32_0 = arith.constant 0 : i32
    %c0_i32_1 = arith.constant 0 : i32
    return %arg0, %c0_i32, %c0_i32_0 : i32, i32, i32
  }
  func.func @transform_3(%arg0: i32, %arg1: i32, %arg2: i32) -> (i32, i32, i32, i32) {
    %c0_i32 = arith.constant 0 : i32
    %c0_i32_0 = arith.constant 0 : i32
    return %arg0, %arg1, %c0_i32, %arg2 : i32, i32, i32, i32
  }
}

module attributes {stable_mosaic.version = 11 : i64} {
  func.func @_stage_kernel(%arg0: i32, %arg1: i32, %arg2: i32, %arg3: i32, %arg4: memref<1x1x32x1024xbf16, #tpu.memory_space<vmem>>, %arg5: memref<1x32x1xf32, #tpu.memory_space<vmem>>, %arg6: memref<1x32x1xf32, #tpu.memory_space<vmem>>, %arg7: memref<1x8x32xbf16, #tpu.memory_space<vmem>>, %arg8: memref<8x1xf32, #tpu.memory_space<vmem>>, %arg9: memref<1x1x8x1024xbf16, #tpu.memory_space<vmem>>, %arg10: memref<1x8x1xf32, #tpu.memory_space<vmem>>, %arg11: memref<1x8x1xf32, #tpu.memory_space<vmem>>, %arg12: memref<8x1024xf32, #tpu.memory_space<vmem>>, %arg13: memref<8x1xf32, #tpu.memory_space<vmem>>, %arg14: memref<8x1xf32, #tpu.memory_space<vmem>>) attributes {dimension_semantics = [#tpu.dimension_semantics<parallel>, #tpu.dimension_semantics<arbitrary>, #tpu.dimension_semantics<arbitrary>, #tpu.dimension_semantics<arbitrary>], iteration_bounds = array<i64: 2, 4, 1, 1>, scalar_prefetch = 0 : i64, scratch_operands = 3 : i64, tpu.core_type = #tpu.core_type<tc>, window_params = [{transform_indices = @transform_0, window_bounds = array<i64: 1, 1, 32, 1024>}, {transform_indices = @transform_1, window_bounds = array<i64: 1, 32, 1>}, {transform_indices = @transform_2, window_bounds = array<i64: 1, 32, 1>}, {transform_indices = @transform_3, window_bounds = array<i64: 1, 8, 32>}, {pipeline_mode = #tpu.pipeline_mode<synchronous>, transform_indices = @transform_4, window_bounds = array<i64: 8, 1>}, {transform_indices = @transform_5, window_bounds = array<i64: 1, 1, 8, 1024>}, {transform_indices = @transform_6, window_bounds = array<i64: 1, 8, 1>}, {transform_indices = @transform_7, window_bounds = array<i64: 1, 8, 1>}]} {
    %c0_i32 = arith.constant 0 : i32
    %0 = arith.cmpi eq, %arg1, %c0_i32 : i32
    %c0_i32_0 = arith.constant 0 : i32
    %1 = arith.cmpi eq, %arg2, %c0_i32_0 : i32
    %2 = arith.andi %0, %1 : i1
    %c0_i32_1 = arith.constant 0 : i32
    %3 = arith.cmpi eq, %arg3, %c0_i32_1 : i32
    %4 = arith.andi %2, %3 : i1
    %5 = arith.extui %4 : i1 to i32
    %c0_i32_2 = arith.constant 0 : i32
    %6 = arith.cmpi ne, %5, %c0_i32_2 : i32
    scf.if %6 {
      %cst_18 = arith.constant 0.000000e+00 : f32
      %28 = vector.broadcast %cst_18 : f32 to vector<8x1xf32>
      %c0_19 = arith.constant 0 : index
      %c0_20 = arith.constant 0 : index
      %29 = vector.load %arg13[%c0_19, %c0_20] : memref<8x1xf32, #tpu.memory_space<vmem>>, vector<8x1xf32>
      tpu.vector_store %arg13[%c0_19, %c0_20], %28 {strides = array<i32>} : memref<8x1xf32, #tpu.memory_space<vmem>>, vector<8x1xf32>,
      %cst_21 = arith.constant 0.000000e+00 : f32
      %30 = vector.broadcast %cst_21 : f32 to vector<8x1xf32>
      %c0_22 = arith.constant 0 : index
      %c0_23 = arith.constant 0 : index
      %31 = vector.load %arg14[%c0_22, %c0_23] : memref<8x1xf32, #tpu.memory_space<vmem>>, vector<8x1xf32>
      tpu.vector_store %arg14[%c0_22, %c0_23], %30 {strides = array<i32>} : memref<8x1xf32, #tpu.memory_space<vmem>>, vector<8x1xf32>,
    } else {
    }
    %c0 = arith.constant 0 : index
    %c0_3 = arith.constant 0 : index
    %c0_4 = arith.constant 0 : index
    %c0_5 = arith.constant 0 : index
    %7 = vector.load %arg4[%c0, %c0_3, %c0_4, %c0_5] : memref<1x1x32x1024xbf16, #tpu.memory_space<vmem>>, vector<1x1x32x1024xbf16>
    %8 = vector.shape_cast %7 : vector<1x1x32x1024xbf16> to vector<32x1024xbf16>
    %c0_6 = arith.constant 0 : index
    %c0_7 = arith.constant 0 : index
    %c0_8 = arith.constant 0 : index
    %9 = vector.load %arg7[%c0_6, %c0_7, %c0_8] : memref<1x8x32xbf16, #tpu.memory_space<vmem>>, vector<1x8x32xbf16>
    %10 = vector.shape_cast %9 : vector<1x8x32xbf16> to vector<8x32xbf16>
    %cst = arith.constant dense<0.000000e+00> : vector<8x1024xf32>
    %11 = tpu.matmul %10, %8, %cst {dimension_numbers = #tpu.dot_dimension_numbers<[1], [0], [0], [1], [0, 0, 1, 1], [], []>} : vector<8x32xbf16>, vector<32x1024xbf16>, vector<8x1024xf32> -> vector<8x1024xf32>
    %c0_i32_9 = arith.constant 0 : i32
    %12 = arith.cmpi eq, %arg3, %c0_i32_9 : i32
    %13 = arith.extui %12 : i1 to i32
    %c0_i32_10 = arith.constant 0 : i32
    %14 = arith.cmpi ne, %13, %c0_i32_10 : i32
    scf.if %14 {
      %c0_18 = arith.constant 0 : index
      %c0_19 = arith.constant 0 : index
      %28 = vector.load %arg8[%c0_18, %c0_19] : memref<8x1xf32, #tpu.memory_space<vmem>>, vector<8x1xf32>
      %29 = vector.broadcast %28 : vector<8x1xf32> to vector<8x1024xf32>
      %30 = arith.addf %11, %29 : vector<8x1024xf32>
      %c0_20 = arith.constant 0 : index
      %c0_21 = arith.constant 0 : index
      %31 = vector.load %arg12[%c0_20, %c0_21] : memref<8x1024xf32, #tpu.memory_space<vmem>>, vector<8x1024xf32>
      tpu.vector_store %arg12[%c0_20, %c0_21], %30 {strides = array<i32>} : memref<8x1024xf32, #tpu.memory_space<vmem>>, vector<8x1024xf32>,
    } else {
    }
    %c0_i32_11 = arith.constant 0 : i32
    %15 = arith.cmpi sgt, %arg3, %c0_i32_11 : i32
    %16 = arith.extui %15 : i1 to i32
    %c0_i32_12 = arith.constant 0 : i32
    %17 = arith.cmpi ne, %16, %c0_i32_12 : i32
    scf.if %17 {
      %c0_18 = arith.constant 0 : index
      %c0_19 = arith.constant 0 : index
      %28 = vector.load %arg12[%c0_18, %c0_19] : memref<8x1024xf32, #tpu.memory_space<vmem>>, vector<8x1024xf32>
      %29 = arith.addf %28, %11 : vector<8x1024xf32>
      %c0_20 = arith.constant 0 : index
      %c0_21 = arith.constant 0 : index
      %30 = vector.load %arg12[%c0_20, %c0_21] : memref<8x1024xf32, #tpu.memory_space<vmem>>, vector<8x1024xf32>
      tpu.vector_store %arg12[%c0_20, %c0_21], %29 {strides = array<i32>} : memref<8x1024xf32, #tpu.memory_space<vmem>>, vector<8x1024xf32>,
    } else {
    }
    %c0_i32_13 = arith.constant 0 : i32
    %18 = arith.cmpi eq, %arg3, %c0_i32_13 : i32
    %19 = arith.extui %18 : i1 to i32
    %c0_i32_14 = arith.constant 0 : i32
    %20 = arith.cmpi ne, %19, %c0_i32_14 : i32
    scf.if %20 {
      %c0_18 = arith.constant 0 : index
      %c0_19 = arith.constant 0 : index
      %28 = vector.load %arg12[%c0_18, %c0_19] : memref<8x1024xf32, #tpu.memory_space<vmem>>, vector<8x1024xf32>
      %c0_20 = arith.constant 0 : index
      %c0_21 = arith.constant 0 : index
      %29 = vector.load %arg13[%c0_20, %c0_21] : memref<8x1xf32, #tpu.memory_space<vmem>>, vector<8x1xf32>
      %cst_22 = arith.constant dense<0.000000e+00> : vector<8xf32>
      %30 = vector.multi_reduction <add>, %28, %cst_22 [1] : vector<8x1024xf32> to vector<8xf32>
      %31 = vector.shape_cast %30 : vector<8xf32> to vector<8x1xf32>
      %32 = arith.addf %29, %31 : vector<8x1xf32>
      %c0_23 = arith.constant 0 : index
      %c0_24 = arith.constant 0 : index
      %33 = vector.load %arg13[%c0_23, %c0_24] : memref<8x1xf32, #tpu.memory_space<vmem>>, vector<8x1xf32>
      tpu.vector_store %arg13[%c0_23, %c0_24], %32 {strides = array<i32>} : memref<8x1xf32, #tpu.memory_space<vmem>>, vector<8x1xf32>,
      %c0_25 = arith.constant 0 : index
      %c0_26 = arith.constant 0 : index
      %34 = vector.load %arg14[%c0_25, %c0_26] : memref<8x1xf32, #tpu.memory_space<vmem>>, vector<8x1xf32>
      %35 = arith.mulf %28, %28 : vector<8x1024xf32>
      %cst_27 = arith.constant dense<0.000000e+00> : vector<8xf32>
      %36 = vector.multi_reduction <add>, %35, %cst_27 [1] : vector<8x1024xf32> to vector<8xf32>
      %37 = vector.shape_cast %36 : vector<8xf32> to vector<8x1xf32>
      %38 = arith.addf %34, %37 : vector<8x1xf32>
      %c0_28 = arith.constant 0 : index
      %c0_29 = arith.constant 0 : index
      %39 = vector.load %arg14[%c0_28, %c0_29] : memref<8x1xf32, #tpu.memory_space<vmem>>, vector<8x1xf32>
      tpu.vector_store %arg14[%c0_28, %c0_29], %38 {strides = array<i32>} : memref<8x1xf32, #tpu.memory_space<vmem>>, vector<8x1xf32>,
      %40 = arith.truncf %28 : vector<8x1024xf32> to vector<8x1024xbf16>
      %c0_30 = arith.constant 0 : index
      %c0_31 = arith.constant 0 : index
      %c0_32 = arith.constant 0 : index
      %c0_33 = arith.constant 0 : index
      %41 = vector.load %arg9[%c0_30, %c0_31, %c0_32, %c0_33] : memref<1x1x8x1024xbf16, #tpu.memory_space<vmem>>, vector<1x1x8x1024xbf16>
      %42 = vector.shape_cast %41 : vector<1x1x8x1024xbf16> to vector<8x1024xbf16>
      %43 = vector.shape_cast %40 : vector<8x1024xbf16> to vector<1x1x8x1024xbf16>
      tpu.vector_store %arg9[%c0_30, %c0_31, %c0_32, %c0_33], %43 {strides = array<i32>} : memref<1x1x8x1024xbf16, #tpu.memory_space<vmem>>, vector<1x1x8x1024xbf16>,
    } else {
    }
    %c3_i32 = arith.constant 3 : i32
    %21 = arith.cmpi eq, %arg1, %c3_i32 : i32
    %c0_i32_15 = arith.constant 0 : i32
    %22 = arith.cmpi eq, %arg2, %c0_i32_15 : i32
    %23 = arith.andi %21, %22 : i1
    %c0_i32_16 = arith.constant 0 : i32
    %24 = arith.cmpi eq, %arg3, %c0_i32_16 : i32
    %25 = arith.andi %23, %24 : i1
    %26 = arith.extui %25 : i1 to i32
    %c0_i32_17 = arith.constant 0 : i32
    %27 = arith.cmpi ne, %26, %c0_i32_17 : i32
    scf.if %27 {
      %c0_18 = arith.constant 0 : index
      %c0_19 = arith.constant 0 : index
      %28 = vector.load %arg13[%c0_18, %c0_19] : memref<8x1xf32, #tpu.memory_space<vmem>>, vector<8x1xf32>
      %cst_20 = arith.constant 2.44140625E-4 : f32
      %29 = vector.broadcast %cst_20 : f32 to vector<8x1xf32>
      %30 = arith.mulf %28, %29 : vector<8x1xf32>
      %c0_21 = arith.constant 0 : index
      %c0_22 = arith.constant 0 : index
      %31 = vector.load %arg14[%c0_21, %c0_22] : memref<8x1xf32, #tpu.memory_space<vmem>>, vector<8x1xf32>
      %cst_23 = arith.constant 2.44140625E-4 : f32
      %32 = vector.broadcast %cst_23 : f32 to vector<8x1xf32>
      %33 = arith.mulf %31, %32 : vector<8x1xf32>
      %34 = arith.mulf %30, %30 : vector<8x1xf32>
      %35 = arith.subf %33, %34 : vector<8x1xf32>
      %cst_24 = arith.constant 0.000000e+00 : f32
      %36 = vector.broadcast %cst_24 : f32 to vector<8x1xf32>
      %37 = arith.maximumf %35, %36 : vector<8x1xf32>
      %cst_25 = arith.constant 9.99999974E-6 : f32
      %38 = vector.broadcast %cst_25 : f32 to vector<8x1xf32>
      %39 = arith.addf %37, %38 : vector<8x1xf32>
      %40 = math.rsqrt %39 : vector<8x1xf32>
      %c0_26 = arith.constant 0 : index
      %c0_27 = arith.constant 0 : index
      %c0_28 = arith.constant 0 : index
      %41 = vector.load %arg10[%c0_26, %c0_27, %c0_28] : memref<1x8x1xf32, #tpu.memory_space<vmem>>, vector<1x8x1xf32>
      %42 = vector.shape_cast %41 : vector<1x8x1xf32> to vector<8x1xf32>
      %43 = vector.shape_cast %40 : vector<8x1xf32> to vector<1x8x1xf32>
      tpu.vector_store %arg10[%c0_26, %c0_27, %c0_28], %43 {strides = array<i32>} : memref<1x8x1xf32, #tpu.memory_space<vmem>>, vector<1x8x1xf32>,
      %cst_29 = arith.constant 0.000000e+00 : f32
      %44 = vector.broadcast %cst_29 : f32 to vector<8x1xf32>
      %45 = arith.subf %44, %30 : vector<8x1xf32>
      %46 = arith.mulf %45, %40 : vector<8x1xf32>
      %c0_30 = arith.constant 0 : index
      %c0_31 = arith.constant 0 : index
      %c0_32 = arith.constant 0 : index
      %47 = vector.load %arg11[%c0_30, %c0_31, %c0_32] : memref<1x8x1xf32, #tpu.memory_space<vmem>>, vector<1x8x1xf32>
      %48 = vector.shape_cast %47 : vector<1x8x1xf32> to vector<8x1xf32>
      %49 = vector.shape_cast %46 : vector<8x1xf32> to vector<1x8x1xf32>
      tpu.vector_store %arg11[%c0_30, %c0_31, %c0_32], %49 {strides = array<i32>} : memref<1x8x1xf32, #tpu.memory_space<vmem>>, vector<1x8x1xf32>,
    } else {
    }
    return
  }
  func.func @transform_0(%arg0: i32, %arg1: i32, %arg2: i32, %arg3: i32) -> (i32, i32, i32, i32) {
    %c0_i32 = arith.constant 0 : i32
    return %arg0, %arg1, %arg3, %arg2 : i32, i32, i32, i32
  }
  func.func @transform_1(%arg0: i32, %arg1: i32, %arg2: i32, %arg3: i32) -> (i32, i32, i32) {
    %c0_i32 = arith.constant 0 : i32
    %c0_i32_0 = arith.constant 0 : i32
    return %arg0, %arg3, %c0_i32 : i32, i32, i32
  }
  func.func @transform_2(%arg0: i32, %arg1: i32, %arg2: i32, %arg3: i32) -> (i32, i32, i32) {
    %c0_i32 = arith.constant 0 : i32
    %c0_i32_0 = arith.constant 0 : i32
    return %arg0, %arg3, %c0_i32 : i32, i32, i32
  }
  func.func @transform_3(%arg0: i32, %arg1: i32, %arg2: i32, %arg3: i32) -> (i32, i32, i32) {
    %c0_i32 = arith.constant 0 : i32
    %c0_i32_0 = arith.constant 0 : i32
    return %arg1, %c0_i32, %arg3 : i32, i32, i32
  }
  func.func @transform_4(%arg0: i32, %arg1: i32, %arg2: i32, %arg3: i32) -> (i32, i32) {
    %c0_i32 = arith.constant 0 : i32
    %c0_i32_0 = arith.constant 0 : i32
    %c0_i32_1 = arith.constant 0 : i32
    return %c0_i32, %c0_i32_0 : i32, i32
  }
  func.func @transform_5(%arg0: i32, %arg1: i32, %arg2: i32, %arg3: i32) -> (i32, i32, i32, i32) {
    %c0_i32 = arith.constant 0 : i32
    %c0_i32_0 = arith.constant 0 : i32
    return %arg0, %arg1, %c0_i32, %arg2 : i32, i32, i32, i32
  }
  func.func @transform_6(%arg0: i32, %arg1: i32, %arg2: i32, %arg3: i32) -> (i32, i32, i32) {
    %c0_i32 = arith.constant 0 : i32
    %c0_i32_0 = arith.constant 0 : i32
    %c0_i32_1 = arith.constant 0 : i32
    return %arg0, %c0_i32, %c0_i32_0 : i32, i32, i32
  }
  func.func @transform_7(%arg0: i32, %arg1: i32, %arg2: i32, %arg3: i32) -> (i32, i32, i32) {
    %c0_i32 = arith.constant 0 : i32
    %c0_i32_0 = arith.constant 0 : i32
    %c0_i32_1 = arith.constant 0 : i32
    return %arg0, %c0_i32, %c0_i32_0 : i32, i32, i32
  }
}

module attributes {stable_mosaic.version = 11 : i64} {
  func.func @_stage_kernel(%arg0: i32, %arg1: i32, %arg2: i32, %arg3: i32, %arg4: memref<1x1x8x1024xbf16, #tpu.memory_space<vmem>>, %arg5: memref<1x8x1xf32, #tpu.memory_space<vmem>>, %arg6: memref<1x8x1xf32, #tpu.memory_space<vmem>>, %arg7: memref<1x8x8xbf16, #tpu.memory_space<vmem>>, %arg8: memref<8x1xf32, #tpu.memory_space<vmem>>, %arg9: memref<1x1x8x1024xbf16, #tpu.memory_space<vmem>>, %arg10: memref<1x8x1xf32, #tpu.memory_space<vmem>>, %arg11: memref<1x8x1xf32, #tpu.memory_space<vmem>>, %arg12: memref<8x1024xf32, #tpu.memory_space<vmem>>, %arg13: memref<8x1xf32, #tpu.memory_space<vmem>>, %arg14: memref<8x1xf32, #tpu.memory_space<vmem>>) attributes {dimension_semantics = [#tpu.dimension_semantics<parallel>, #tpu.dimension_semantics<arbitrary>, #tpu.dimension_semantics<arbitrary>, #tpu.dimension_semantics<arbitrary>], iteration_bounds = array<i64: 2, 4, 1, 1>, scalar_prefetch = 0 : i64, scratch_operands = 3 : i64, tpu.core_type = #tpu.core_type<tc>, window_params = [{transform_indices = @transform_0, window_bounds = array<i64: 1, 1, 8, 1024>}, {transform_indices = @transform_1, window_bounds = array<i64: 1, 8, 1>}, {transform_indices = @transform_2, window_bounds = array<i64: 1, 8, 1>}, {transform_indices = @transform_3, window_bounds = array<i64: 1, 8, 8>}, {pipeline_mode = #tpu.pipeline_mode<synchronous>, transform_indices = @transform_4, window_bounds = array<i64: 8, 1>}, {transform_indices = @transform_5, window_bounds = array<i64: 1, 1, 8, 1024>}, {transform_indices = @transform_6, window_bounds = array<i64: 1, 8, 1>}, {transform_indices = @transform_7, window_bounds = array<i64: 1, 8, 1>}]} {
    %c0_i32 = arith.constant 0 : i32
    %0 = arith.cmpi eq, %arg1, %c0_i32 : i32
    %c0_i32_0 = arith.constant 0 : i32
    %1 = arith.cmpi eq, %arg2, %c0_i32_0 : i32
    %2 = arith.andi %0, %1 : i1
    %c0_i32_1 = arith.constant 0 : i32
    %3 = arith.cmpi eq, %arg3, %c0_i32_1 : i32
    %4 = arith.andi %2, %3 : i1
    %5 = arith.extui %4 : i1 to i32
    %c0_i32_2 = arith.constant 0 : i32
    %6 = arith.cmpi ne, %5, %c0_i32_2 : i32
    scf.if %6 {
      %cst_26 = arith.constant 0.000000e+00 : f32
      %45 = vector.broadcast %cst_26 : f32 to vector<8x1xf32>
      %c0_27 = arith.constant 0 : index
      %c0_28 = arith.constant 0 : index
      %46 = vector.load %arg13[%c0_27, %c0_28] : memref<8x1xf32, #tpu.memory_space<vmem>>, vector<8x1xf32>
      tpu.vector_store %arg13[%c0_27, %c0_28], %45 {strides = array<i32>} : memref<8x1xf32, #tpu.memory_space<vmem>>, vector<8x1xf32>,
      %cst_29 = arith.constant 0.000000e+00 : f32
      %47 = vector.broadcast %cst_29 : f32 to vector<8x1xf32>
      %c0_30 = arith.constant 0 : index
      %c0_31 = arith.constant 0 : index
      %48 = vector.load %arg14[%c0_30, %c0_31] : memref<8x1xf32, #tpu.memory_space<vmem>>, vector<8x1xf32>
      tpu.vector_store %arg14[%c0_30, %c0_31], %47 {strides = array<i32>} : memref<8x1xf32, #tpu.memory_space<vmem>>, vector<8x1xf32>,
    } else {
    }
    %c0 = arith.constant 0 : index
    %c0_3 = arith.constant 0 : index
    %c0_4 = arith.constant 0 : index
    %c0_5 = arith.constant 0 : index
    %7 = vector.load %arg4[%c0, %c0_3, %c0_4, %c0_5] : memref<1x1x8x1024xbf16, #tpu.memory_space<vmem>>, vector<1x1x8x1024xbf16>
    %8 = vector.shape_cast %7 : vector<1x1x8x1024xbf16> to vector<8x1024xbf16>
    %9 = arith.extf %8 : vector<8x1024xbf16> to vector<8x1024xf32>
    %c0_6 = arith.constant 0 : index
    %c0_7 = arith.constant 0 : index
    %c0_8 = arith.constant 0 : index
    %10 = vector.load %arg5[%c0_6, %c0_7, %c0_8] : memref<1x8x1xf32, #tpu.memory_space<vmem>>, vector<1x8x1xf32>
    %11 = vector.shape_cast %10 : vector<1x8x1xf32> to vector<8x1xf32>
    %12 = vector.broadcast %11 : vector<8x1xf32> to vector<8x1024xf32>
    %13 = arith.mulf %9, %12 : vector<8x1024xf32>
    %c0_9 = arith.constant 0 : index
    %c0_10 = arith.constant 0 : index
    %c0_11 = arith.constant 0 : index
    %14 = vector.load %arg6[%c0_9, %c0_10, %c0_11] : memref<1x8x1xf32, #tpu.memory_space<vmem>>, vector<1x8x1xf32>
    %15 = vector.shape_cast %14 : vector<1x8x1xf32> to vector<8x1xf32>
    %16 = vector.broadcast %15 : vector<8x1xf32> to vector<8x1024xf32>
    %17 = arith.addf %13, %16 : vector<8x1024xf32>
    %cst = arith.constant 0.000000e+00 : f32
    %18 = vector.broadcast %cst : f32 to vector<8x1024xf32>
    %19 = arith.subf %18, %17 : vector<8x1024xf32>
    %20 = math.exp %19 : vector<8x1024xf32>
    %cst_12 = arith.constant 1.000000e+00 : f32
    %21 = vector.broadcast %cst_12 : f32 to vector<8x1024xf32>
    %22 = arith.addf %21, %20 : vector<8x1024xf32>
    %23 = tpu.reciprocal %22 {approx = true} : vector<8x1024xf32> -> vector<8x1024xf32>
    %24 = arith.mulf %17, %23 : vector<8x1024xf32>
    %25 = arith.truncf %24 : vector<8x1024xf32> to vector<8x1024xbf16>
    %c0_13 = arith.constant 0 : index
    %c0_14 = arith.constant 0 : index
    %c0_15 = arith.constant 0 : index
    %26 = vector.load %arg7[%c0_13, %c0_14, %c0_15] : memref<1x8x8xbf16, #tpu.memory_space<vmem>>, vector<1x8x8xbf16>
    %27 = vector.shape_cast %26 : vector<1x8x8xbf16> to vector<8x8xbf16>
    %cst_16 = arith.constant dense<0.000000e+00> : vector<8x1024xf32>
    %28 = tpu.matmul %27, %25, %cst_16 {dimension_numbers = #tpu.dot_dimension_numbers<[1], [0], [0], [1], [0, 0, 1, 1], [], []>} : vector<8x8xbf16>, vector<8x1024xbf16>, vector<8x1024xf32> -> vector<8x1024xf32>
    %c0_i32_17 = arith.constant 0 : i32
    %29 = arith.cmpi eq, %arg3, %c0_i32_17 : i32
    %30 = arith.extui %29 : i1 to i32
    %c0_i32_18 = arith.constant 0 : i32
    %31 = arith.cmpi ne, %30, %c0_i32_18 : i32
    scf.if %31 {
      %c0_26 = arith.constant 0 : index
      %c0_27 = arith.constant 0 : index
      %45 = vector.load %arg8[%c0_26, %c0_27] : memref<8x1xf32, #tpu.memory_space<vmem>>, vector<8x1xf32>
      %46 = vector.broadcast %45 : vector<8x1xf32> to vector<8x1024xf32>
      %47 = arith.addf %28, %46 : vector<8x1024xf32>
      %c0_28 = arith.constant 0 : index
      %c0_29 = arith.constant 0 : index
      %48 = vector.load %arg12[%c0_28, %c0_29] : memref<8x1024xf32, #tpu.memory_space<vmem>>, vector<8x1024xf32>
      tpu.vector_store %arg12[%c0_28, %c0_29], %47 {strides = array<i32>} : memref<8x1024xf32, #tpu.memory_space<vmem>>, vector<8x1024xf32>,
    } else {
    }
    %c0_i32_19 = arith.constant 0 : i32
    %32 = arith.cmpi sgt, %arg3, %c0_i32_19 : i32
    %33 = arith.extui %32 : i1 to i32
    %c0_i32_20 = arith.constant 0 : i32
    %34 = arith.cmpi ne, %33, %c0_i32_20 : i32
    scf.if %34 {
      %c0_26 = arith.constant 0 : index
      %c0_27 = arith.constant 0 : index
      %45 = vector.load %arg12[%c0_26, %c0_27] : memref<8x1024xf32, #tpu.memory_space<vmem>>, vector<8x1024xf32>
      %46 = arith.addf %45, %28 : vector<8x1024xf32>
      %c0_28 = arith.constant 0 : index
      %c0_29 = arith.constant 0 : index
      %47 = vector.load %arg12[%c0_28, %c0_29] : memref<8x1024xf32, #tpu.memory_space<vmem>>, vector<8x1024xf32>
      tpu.vector_store %arg12[%c0_28, %c0_29], %46 {strides = array<i32>} : memref<8x1024xf32, #tpu.memory_space<vmem>>, vector<8x1024xf32>,
    } else {
    }
    %c0_i32_21 = arith.constant 0 : i32
    %35 = arith.cmpi eq, %arg3, %c0_i32_21 : i32
    %36 = arith.extui %35 : i1 to i32
    %c0_i32_22 = arith.constant 0 : i32
    %37 = arith.cmpi ne, %36, %c0_i32_22 : i32
    scf.if %37 {
      %c0_26 = arith.constant 0 : index
      %c0_27 = arith.constant 0 : index
      %45 = vector.load %arg12[%c0_26, %c0_27] : memref<8x1024xf32, #tpu.memory_space<vmem>>, vector<8x1024xf32>
      %c0_28 = arith.constant 0 : index
      %c0_29 = arith.constant 0 : index
      %46 = vector.load %arg13[%c0_28, %c0_29] : memref<8x1xf32, #tpu.memory_space<vmem>>, vector<8x1xf32>
      %cst_30 = arith.constant dense<0.000000e+00> : vector<8xf32>
      %47 = vector.multi_reduction <add>, %45, %cst_30 [1] : vector<8x1024xf32> to vector<8xf32>
      %48 = vector.shape_cast %47 : vector<8xf32> to vector<8x1xf32>
      %49 = arith.addf %46, %48 : vector<8x1xf32>
      %c0_31 = arith.constant 0 : index
      %c0_32 = arith.constant 0 : index
      %50 = vector.load %arg13[%c0_31, %c0_32] : memref<8x1xf32, #tpu.memory_space<vmem>>, vector<8x1xf32>
      tpu.vector_store %arg13[%c0_31, %c0_32], %49 {strides = array<i32>} : memref<8x1xf32, #tpu.memory_space<vmem>>, vector<8x1xf32>,
      %c0_33 = arith.constant 0 : index
      %c0_34 = arith.constant 0 : index
      %51 = vector.load %arg14[%c0_33, %c0_34] : memref<8x1xf32, #tpu.memory_space<vmem>>, vector<8x1xf32>
      %52 = arith.mulf %45, %45 : vector<8x1024xf32>
      %cst_35 = arith.constant dense<0.000000e+00> : vector<8xf32>
      %53 = vector.multi_reduction <add>, %52, %cst_35 [1] : vector<8x1024xf32> to vector<8xf32>
      %54 = vector.shape_cast %53 : vector<8xf32> to vector<8x1xf32>
      %55 = arith.addf %51, %54 : vector<8x1xf32>
      %c0_36 = arith.constant 0 : index
      %c0_37 = arith.constant 0 : index
      %56 = vector.load %arg14[%c0_36, %c0_37] : memref<8x1xf32, #tpu.memory_space<vmem>>, vector<8x1xf32>
      tpu.vector_store %arg14[%c0_36, %c0_37], %55 {strides = array<i32>} : memref<8x1xf32, #tpu.memory_space<vmem>>, vector<8x1xf32>,
      %57 = arith.truncf %45 : vector<8x1024xf32> to vector<8x1024xbf16>
      %c0_38 = arith.constant 0 : index
      %c0_39 = arith.constant 0 : index
      %c0_40 = arith.constant 0 : index
      %c0_41 = arith.constant 0 : index
      %58 = vector.load %arg9[%c0_38, %c0_39, %c0_40, %c0_41] : memref<1x1x8x1024xbf16, #tpu.memory_space<vmem>>, vector<1x1x8x1024xbf16>
      %59 = vector.shape_cast %58 : vector<1x1x8x1024xbf16> to vector<8x1024xbf16>
      %60 = vector.shape_cast %57 : vector<8x1024xbf16> to vector<1x1x8x1024xbf16>
      tpu.vector_store %arg9[%c0_38, %c0_39, %c0_40, %c0_41], %60 {strides = array<i32>} : memref<1x1x8x1024xbf16, #tpu.memory_space<vmem>>, vector<1x1x8x1024xbf16>,
    } else {
    }
    %c3_i32 = arith.constant 3 : i32
    %38 = arith.cmpi eq, %arg1, %c3_i32 : i32
    %c0_i32_23 = arith.constant 0 : i32
    %39 = arith.cmpi eq, %arg2, %c0_i32_23 : i32
    %40 = arith.andi %38, %39 : i1
    %c0_i32_24 = arith.constant 0 : i32
    %41 = arith.cmpi eq, %arg3, %c0_i32_24 : i32
    %42 = arith.andi %40, %41 : i1
    %43 = arith.extui %42 : i1 to i32
    %c0_i32_25 = arith.constant 0 : i32
    %44 = arith.cmpi ne, %43, %c0_i32_25 : i32
    scf.if %44 {
      %c0_26 = arith.constant 0 : index
      %c0_27 = arith.constant 0 : index
      %45 = vector.load %arg13[%c0_26, %c0_27] : memref<8x1xf32, #tpu.memory_space<vmem>>, vector<8x1xf32>
      %cst_28 = arith.constant 2.44140625E-4 : f32
      %46 = vector.broadcast %cst_28 : f32 to vector<8x1xf32>
      %47 = arith.mulf %45, %46 : vector<8x1xf32>
      %c0_29 = arith.constant 0 : index
      %c0_30 = arith.constant 0 : index
      %48 = vector.load %arg14[%c0_29, %c0_30] : memref<8x1xf32, #tpu.memory_space<vmem>>, vector<8x1xf32>
      %cst_31 = arith.constant 2.44140625E-4 : f32
      %49 = vector.broadcast %cst_31 : f32 to vector<8x1xf32>
      %50 = arith.mulf %48, %49 : vector<8x1xf32>
      %51 = arith.mulf %47, %47 : vector<8x1xf32>
      %52 = arith.subf %50, %51 : vector<8x1xf32>
      %cst_32 = arith.constant 0.000000e+00 : f32
      %53 = vector.broadcast %cst_32 : f32 to vector<8x1xf32>
      %54 = arith.maximumf %52, %53 : vector<8x1xf32>
      %cst_33 = arith.constant 9.99999974E-6 : f32
      %55 = vector.broadcast %cst_33 : f32 to vector<8x1xf32>
      %56 = arith.addf %54, %55 : vector<8x1xf32>
      %57 = math.rsqrt %56 : vector<8x1xf32>
      %c0_34 = arith.constant 0 : index
      %c0_35 = arith.constant 0 : index
      %c0_36 = arith.constant 0 : index
      %58 = vector.load %arg10[%c0_34, %c0_35, %c0_36] : memref<1x8x1xf32, #tpu.memory_space<vmem>>, vector<1x8x1xf32>
      %59 = vector.shape_cast %58 : vector<1x8x1xf32> to vector<8x1xf32>
      %60 = vector.shape_cast %57 : vector<8x1xf32> to vector<1x8x1xf32>
      tpu.vector_store %arg10[%c0_34, %c0_35, %c0_36], %60 {strides = array<i32>} : memref<1x8x1xf32, #tpu.memory_space<vmem>>, vector<1x8x1xf32>,
      %cst_37 = arith.constant 0.000000e+00 : f32
      %61 = vector.broadcast %cst_37 : f32 to vector<8x1xf32>
      %62 = arith.subf %61, %47 : vector<8x1xf32>
      %63 = arith.mulf %62, %57 : vector<8x1xf32>
      %c0_38 = arith.constant 0 : index
      %c0_39 = arith.constant 0 : index
      %c0_40 = arith.constant 0 : index
      %64 = vector.load %arg11[%c0_38, %c0_39, %c0_40] : memref<1x8x1xf32, #tpu.memory_space<vmem>>, vector<1x8x1xf32>
      %65 = vector.shape_cast %64 : vector<1x8x1xf32> to vector<8x1xf32>
      %66 = vector.shape_cast %63 : vector<8x1xf32> to vector<1x8x1xf32>
      tpu.vector_store %arg11[%c0_38, %c0_39, %c0_40], %66 {strides = array<i32>} : memref<1x8x1xf32, #tpu.memory_space<vmem>>, vector<1x8x1xf32>,
    } else {
    }
    return
  }
  func.func @transform_0(%arg0: i32, %arg1: i32, %arg2: i32, %arg3: i32) -> (i32, i32, i32, i32) {
    %c0_i32 = arith.constant 0 : i32
    return %arg0, %arg1, %arg3, %arg2 : i32, i32, i32, i32
  }
  func.func @transform_1(%arg0: i32, %arg1: i32, %arg2: i32, %arg3: i32) -> (i32, i32, i32) {
    %c0_i32 = arith.constant 0 : i32
    %c0_i32_0 = arith.constant 0 : i32
    return %arg0, %arg3, %c0_i32 : i32, i32, i32
  }
  func.func @transform_2(%arg0: i32, %arg1: i32, %arg2: i32, %arg3: i32) -> (i32, i32, i32) {
    %c0_i32 = arith.constant 0 : i32
    %c0_i32_0 = arith.constant 0 : i32
    return %arg0, %arg3, %c0_i32 : i32, i32, i32
  }
  func.func @transform_3(%arg0: i32, %arg1: i32, %arg2: i32, %arg3: i32) -> (i32, i32, i32) {
    %c0_i32 = arith.constant 0 : i32
    %c0_i32_0 = arith.constant 0 : i32
    %c0_i32_1 = arith.constant 0 : i32
    return %c0_i32, %c0_i32_0, %arg3 : i32, i32, i32
  }
  func.func @transform_4(%arg0: i32, %arg1: i32, %arg2: i32, %arg3: i32) -> (i32, i32) {
    %c0_i32 = arith.constant 0 : i32
    %c0_i32_0 = arith.constant 0 : i32
    %c0_i32_1 = arith.constant 0 : i32
    return %c0_i32, %c0_i32_0 : i32, i32
  }
  func.func @transform_5(%arg0: i32, %arg1: i32, %arg2: i32, %arg3: i32) -> (i32, i32, i32, i32) {
    %c0_i32 = arith.constant 0 : i32
    %c0_i32_0 = arith.constant 0 : i32
    return %arg0, %arg1, %c0_i32, %arg2 : i32, i32, i32, i32
  }
  func.func @transform_6(%arg0: i32, %arg1: i32, %arg2: i32, %arg3: i32) -> (i32, i32, i32) {
    %c0_i32 = arith.constant 0 : i32
    %c0_i32_0 = arith.constant 0 : i32
    %c0_i32_1 = arith.constant 0 : i32
    return %arg0, %c0_i32, %c0_i32_0 : i32, i32, i32
  }
  func.func @transform_7(%arg0: i32, %arg1: i32, %arg2: i32, %arg3: i32) -> (i32, i32, i32) {
    %c0_i32 = arith.constant 0 : i32
    %c0_i32_0 = arith.constant 0 : i32
    %c0_i32_1 = arith.constant 0 : i32
    return %arg0, %c0_i32, %c0_i32_0 : i32, i32, i32
  }
}

module attributes {stable_mosaic.version = 11 : i64} {
  func.func @_stage_kernel(%arg0: i32, %arg1: i32, %arg2: i32, %arg3: i32, %arg4: memref<1x1x8x1024xbf16, #tpu.memory_space<vmem>>, %arg5: memref<1x8x1xf32, #tpu.memory_space<vmem>>, %arg6: memref<1x8x1xf32, #tpu.memory_space<vmem>>, %arg7: memref<1x6x8xbf16, #tpu.memory_space<vmem>>, %arg8: memref<6x1xf32, #tpu.memory_space<vmem>>, %arg9: memref<1x1x6x1024xf32, #tpu.memory_space<vmem>>, %arg10: memref<1x6x1xf32, #tpu.memory_space<vmem>>, %arg11: memref<1x6x1xf32, #tpu.memory_space<vmem>>, %arg12: memref<6x1024xf32, #tpu.memory_space<vmem>>, %arg13: memref<6x1xf32, #tpu.memory_space<vmem>>, %arg14: memref<6x1xf32, #tpu.memory_space<vmem>>) attributes {dimension_semantics = [#tpu.dimension_semantics<parallel>, #tpu.dimension_semantics<arbitrary>, #tpu.dimension_semantics<arbitrary>, #tpu.dimension_semantics<arbitrary>], iteration_bounds = array<i64: 2, 4, 1, 1>, scalar_prefetch = 0 : i64, scratch_operands = 3 : i64, tpu.core_type = #tpu.core_type<tc>, window_params = [{transform_indices = @transform_0, window_bounds = array<i64: 1, 1, 8, 1024>}, {transform_indices = @transform_1, window_bounds = array<i64: 1, 8, 1>}, {transform_indices = @transform_2, window_bounds = array<i64: 1, 8, 1>}, {transform_indices = @transform_3, window_bounds = array<i64: 1, 6, 8>}, {pipeline_mode = #tpu.pipeline_mode<synchronous>, transform_indices = @transform_4, window_bounds = array<i64: 6, 1>}, {transform_indices = @transform_5, window_bounds = array<i64: 1, 1, 6, 1024>}, {transform_indices = @transform_6, window_bounds = array<i64: 1, 6, 1>}, {transform_indices = @transform_7, window_bounds = array<i64: 1, 6, 1>}]} {
    %c0_i32 = arith.constant 0 : i32
    %0 = arith.cmpi eq, %arg1, %c0_i32 : i32
    %c0_i32_0 = arith.constant 0 : i32
    %1 = arith.cmpi eq, %arg2, %c0_i32_0 : i32
    %2 = arith.andi %0, %1 : i1
    %c0_i32_1 = arith.constant 0 : i32
    %3 = arith.cmpi eq, %arg3, %c0_i32_1 : i32
    %4 = arith.andi %2, %3 : i1
    %5 = arith.extui %4 : i1 to i32
    %c0_i32_2 = arith.constant 0 : i32
    %6 = arith.cmpi ne, %5, %c0_i32_2 : i32
    scf.if %6 {
      %cst_26 = arith.constant 0.000000e+00 : f32
      %45 = vector.broadcast %cst_26 : f32 to vector<6x1xf32>
      %c0_27 = arith.constant 0 : index
      %c0_28 = arith.constant 0 : index
      %46 = vector.load %arg13[%c0_27, %c0_28] : memref<6x1xf32, #tpu.memory_space<vmem>>, vector<6x1xf32>
      tpu.vector_store %arg13[%c0_27, %c0_28], %45 {strides = array<i32>} : memref<6x1xf32, #tpu.memory_space<vmem>>, vector<6x1xf32>,
      %cst_29 = arith.constant 0.000000e+00 : f32
      %47 = vector.broadcast %cst_29 : f32 to vector<6x1xf32>
      %c0_30 = arith.constant 0 : index
      %c0_31 = arith.constant 0 : index
      %48 = vector.load %arg14[%c0_30, %c0_31] : memref<6x1xf32, #tpu.memory_space<vmem>>, vector<6x1xf32>
      tpu.vector_store %arg14[%c0_30, %c0_31], %47 {strides = array<i32>} : memref<6x1xf32, #tpu.memory_space<vmem>>, vector<6x1xf32>,
    } else {
    }
    %c0 = arith.constant 0 : index
    %c0_3 = arith.constant 0 : index
    %c0_4 = arith.constant 0 : index
    %c0_5 = arith.constant 0 : index
    %7 = vector.load %arg4[%c0, %c0_3, %c0_4, %c0_5] : memref<1x1x8x1024xbf16, #tpu.memory_space<vmem>>, vector<1x1x8x1024xbf16>
    %8 = vector.shape_cast %7 : vector<1x1x8x1024xbf16> to vector<8x1024xbf16>
    %9 = arith.extf %8 : vector<8x1024xbf16> to vector<8x1024xf32>
    %c0_6 = arith.constant 0 : index
    %c0_7 = arith.constant 0 : index
    %c0_8 = arith.constant 0 : index
    %10 = vector.load %arg5[%c0_6, %c0_7, %c0_8] : memref<1x8x1xf32, #tpu.memory_space<vmem>>, vector<1x8x1xf32>
    %11 = vector.shape_cast %10 : vector<1x8x1xf32> to vector<8x1xf32>
    %12 = vector.broadcast %11 : vector<8x1xf32> to vector<8x1024xf32>
    %13 = arith.mulf %9, %12 : vector<8x1024xf32>
    %c0_9 = arith.constant 0 : index
    %c0_10 = arith.constant 0 : index
    %c0_11 = arith.constant 0 : index
    %14 = vector.load %arg6[%c0_9, %c0_10, %c0_11] : memref<1x8x1xf32, #tpu.memory_space<vmem>>, vector<1x8x1xf32>
    %15 = vector.shape_cast %14 : vector<1x8x1xf32> to vector<8x1xf32>
    %16 = vector.broadcast %15 : vector<8x1xf32> to vector<8x1024xf32>
    %17 = arith.addf %13, %16 : vector<8x1024xf32>
    %cst = arith.constant 0.000000e+00 : f32
    %18 = vector.broadcast %cst : f32 to vector<8x1024xf32>
    %19 = arith.subf %18, %17 : vector<8x1024xf32>
    %20 = math.exp %19 : vector<8x1024xf32>
    %cst_12 = arith.constant 1.000000e+00 : f32
    %21 = vector.broadcast %cst_12 : f32 to vector<8x1024xf32>
    %22 = arith.addf %21, %20 : vector<8x1024xf32>
    %23 = tpu.reciprocal %22 {approx = true} : vector<8x1024xf32> -> vector<8x1024xf32>
    %24 = arith.mulf %17, %23 : vector<8x1024xf32>
    %25 = arith.truncf %24 : vector<8x1024xf32> to vector<8x1024xbf16>
    %c0_13 = arith.constant 0 : index
    %c0_14 = arith.constant 0 : index
    %c0_15 = arith.constant 0 : index
    %26 = vector.load %arg7[%c0_13, %c0_14, %c0_15] : memref<1x6x8xbf16, #tpu.memory_space<vmem>>, vector<1x6x8xbf16>
    %27 = vector.shape_cast %26 : vector<1x6x8xbf16> to vector<6x8xbf16>
    %cst_16 = arith.constant dense<0.000000e+00> : vector<6x1024xf32>
    %28 = tpu.matmul %27, %25, %cst_16 {dimension_numbers = #tpu.dot_dimension_numbers<[1], [0], [0], [1], [0, 0, 1, 1], [], []>} : vector<6x8xbf16>, vector<8x1024xbf16>, vector<6x1024xf32> -> vector<6x1024xf32>
    %c0_i32_17 = arith.constant 0 : i32
    %29 = arith.cmpi eq, %arg3, %c0_i32_17 : i32
    %30 = arith.extui %29 : i1 to i32
    %c0_i32_18 = arith.constant 0 : i32
    %31 = arith.cmpi ne, %30, %c0_i32_18 : i32
    scf.if %31 {
      %c0_26 = arith.constant 0 : index
      %c0_27 = arith.constant 0 : index
      %45 = vector.load %arg8[%c0_26, %c0_27] : memref<6x1xf32, #tpu.memory_space<vmem>>, vector<6x1xf32>
      %46 = vector.broadcast %45 : vector<6x1xf32> to vector<6x1024xf32>
      %47 = arith.addf %28, %46 : vector<6x1024xf32>
      %c0_28 = arith.constant 0 : index
      %c0_29 = arith.constant 0 : index
      %48 = vector.load %arg12[%c0_28, %c0_29] : memref<6x1024xf32, #tpu.memory_space<vmem>>, vector<6x1024xf32>
      tpu.vector_store %arg12[%c0_28, %c0_29], %47 {strides = array<i32>} : memref<6x1024xf32, #tpu.memory_space<vmem>>, vector<6x1024xf32>,
    } else {
    }
    %c0_i32_19 = arith.constant 0 : i32
    %32 = arith.cmpi sgt, %arg3, %c0_i32_19 : i32
    %33 = arith.extui %32 : i1 to i32
    %c0_i32_20 = arith.constant 0 : i32
    %34 = arith.cmpi ne, %33, %c0_i32_20 : i32
    scf.if %34 {
      %c0_26 = arith.constant 0 : index
      %c0_27 = arith.constant 0 : index
      %45 = vector.load %arg12[%c0_26, %c0_27] : memref<6x1024xf32, #tpu.memory_space<vmem>>, vector<6x1024xf32>
      %46 = arith.addf %45, %28 : vector<6x1024xf32>
      %c0_28 = arith.constant 0 : index
      %c0_29 = arith.constant 0 : index
      %47 = vector.load %arg12[%c0_28, %c0_29] : memref<6x1024xf32, #tpu.memory_space<vmem>>, vector<6x1024xf32>
      tpu.vector_store %arg12[%c0_28, %c0_29], %46 {strides = array<i32>} : memref<6x1024xf32, #tpu.memory_space<vmem>>, vector<6x1024xf32>,
    } else {
    }
    %c0_i32_21 = arith.constant 0 : i32
    %35 = arith.cmpi eq, %arg3, %c0_i32_21 : i32
    %36 = arith.extui %35 : i1 to i32
    %c0_i32_22 = arith.constant 0 : i32
    %37 = arith.cmpi ne, %36, %c0_i32_22 : i32
    scf.if %37 {
      %c0_26 = arith.constant 0 : index
      %c0_27 = arith.constant 0 : index
      %45 = vector.load %arg12[%c0_26, %c0_27] : memref<6x1024xf32, #tpu.memory_space<vmem>>, vector<6x1024xf32>
      %c0_28 = arith.constant 0 : index
      %c0_29 = arith.constant 0 : index
      %46 = vector.load %arg13[%c0_28, %c0_29] : memref<6x1xf32, #tpu.memory_space<vmem>>, vector<6x1xf32>
      %cst_30 = arith.constant dense<0.000000e+00> : vector<6xf32>
      %47 = vector.multi_reduction <add>, %45, %cst_30 [1] : vector<6x1024xf32> to vector<6xf32>
      %48 = vector.shape_cast %47 : vector<6xf32> to vector<6x1xf32>
      %49 = arith.addf %46, %48 : vector<6x1xf32>
      %c0_31 = arith.constant 0 : index
      %c0_32 = arith.constant 0 : index
      %50 = vector.load %arg13[%c0_31, %c0_32] : memref<6x1xf32, #tpu.memory_space<vmem>>, vector<6x1xf32>
      tpu.vector_store %arg13[%c0_31, %c0_32], %49 {strides = array<i32>} : memref<6x1xf32, #tpu.memory_space<vmem>>, vector<6x1xf32>,
      %c0_33 = arith.constant 0 : index
      %c0_34 = arith.constant 0 : index
      %51 = vector.load %arg14[%c0_33, %c0_34] : memref<6x1xf32, #tpu.memory_space<vmem>>, vector<6x1xf32>
      %52 = arith.mulf %45, %45 : vector<6x1024xf32>
      %cst_35 = arith.constant dense<0.000000e+00> : vector<6xf32>
      %53 = vector.multi_reduction <add>, %52, %cst_35 [1] : vector<6x1024xf32> to vector<6xf32>
      %54 = vector.shape_cast %53 : vector<6xf32> to vector<6x1xf32>
      %55 = arith.addf %51, %54 : vector<6x1xf32>
      %c0_36 = arith.constant 0 : index
      %c0_37 = arith.constant 0 : index
      %56 = vector.load %arg14[%c0_36, %c0_37] : memref<6x1xf32, #tpu.memory_space<vmem>>, vector<6x1xf32>
      tpu.vector_store %arg14[%c0_36, %c0_37], %55 {strides = array<i32>} : memref<6x1xf32, #tpu.memory_space<vmem>>, vector<6x1xf32>,
      %c0_38 = arith.constant 0 : index
      %c0_39 = arith.constant 0 : index
      %c0_40 = arith.constant 0 : index
      %c0_41 = arith.constant 0 : index
      %57 = vector.load %arg9[%c0_38, %c0_39, %c0_40, %c0_41] : memref<1x1x6x1024xf32, #tpu.memory_space<vmem>>, vector<1x1x6x1024xf32>
      %58 = vector.shape_cast %57 : vector<1x1x6x1024xf32> to vector<6x1024xf32>
      %59 = vector.shape_cast %45 : vector<6x1024xf32> to vector<1x1x6x1024xf32>
      tpu.vector_store %arg9[%c0_38, %c0_39, %c0_40, %c0_41], %59 {strides = array<i32>} : memref<1x1x6x1024xf32, #tpu.memory_space<vmem>>, vector<1x1x6x1024xf32>,
    } else {
    }
    %c3_i32 = arith.constant 3 : i32
    %38 = arith.cmpi eq, %arg1, %c3_i32 : i32
    %c0_i32_23 = arith.constant 0 : i32
    %39 = arith.cmpi eq, %arg2, %c0_i32_23 : i32
    %40 = arith.andi %38, %39 : i1
    %c0_i32_24 = arith.constant 0 : i32
    %41 = arith.cmpi eq, %arg3, %c0_i32_24 : i32
    %42 = arith.andi %40, %41 : i1
    %43 = arith.extui %42 : i1 to i32
    %c0_i32_25 = arith.constant 0 : i32
    %44 = arith.cmpi ne, %43, %c0_i32_25 : i32
    scf.if %44 {
      %c0_26 = arith.constant 0 : index
      %c0_27 = arith.constant 0 : index
      %45 = vector.load %arg13[%c0_26, %c0_27] : memref<6x1xf32, #tpu.memory_space<vmem>>, vector<6x1xf32>
      %cst_28 = arith.constant 2.44140625E-4 : f32
      %46 = vector.broadcast %cst_28 : f32 to vector<6x1xf32>
      %47 = arith.mulf %45, %46 : vector<6x1xf32>
      %c0_29 = arith.constant 0 : index
      %c0_30 = arith.constant 0 : index
      %48 = vector.load %arg14[%c0_29, %c0_30] : memref<6x1xf32, #tpu.memory_space<vmem>>, vector<6x1xf32>
      %cst_31 = arith.constant 2.44140625E-4 : f32
      %49 = vector.broadcast %cst_31 : f32 to vector<6x1xf32>
      %50 = arith.mulf %48, %49 : vector<6x1xf32>
      %51 = arith.mulf %47, %47 : vector<6x1xf32>
      %52 = arith.subf %50, %51 : vector<6x1xf32>
      %cst_32 = arith.constant 0.000000e+00 : f32
      %53 = vector.broadcast %cst_32 : f32 to vector<6x1xf32>
      %54 = arith.maximumf %52, %53 : vector<6x1xf32>
      %cst_33 = arith.constant 9.99999974E-6 : f32
      %55 = vector.broadcast %cst_33 : f32 to vector<6x1xf32>
      %56 = arith.addf %54, %55 : vector<6x1xf32>
      %57 = math.rsqrt %56 : vector<6x1xf32>
      %c0_34 = arith.constant 0 : index
      %c0_35 = arith.constant 0 : index
      %c0_36 = arith.constant 0 : index
      %58 = vector.load %arg10[%c0_34, %c0_35, %c0_36] : memref<1x6x1xf32, #tpu.memory_space<vmem>>, vector<1x6x1xf32>
      %59 = vector.shape_cast %58 : vector<1x6x1xf32> to vector<6x1xf32>
      %60 = vector.shape_cast %57 : vector<6x1xf32> to vector<1x6x1xf32>
      tpu.vector_store %arg10[%c0_34, %c0_35, %c0_36], %60 {strides = array<i32>} : memref<1x6x1xf32, #tpu.memory_space<vmem>>, vector<1x6x1xf32>,
      %cst_37 = arith.constant 0.000000e+00 : f32
      %61 = vector.broadcast %cst_37 : f32 to vector<6x1xf32>
      %62 = arith.subf %61, %47 : vector<6x1xf32>
      %63 = arith.mulf %62, %57 : vector<6x1xf32>
      %c0_38 = arith.constant 0 : index
      %c0_39 = arith.constant 0 : index
      %c0_40 = arith.constant 0 : index
      %64 = vector.load %arg11[%c0_38, %c0_39, %c0_40] : memref<1x6x1xf32, #tpu.memory_space<vmem>>, vector<1x6x1xf32>
      %65 = vector.shape_cast %64 : vector<1x6x1xf32> to vector<6x1xf32>
      %66 = vector.shape_cast %63 : vector<6x1xf32> to vector<1x6x1xf32>
      tpu.vector_store %arg11[%c0_38, %c0_39, %c0_40], %66 {strides = array<i32>} : memref<1x6x1xf32, #tpu.memory_space<vmem>>, vector<1x6x1xf32>,
    } else {
    }
    return
  }
  func.func @transform_0(%arg0: i32, %arg1: i32, %arg2: i32, %arg3: i32) -> (i32, i32, i32, i32) {
    %c0_i32 = arith.constant 0 : i32
    return %arg0, %arg1, %arg3, %arg2 : i32, i32, i32, i32
  }
  func.func @transform_1(%arg0: i32, %arg1: i32, %arg2: i32, %arg3: i32) -> (i32, i32, i32) {
    %c0_i32 = arith.constant 0 : i32
    %c0_i32_0 = arith.constant 0 : i32
    return %arg0, %arg3, %c0_i32 : i32, i32, i32
  }
  func.func @transform_2(%arg0: i32, %arg1: i32, %arg2: i32, %arg3: i32) -> (i32, i32, i32) {
    %c0_i32 = arith.constant 0 : i32
    %c0_i32_0 = arith.constant 0 : i32
    return %arg0, %arg3, %c0_i32 : i32, i32, i32
  }
  func.func @transform_3(%arg0: i32, %arg1: i32, %arg2: i32, %arg3: i32) -> (i32, i32, i32) {
    %c0_i32 = arith.constant 0 : i32
    %c0_i32_0 = arith.constant 0 : i32
    %c0_i32_1 = arith.constant 0 : i32
    return %c0_i32, %c0_i32_0, %arg3 : i32, i32, i32
  }
  func.func @transform_4(%arg0: i32, %arg1: i32, %arg2: i32, %arg3: i32) -> (i32, i32) {
    %c0_i32 = arith.constant 0 : i32
    %c0_i32_0 = arith.constant 0 : i32
    %c0_i32_1 = arith.constant 0 : i32
    return %c0_i32, %c0_i32_0 : i32, i32
  }
  func.func @transform_5(%arg0: i32, %arg1: i32, %arg2: i32, %arg3: i32) -> (i32, i32, i32, i32) {
    %c0_i32 = arith.constant 0 : i32
    %c0_i32_0 = arith.constant 0 : i32
    return %arg0, %arg1, %c0_i32, %arg2 : i32, i32, i32, i32
  }
  func.func @transform_6(%arg0: i32, %arg1: i32, %arg2: i32, %arg3: i32) -> (i32, i32, i32) {
    %c0_i32 = arith.constant 0 : i32
    %c0_i32_0 = arith.constant 0 : i32
    %c0_i32_1 = arith.constant 0 : i32
    return %arg0, %c0_i32, %c0_i32_0 : i32, i32, i32
  }
  func.func @transform_7(%arg0: i32, %arg1: i32, %arg2: i32, %arg3: i32) -> (i32, i32, i32) {
    %c0_i32 = arith.constant 0 : i32
    %c0_i32_0 = arith.constant 0 : i32
    %c0_i32_1 = arith.constant 0 : i32
    return %arg0, %c0_i32, %c0_i32_0 : i32, i32, i32
  }
}

</mosaic_0001>

<bundles_post_ra>
// kernel: vit_head_forward.13
= control target key start
LH: loop header
LB: loop body
LE: loop exit
PB: predicated region body
PF: predicated region fallthrough
CT: control target
= control target key end

     0   :  { %s602_s12 = smov 0   ;;  %s604_s13 = smov 0   ;;  %s666_s0 = inlined_call_operand.vmem [shape: bf16[2,4,16,16], index: 0, kind: input, shape index: {}]   ;;  %s667_s1 = inlined_call_operand.vmem [shape: f32[2,16,1], index: 1, kind: input, shape index: {}]   ;;  %s668_s2 = inlined_call_operand.vmem [shape: f32[2,16,1], index: 2, kind: input, shape index: {}]   ;;  %s669_s3 = inlined_call_operand.vmem [shape: bf16[2,4,16,16], index: 3, kind: output, shape index: {}]  }
   0x1   :  { %s606_s14 = smov 0   ;;  %s608_s15 = smov 0  }
   0x2   :  { %s610_s16 = smov 0  }
   0x3 LB: > { %s28_s17 = sadd.s32 1, %s571_s14  ;;  %s32_s18 = sadd.s32 1, %s575_s15  ;;  %s579_s16 = sphi %s610_s16, %s13_s16   ;;  %s575_s15 = sphi %s608_s15, %s673_s15   ;;  %s571_s14 = sphi %s606_s14, %s672_s14   ;;  %s567_s13 = sphi %s604_s13, %s671_s13   ;;  %s563_s12 = sphi %s602_s12, %s670_s12  }
   0x4   : > { %p30_p0 = scmp.ge.s32.totalorder %s28_s17, 4  ;;  %p467_p1 = scmp.ge.s32.totalorder %s579_s16, 1 }
   0x5   : > { %p191_p2 = scmp.lt.s32.totalorder %s579_s16, 9 }
   0x6   : > { %s675_s17 = smov (%p30_p0, %s28_s17), 0  ;;  %s677_s18 = smov (!%p30_p0, %s32_s18), %s575_s15 }
   0x7   : > { %p192_p3 = pnand %p467_p1, %p191_p2  ;;  %p34_p4 = scmp.ge.s32.totalorder %s677_s18, 2 }
   0x8   : > { %p239_p5 = scmp.lt.s32.totalorder (!%p192_p3), %s567_s13, 1  ;;  %v581_v0 = vmov (!%p192_p3), 0   ;;  %p241_p6 = scmp.lt.s32.totalorder (!%p192_p3), %s563_s12, 3  ;;  %vm325_vm0 = vcmask (!%p192_p3), 125952  }
   0x9   : > { %s679_s18 = smov (%p34_p4, %s677_s18), 0  ;;  %195 = sbr.rel (%p192_p3) target bundleno = 190 (0xbe), region = 32 }
   0xa   : > { %532 = vset.pattern.permute.xlu1 (!%p192_p3), %v581_v0  ;;  %531 = vset.pattern.permute.xlu0 (!%p192_p3), %v581_v0 }
  0x10   : > { %s681_s13 = smov (!%p239_p5, %s567_s13), 1  ;;  %s683_s12 = smov (!%p241_p6, %s563_s12), 3 }
  0x11   : > { %s482_s19 = sshll.u32 %s681_s13, 4  ;;  %s468_s26 = sshll.u32 %s683_s12, 1 }
  0x12   : > { %s260_s22 = scalar_lea.vmem %s668_s2, %s482_s19  ;;  %s255_s25 = scalar_lea.vmem %s667_s1, %s482_s19 }
  0x13   : > { %v291_v1 = vld [vmem:[%s260_s22] sm:$0xff]  ;;  %v292_v3 = vld [vmem:[%s260_s22 + $0x8] sm:$0xff]  ;;  %s469_s27 = sshll.u32 %s681_s13, 3 }
  0x14   : > { %v277_v2 = vld [vmem:[%s255_s25] sm:$0xff]  ;;  %295 = vperm.xlu1 %532, %v291_v1   ;;  %v278_v4 = vld [vmem:[%s255_s25 + $0x8] sm:$0xff]  ;;  %s642_s28 = sadd.s32 %s469_s27, %s468_s26 }
  0x15   : > { %281 = vperm.xlu0 %531, %v277_v2   ;;  %s470_s29 = sshll.u32 %s642_s28, 2 }
  0x16   : > { %s250_s5 = scalar_lea.vmem %s666_s0, %s470_s29  ;;  %s272_s8 = scalar_lea.vmem %s669_s3, %s470_s29 }
  0x17   : > { %v487_v5 = vld [vmem:[%s250_s5] sm:$0xff]  }
  0x18   : > { %300 = vperm.xlu1 %532, %v292_v3   ;;  %v488_v6 = vunpack.c.l.bf16 %v487_v5  ;;  %v489_v10 = vunpack.c.h.bf16 %v487_v5 }
  0x19   : > { %286 = vperm.xlu0 %531, %v278_v4  }
  0x93   : > { %v296_v7 = vpop.permute.xlu1 %295 }
  0x94   : > { %v282_v8 = vpop.permute.xlu0 %281 }
  0x95   : > { %v289_v9 = vmul.f32 %v488_v6, %v282_v8 }
  0x97   : > { %v303_v11 = vadd.f32 %v296_v7, %v289_v9  ;;  %v301_v15 = vpop.permute.xlu1 %300 }
  0x98   : > { %v287_v12 = vpop.permute.xlu0 %286 }
  0x99   : > { %v305_v13 = vsub.f32 0.0, %v303_v11  ;;  %v290_v14 = vmul.f32 %v489_v10, %v287_v12 }
  0x9b   : > { %v307_v16 = vmul.f32 1.442695, %v305_v13  ;;  %v304_v17 = vadd.f32 %v301_v15, %v290_v14 }
  0x9d   : > { %533 = vpow2.f32 %v307_v16  ;;  %v306_v18 = vsub.f32 0.0, %v304_v17 }
  0x9f   : > { %v309_v19 = vmul.f32 1.442695, %v306_v18 }
  0xa1   : > { %535 = vpow2.f32 %v309_v19 }
  0xa7   : > { %v534_v20 = vpop.eup %533 }
  0xa8   : > { %v311_v21 = vadd.f32 1.0, %v534_v20 }
  0xaa   : > { %537 = vrcp.f32 %v311_v21 }
  0xab   : > { %v536_v22 = vpop.eup %535 }
  0xac   : > { %v312_v23 = vadd.f32 1.0, %v536_v22 }
  0xae   : > { %539 = vrcp.f32 %v312_v23 }
  0xb4   : > { %v538_v24 = vpop.eup %537 }
  0xb5   : > { %v315_v25 = vmul.f32 %v538_v24, %v303_v11 }
  0xb7   : > { %v484_v26 = vpack.c.bf16 %v315_v25, %v315_v25 }
  0xb8   : > { %v540_v27 = vpop.eup %539 }
  0xb9   : > { %326 = vst.msk [vmem:[%s272_s8] sm:$0xf] %vm325_vm0, %v484_v26  ;;  %v316_v28 = vmul.f32 %v540_v27, %v304_v17 }
  0xbb   : > { %v485_v29 = vpack.c.bf16 %v316_v28, %v316_v28 }
  0xbd   : > { %327 = vst.msk [vmem:[%s272_s8 + $0x4] sm:$0xf] %vm325_vm0, %v485_v29 }
  0xbe PF: > { %s13_s16 = sadd.s32 1, %s579_s16   ;;  %s670_s12 = smov %s571_s14 }
  0xbf   : > { %p10_p7 = scmp.ge.s32.totalorder %s13_s16, 10   ;;  %s671_s13 = smov %s575_s15 }
  0xc0   : > { %s672_s14 = smov %s675_s17  ;;  %s673_s15 = smov %s679_s18 }
  0xc1   :  { %12 = sbr.rel (!%p10_p7) target bundleno = 3 (0x3), region = 68 }

// kernel: vit_head_forward.12
= control target key start
LH: loop header
LB: loop body
LE: loop exit
PB: predicated region body
PF: predicated region fallthrough
CT: control target
= control target key end

     0   :  { %s1180_s24 = smov 0   ;;  %s1182_s1 = smov 0   ;;  %s1295_s0 = inlined_call_operand.vmem [shape: bf16[2,4,128,16], index: 0, kind: input, shape index: {}]   ;;  %s1296_s1 = inlined_call_operand.vmem [shape: f32[2,128,1], index: 1, kind: input, shape index: {}]   ;;  %s1297_s2 = inlined_call_operand.vmem [shape: f32[2,128,1], index: 2, kind: input, shape index: {}]   ;;  %s1298_s3 = inlined_call_operand.vmem [shape: bf16[4,16,128], index: 3, kind: input, shape index: {}]   ;;  %s1299_s4 = inlined_call_operand.vmem [shape: f32[16,1], index: 4, kind: input, shape index: {}]   ;;  %s1300_s5 = inlined_call_operand.vmem [shape: bf16[2,4,16,16], index: 5, kind: output, shape index: {0}]   ;;  %s1301_s6 = inlined_call_operand.vmem [shape: f32[2,16,1], index: 6, kind: output, shape index: {1}]   ;;  %s1302_s7 = inlined_call_operand.vmem [shape: f32[2,16,1], index: 7, kind: output, shape index: {2}]  }
   0x1   :  { %s1184_s2 = smov 0   ;;  %s1186_s25 = smov 0  }
   0x2   :  { %s1188_s26 = smov 0  }
   0x3 LB: > { %s40_s27 = sadd.s32 1, %s1126_s2  ;;  %s44_s28 = sadd.s32 1, %s1130_s25  ;;  %s1134_s26 = sphi %s1188_s26, %s18_s26   ;;  %s1130_s25 = sphi %s1186_s25, %s1310_s25   ;;  %s1126_s2 = sphi %s1184_s2, %s1309_s2   ;;  %s1122_s1 = sphi %s1182_s1, %s1308_s1   ;;  %s1118_s24 = sphi %s1180_s24, %s1307_s24  }
   0x4   : > { %p42_p0 = scmp.ge.s32.totalorder %s40_s27, 4  ;;  %p970_p1 = scmp.ge.s32.totalorder %s1134_s26, 1 }
   0x5   : > { %p339_p2 = scmp.lt.s32.totalorder %s1134_s26, 9 }
   0x6   : > { %s1312_s27 = smov (%p42_p0, %s40_s27), 0  ;;  %s1314_s28 = smov (!%p42_p0, %s44_s28), %s1130_s25 }
   0x7   : > { %1303 = sst [smem:[#allocation5_spill]] %s1312_s27  ;;  %p340_p3 = pnand %p970_p1, %p339_p2 }
   0x8   : > { %p46_p4 = scmp.ge.s32.totalorder %s1314_s28, 2  ;;  %p426_p5 = scmp.lt.s32.totalorder (!%p340_p3), %s1122_s1, 1 }
   0x9   : > { %343 = sbr.rel (%p340_p3) target bundleno = 470 (0x1d6), region = 40  ;;  %p428_p6 = scmp.lt.s32.totalorder (!%p340_p3), %s1118_s24, 3 }
   0xa   : > { %s1316_s28 = smov (%p46_p4, %s1314_s28), 0  ;;  %p493_p7 = scmp.eq.s32.totalorder (!%p340_p3), %s1118_s24, 0 }
   0xb   : > { %1304 = sst [smem:[#allocation6_spill]] %s1316_s28 }
  0x10   : > { %s1318_s1 = smov (!%p426_p5, %s1122_s1), 1  ;;  %vm502_vm0 = vcmask (%p493_p7), 7168   ;;  %v1136_v0 = vmov (%p493_p7), 0.0  }
  0x11   : > { %s429_s29 = scalar_select %p428_p6, %s1118_s24, 3 }
  0x12   : > { %s972_s30 = sshll.u32 %s1318_s1, 6  ;;  %s977_s8 = sshll.u32 %s1318_s1, 3  ;;  %503 = vst.msk [vmem:[#allocation3] sm:$0xff] (%p493_p7), %vm502_vm0, %v1136_v0  ;;  %504 = vst.msk [vmem:[#allocation3 + $0x8] sm:$0xff] (%p493_p7), %vm502_vm0, %v1136_v0 }
  0x13   : > { %s971_s9 = sshll.u32 %s429_s29, 4  ;;  %s1000_s10 = sshll.u32 %s429_s29, 3  ;;  %505 = vst.msk [vmem:[#allocation4] sm:$0xff] (%p493_p7), %vm502_vm0, %v1136_v0  ;;  %506 = vst.msk [vmem:[#allocation4 + $0x8] sm:$0xff] (%p493_p7), %vm502_vm0, %v1136_v0 }
  0x14   : > { %s438_s11 = sadd.s32 %s972_s30, %s971_s9  ;;  %s1218_s14 = scalar_lea.vmem %s1298_s3, %s1000_s10 }
  0x15   : > { %s973_s15 = sshll.u32 %s438_s11, 2  ;;  %s976_s16 = sshll.u32 %s429_s29, 1 }
  0x16   : > { %s1223_s19 = scalar_lea.vmem %s1295_s0, %s973_s15  ;;  %s479_s20 = sadd.s32 %s977_s8, %s976_s16 }
  0x17   : > { %s978_s21 = sshll.u32 %s479_s20, 2  ;;  %s1001_s22 = sshll.u32 %s1318_s1, 4 }
  0x18   : > { %s1228_s27 = scalar_lea.vmem %s1300_s5, %s978_s21  ;;  %s1233_s10 = scalar_lea.vmem %s1301_s6, %s1001_s22 }
  0x19   : > { %s1238_s12 = scalar_lea.vmem %s1302_s7, %s1001_s22  ;;  %501 = sbr.rel (!%p493_p7) target bundleno = 32 (0x20), region = 44 }
  0x20 PF: > { %v1083_v1 = vld [vmem:[%s1223_s19] sm:$0xff]   ;;  %v1137_v2 = vmov 0.0   ;;  %v1084_v3 = vld [vmem:[%s1223_s19 + $0x8] sm:$0xff]   ;;  %vm1138_vm1 = vmmov 0   ;;  %v1139_v4 = vmov 0   ;;  %v1085_v5 = vld [vmem:[%s1223_s19 + $0x10] sm:$0xff]  }
  0x21   : > { %1018 = vmatprep.subr.bf16.mxu0 %v1137_v2  ;;  %1034 = vmatprep.mubr.msk.bf16.mxu0 %vm1138_vm1, %v1137_v2  ;;  %v623_v6 = vld [vmem:[%s1299_s4] sm:$0xff]  ;;  %v1086_v7 = vld [vmem:[%s1223_s19 + $0x18] sm:$0xff]   ;;  %v624_v8 = vld [vmem:[%s1299_s4 + $0x8] sm:$0xff]  ;;  %vm637_vm2 = vcmask 130048   ;;  %vm692_vm3 = vcmask 125952   ;;  %p695_p8 = scmp.eq.s32.totalorder %s1118_s24, 3 }
  0x22   : > { %1019 = vmatpush3.bf16.msra.mxu0 %v1083_v1  ;;  %1082 = vset.pattern.permute.xlu0 %v1139_v4  ;;  %v1087_v9 = vld [vmem:[%s1223_s19 + $0x20] sm:$0xff]   ;;  %v1088_v10 = vld [vmem:[%s1223_s19 + $0x28] sm:$0xff]   ;;  %v1089_v11 = vld [vmem:[%s1223_s19 + $0x30] sm:$0xff]   ;;  %vm667_vm4 = vcmask 7168  }
  0x23   : > { %1020 = vmatprep.subr.bf16.mxu0 %v1137_v2  ;;  %627 = vperm.xlu0 %1082, %v623_v6   ;;  %v1090_v12 = vld [vmem:[%s1223_s19 + $0x38] sm:$0xff]   ;;  %v1091_v13 = vld [vmem:[%s1218_s14] sm:$0xff]   ;;  %v656_v32 = vld [vmem:[#allocation3] sm:$0xff] }
  0x24   : > { %v670_v34 = vld [vmem:[#allocation4] sm:$0xff]  ;;  %v657_v37 = vld [vmem:[#allocation3 + $0x8] sm:$0xff]  ;;  %v671_v41 = vld [vmem:[#allocation4 + $0x8] sm:$0xff] }
  0x26   : > { %1021 = vmatpush3.bf16.msra.mxu0 %v1084_v3 }
  0x27   : > { %1022 = vmatprep.subr.bf16.mxu0 %v1137_v2  ;;  %632 = vperm.xlu0 %1082, %v624_v8  }
  0x2a   : > { %1023 = vmatpush3.bf16.msra.mxu0 %v1085_v5 }
  0x2b   : > { %1024 = vmatprep.subr.bf16.mxu0 %v1137_v2 }
  0x2e   : > { %1025 = vmatpush3.bf16.msra.mxu0 %v1086_v7 }
  0x2f   : > { %1026 = vmatprep.subr.bf16.mxu0 %v1137_v2 }
  0x32   : > { %1027 = vmatpush3.bf16.msra.mxu0 %v1087_v9 }
  0x33   : > { %1028 = vmatprep.subr.bf16.mxu0 %v1137_v2 }
  0x36   : > { %1029 = vmatpush3.bf16.msra.mxu0 %v1088_v10 }
  0x37   : > { %1030 = vmatprep.subr.bf16.mxu0 %v1137_v2 }
  0x3a   : > { %1031 = vmatpush3.bf16.msra.mxu0 %v1089_v11 }
  0x3b   : > { %1032 = vmatprep.subr.bf16.mxu0 %v1137_v2 }
  0x3e   : > { %1033 = vmatpush3.bf16.msra.mxu0 %v1090_v12 }
  0x41   : > { %1035 = vmatmul.mubr.bf16.vlgmr.msra.gmra.mrb[0].mxu0 %v1091_v13 }
  0xa2   : > { %v628_v14 = vpop.permute.xlu0 %627 }
  0xa6   : > { %v633_v18 = vpop.permute.xlu0 %632 }
 0x114   : > { %v613_v15 = vpop.f32.mrb[0].mxu0 }
 0x115   : > { %v635_v16 = vadd.f32 %v628_v14, %v613_v15  ;;  %v1036_v17 = vpop.f32.mrb[1].mxu0 }
 0x116   : > { %v616_v19 = vpop.f32.mrb[2].mxu0 }
 0x117   : > { %638 = vst.msk [vmem:[#allocation2] sm:$0xff] %vm637_vm2, %v635_v16  ;;  %v636_v20 = vadd.f32 %v633_v18, %v616_v19  ;;  %v1037_v21 = vpop.f32.mrb[3].mxu0 }
 0x119   : > { %639 = vst.msk [vmem:[#allocation2 + $0x8] sm:$0xff] %vm637_vm2, %v636_v20 }
 0x11e   : > { %v654_v22 = vld [vmem:[#allocation2] sm:$0xff] }
 0x11f   : > { %v659_v23 = vsel %vm637_vm2, %v654_v22, 0.0  ;;  %v1005_v24 = vpack.c.bf16 %v654_v22, %v654_v22  ;;  %v672_v25 = vmul.f32 %v654_v22, %v654_v22 }
 0x120   : > { %660 = vadd.xlane.f32.xlu1 %v659_v23  ;;  %v655_v26 = vld [vmem:[#allocation2 + $0x8] sm:$0xff] }
 0x121   : > { %693 = vst.msk [vmem:[%s1228_s27] sm:$0xf] %vm692_vm3, %v1005_v24  ;;  %v674_v27 = vsel %vm637_vm2, %v672_v25, 0.0  ;;  %v1006_v28 = vpack.c.bf16 %v655_v26, %v655_v26  ;;  %v662_v29 = vsel %vm637_vm2, %v655_v26, 0.0  ;;  %v673_v30 = vmul.f32 %v655_v26, %v655_v26 }
 0x122   : > { %675 = vadd.xlane.f32.xlu0 %v674_v27 }
 0x123   : > { %694 = vst.msk [vmem:[%s1228_s27 + $0x4] sm:$0xf] %vm692_vm3, %v1006_v28  ;;  %v677_v31 = vsel %vm637_vm2, %v673_v30, 0.0 }
 0x124   : > { %663 = vadd.xlane.f32.xlu1 %v662_v29 }
 0x128   : > { %678 = vadd.xlane.f32.xlu1 %v677_v31 }
 0x1ad   : > { %v661_v33 = vpop.xlane.xlu1 %660 }
 0x1ae   : > { %v665_v35 = vadd.f32 %v661_v33, %v656_v32 }
 0x1af   : > { %v676_v36 = vpop.xlane.xlu0 %675 }
 0x1b0   : > { %668 = vst.msk [vmem:[#allocation3] sm:$0xff] %vm667_vm4, %v665_v35  ;;  %v680_v38 = vadd.f32 %v676_v36, %v670_v34 }
 0x1b1   : > { %v664_v39 = vpop.xlane.xlu1 %663 }
 0x1b2   : > { %682 = vst.msk [vmem:[#allocation4] sm:$0xff] %vm667_vm4, %v680_v38  ;;  %v666_v40 = vadd.f32 %v664_v39, %v657_v37  ;;  %701 = sbr.rel (!%p695_p8) target bundleno = 470 (0x1d6), region = 60 }
 0x1b4   : > { %669 = vst.msk [vmem:[#allocation3 + $0x8] sm:$0xff] %vm667_vm4, %v666_v40 }
 0x1b5   : > { %v679_v42 = vpop.xlane.xlu1 %678 }
 0x1b6   : > { %v681_v43 = vadd.f32 %v679_v42, %v671_v41 }
 0x1b7   : > { %v702_v44 = vld [vmem:[#allocation3] sm:$0xff] (%p695_p8) }
 0x1b8   : > { %683 = vst.msk [vmem:[#allocation4 + $0x8] sm:$0xff] %vm667_vm4, %v681_v43  ;;  %v704_v47 = vmul.f32 (%p695_p8), 0.015625, %v702_v44 }
 0x1b9   : > { %v706_v45 = vld [vmem:[#allocation4] sm:$0xff] }
 0x1ba   : > { %v708_v48 = vmul.f32 0.015625, %v706_v45  ;;  %v710_v52 = vmul.f32 %v704_v47, %v704_v47  ;;  %v723_v60 = vsub.f32 0.0, %v704_v47 }
 0x1bb   : > { %v703_v46 = vld [vmem:[#allocation3 + $0x8] sm:$0xff] }
 0x1bc   : > { %v705_v49 = vmul.f32 0.015625, %v703_v46  ;;  %v712_v54 = vsub.f32 %v708_v48, %v710_v52 }
 0x1be   : > { %v711_v53 = vmul.f32 %v705_v49, %v705_v49  ;;  %v714_v56 = vmax.f32 %v712_v54, 0.0  ;;  %v724_v61 = vsub.f32 0.0, %v705_v49 }
 0x1bf   : > { %v707_v50 = vld [vmem:[#allocation4 + $0x8] sm:$0xff] }
 0x1c0   : > { %v709_v51 = vmul.f32 0.015625, %v707_v50  ;;  %v716_v58 = vadd.f32 1e-05, %v714_v56 }
 0x1c2   : > { %v713_v55 = vsub.f32 %v709_v51, %v711_v53  ;;  %1092 = vrsqrt.f32 %v716_v58 }
 0x1c4   : > { %v715_v57 = vmax.f32 %v713_v55, 0.0 }
 0x1c6   : > { %v717_v59 = vadd.f32 1e-05, %v715_v57 }
 0x1c8   : > { %1094 = vrsqrt.f32 %v717_v59 }
 0x1cc   : > { %v1093_v62 = vpop.eup %1092 }
 0x1cd   : > { %721 = vst.msk [vmem:[%s1233_s10] sm:$0xff] %vm667_vm4, %v1093_v62  ;;  %v725_v0 = vmul.f32 %v1093_v62, %v723_v60 }
 0x1cf   : > { %727 = vst.msk [vmem:[%s1238_s12] sm:$0xff] %vm667_vm4, %v725_v0 }
 0x1d2   : > { %v1095_v63 = vpop.eup %1094 }
 0x1d3   : > { %722 = vst.msk [vmem:[%s1233_s10 + $0x8] sm:$0xff] %vm667_vm4, %v1095_v63  ;;  %v726_v1 = vmul.f32 %v1095_v63, %v724_v61 }
 0x1d5   : > { %728 = vst.msk [vmem:[%s1238_s12 + $0x8] sm:$0xff] %vm667_vm4, %v726_v1 }
 0x1d6 PF: > { %s18_s26 = sadd.s32 1, %s1134_s26   ;;  %s1305_s27 = sld [smem:[#allocation5_spill]] }
 0x1d7   : > { %p15_p9 = scmp.ge.s32.totalorder %s18_s26, 10   ;;  %s1306_s14 = sld [smem:[#allocation6_spill]] }
 0x1d8   : > { %s1307_s24 = smov %s1126_s2  ;;  %s1308_s1 = smov %s1130_s25 }
 0x1d9   :  { %17 = sbr.rel (!%p15_p9) target bundleno = 3 (0x3), region = 123 }
 0x1dc   : > { %s1309_s2 = smov %s1305_s27 }
 0x1dd   : > { %s1310_s25 = smov %s1306_s14 }

// kernel: vit_head_forward.15
= control target key start
LH: loop header
LB: loop body
LE: loop exit
PB: predicated region body
PF: predicated region fallthrough
CT: control target
= control target key end

     0   :  { %s602_s12 = smov 0   ;;  %s604_s13 = smov 0   ;;  %s666_s0 = inlined_call_operand.vmem [shape: bf16[2,4,16,64], index: 0, kind: input, shape index: {}]   ;;  %s667_s1 = inlined_call_operand.vmem [shape: f32[2,16,1], index: 1, kind: input, shape index: {}]   ;;  %s668_s2 = inlined_call_operand.vmem [shape: f32[2,16,1], index: 2, kind: input, shape index: {}]   ;;  %s669_s3 = inlined_call_operand.vmem [shape: bf16[2,4,16,64], index: 3, kind: output, shape index: {}]  }
   0x1   :  { %s606_s14 = smov 0   ;;  %s608_s15 = smov 0  }
   0x2   :  { %s610_s16 = smov 0  }
   0x3 LB: > { %s28_s17 = sadd.s32 1, %s571_s14  ;;  %s32_s18 = sadd.s32 1, %s575_s15  ;;  %s579_s16 = sphi %s610_s16, %s13_s16   ;;  %s575_s15 = sphi %s608_s15, %s673_s15   ;;  %s571_s14 = sphi %s606_s14, %s672_s14   ;;  %s567_s13 = sphi %s604_s13, %s671_s13   ;;  %s563_s12 = sphi %s602_s12, %s670_s12  }
   0x4   : > { %p30_p0 = scmp.ge.s32.totalorder %s28_s17, 4  ;;  %p467_p1 = scmp.ge.s32.totalorder %s579_s16, 1 }
   0x5   : > { %p191_p2 = scmp.lt.s32.totalorder %s579_s16, 9 }
   0x6   : > { %s675_s17 = smov (%p30_p0, %s28_s17), 0  ;;  %s677_s18 = smov (!%p30_p0, %s32_s18), %s575_s15 }
   0x7   : > { %p192_p3 = pnand %p467_p1, %p191_p2  ;;  %p34_p4 = scmp.ge.s32.totalorder %s677_s18, 2 }
   0x8   : > { %p239_p5 = scmp.lt.s32.totalorder (!%p192_p3), %s567_s13, 1  ;;  %v581_v0 = vmov (!%p192_p3), 0   ;;  %p241_p6 = scmp.lt.s32.totalorder (!%p192_p3), %s563_s12, 3  ;;  %vm325_vm0 = vcmask (!%p192_p3), 519168  }
   0x9   : > { %s679_s18 = smov (%p34_p4, %s677_s18), 0  ;;  %195 = sbr.rel (%p192_p3) target bundleno = 190 (0xbe), region = 32 }
   0xa   : > { %532 = vset.pattern.permute.xlu1 (!%p192_p3), %v581_v0  ;;  %531 = vset.pattern.permute.xlu0 (!%p192_p3), %v581_v0 }
  0x10   : > { %s681_s13 = smov (!%p239_p5, %s567_s13), 1  ;;  %s683_s12 = smov (!%p241_p6, %s563_s12), 3 }
  0x11   : > { %s482_s19 = sshll.u32 %s681_s13, 4  ;;  %s468_s26 = sshll.u32 %s683_s12, 1 }
  0x12   : > { %s260_s22 = scalar_lea.vmem %s668_s2, %s482_s19  ;;  %s255_s25 = scalar_lea.vmem %s667_s1, %s482_s19 }
  0x13   : > { %v291_v1 = vld [vmem:[%s260_s22] sm:$0xff]  ;;  %v292_v3 = vld [vmem:[%s260_s22 + $0x8] sm:$0xff]  ;;  %s469_s27 = sshll.u32 %s681_s13, 3 }
  0x14   : > { %v277_v2 = vld [vmem:[%s255_s25] sm:$0xff]  ;;  %295 = vperm.xlu1 %532, %v291_v1   ;;  %v278_v4 = vld [vmem:[%s255_s25 + $0x8] sm:$0xff]  ;;  %s642_s28 = sadd.s32 %s469_s27, %s468_s26 }
  0x15   : > { %281 = vperm.xlu0 %531, %v277_v2   ;;  %s470_s29 = sshll.u32 %s642_s28, 2 }
  0x16   : > { %s250_s5 = scalar_lea.vmem %s666_s0, %s470_s29  ;;  %s272_s8 = scalar_lea.vmem %s669_s3, %s470_s29 }
  0x17   : > { %v487_v5 = vld [vmem:[%s250_s5] sm:$0xff]  }
  0x18   : > { %300 = vperm.xlu1 %532, %v292_v3   ;;  %v488_v6 = vunpack.c.l.bf16 %v487_v5  ;;  %v489_v10 = vunpack.c.h.bf16 %v487_v5 }
  0x19   : > { %286 = vperm.xlu0 %531, %v278_v4  }
  0x93   : > { %v296_v7 = vpop.permute.xlu1 %295 }
  0x94   : > { %v282_v8 = vpop.permute.xlu0 %281 }
  0x95   : > { %v289_v9 = vmul.f32 %v488_v6, %v282_v8 }
  0x97   : > { %v303_v11 = vadd.f32 %v296_v7, %v289_v9  ;;  %v301_v15 = vpop.permute.xlu1 %300 }
  0x98   : > { %v287_v12 = vpop.permute.xlu0 %286 }
  0x99   : > { %v305_v13 = vsub.f32 0.0, %v303_v11  ;;  %v290_v14 = vmul.f32 %v489_v10, %v287_v12 }
  0x9b   : > { %v307_v16 = vmul.f32 1.442695, %v305_v13  ;;  %v304_v17 = vadd.f32 %v301_v15, %v290_v14 }
  0x9d   : > { %533 = vpow2.f32 %v307_v16  ;;  %v306_v18 = vsub.f32 0.0, %v304_v17 }
  0x9f   : > { %v309_v19 = vmul.f32 1.442695, %v306_v18 }
  0xa1   : > { %535 = vpow2.f32 %v309_v19 }
  0xa7   : > { %v534_v20 = vpop.eup %533 }
  0xa8   : > { %v311_v21 = vadd.f32 1.0, %v534_v20 }
  0xaa   : > { %537 = vrcp.f32 %v311_v21 }
  0xab   : > { %v536_v22 = vpop.eup %535 }
  0xac   : > { %v312_v23 = vadd.f32 1.0, %v536_v22 }
  0xae   : > { %539 = vrcp.f32 %v312_v23 }
  0xb4   : > { %v538_v24 = vpop.eup %537 }
  0xb5   : > { %v315_v25 = vmul.f32 %v538_v24, %v303_v11 }
  0xb7   : > { %v484_v26 = vpack.c.bf16 %v315_v25, %v315_v25 }
  0xb8   : > { %v540_v27 = vpop.eup %539 }
  0xb9   : > { %326 = vst.msk [vmem:[%s272_s8] sm:$0xf] %vm325_vm0, %v484_v26  ;;  %v316_v28 = vmul.f32 %v540_v27, %v304_v17 }
  0xbb   : > { %v485_v29 = vpack.c.bf16 %v316_v28, %v316_v28 }
  0xbd   : > { %327 = vst.msk [vmem:[%s272_s8 + $0x4] sm:$0xf] %vm325_vm0, %v485_v29 }
  0xbe PF: > { %s13_s16 = sadd.s32 1, %s579_s16   ;;  %s670_s12 = smov %s571_s14 }
  0xbf   : > { %p10_p7 = scmp.ge.s32.totalorder %s13_s16, 10   ;;  %s671_s13 = smov %s575_s15 }
  0xc0   : > { %s672_s14 = smov %s675_s17  ;;  %s673_s15 = smov %s679_s18 }
  0xc1   :  { %12 = sbr.rel (!%p10_p7) target bundleno = 3 (0x3), region = 68 }

// kernel: vit_head_forward.14
= control target key start
LH: loop header
LB: loop body
LE: loop exit
PB: predicated region body
PF: predicated region fallthrough
CT: control target
= control target key end

     0   :  { %s1129_s24 = smov 0   ;;  %s1131_s1 = smov 0   ;;  %s1241_s0 = inlined_call_operand.vmem [shape: bf16[2,4,64,64], index: 0, kind: input, shape index: {}]   ;;  %s1242_s1 = inlined_call_operand.vmem [shape: f32[2,64,1], index: 1, kind: input, shape index: {}]   ;;  %s1243_s2 = inlined_call_operand.vmem [shape: f32[2,64,1], index: 2, kind: input, shape index: {}]   ;;  %s1244_s3 = inlined_call_operand.vmem [shape: bf16[4,16,64], index: 3, kind: input, shape index: {}]   ;;  %s1245_s4 = inlined_call_operand.vmem [shape: f32[16,1], index: 4, kind: input, shape index: {}]   ;;  %s1246_s5 = inlined_call_operand.vmem [shape: bf16[2,4,16,64], index: 5, kind: output, shape index: {0}]   ;;  %s1247_s6 = inlined_call_operand.vmem [shape: f32[2,16,1], index: 6, kind: output, shape index: {1}]   ;;  %s1248_s7 = inlined_call_operand.vmem [shape: f32[2,16,1], index: 7, kind: output, shape index: {2}]  }
   0x1   :  { %s1133_s2 = smov 0   ;;  %s1135_s25 = smov 0  }
   0x2   :  { %s1137_s26 = smov 0  }
   0x3 LB: > { %s40_s27 = sadd.s32 1, %s1075_s2  ;;  %s44_s28 = sadd.s32 1, %s1079_s25  ;;  %s1083_s26 = sphi %s1137_s26, %s18_s26   ;;  %s1079_s25 = sphi %s1135_s25, %s1254_s25   ;;  %s1075_s2 = sphi %s1133_s2, %s1253_s2   ;;  %s1071_s1 = sphi %s1131_s1, %s1252_s1   ;;  %s1067_s24 = sphi %s1129_s24, %s1251_s24  }
   0x4   : > { %p42_p0 = scmp.ge.s32.totalorder %s40_s27, 4  ;;  %p938_p1 = scmp.ge.s32.totalorder %s1083_s26, 1 }
   0x5   : > { %p339_p2 = scmp.lt.s32.totalorder %s1083_s26, 9 }
   0x6   : > { %s1256_s27 = smov (%p42_p0, %s40_s27), 0  ;;  %s1258_s28 = smov (!%p42_p0, %s44_s28), %s1079_s25 }
   0x7   : > { %p340_p3 = pnand %p938_p1, %p339_p2  ;;  %p46_p4 = scmp.ge.s32.totalorder %s1258_s28, 2 }
   0x8   : > { %p426_p5 = scmp.lt.s32.totalorder (!%p340_p3), %s1071_s1, 1  ;;  %p428_p6 = scmp.lt.s32.totalorder (!%p340_p3), %s1067_s24, 3 }
   0x9   : > { %s1260_s28 = smov (%p46_p4, %s1258_s28), 0  ;;  %343 = sbr.rel (%p340_p3) target bundleno = 454 (0x1c6), region = 40 }
   0xa   : > { %1249 = sst [smem:[#allocation5_spill]] %s1260_s28  ;;  %p493_p7 = scmp.eq.s32.totalorder (!%p340_p3), %s1067_s24, 0 }
  0x10   : > { %s1262_s1 = smov (!%p426_p5, %s1071_s1), 1  ;;  %vm502_vm0 = vcmask (%p493_p7), 7168   ;;  %v1085_v0 = vmov (%p493_p7), 0.0  }
  0x11   : > { %s429_s29 = scalar_select %p428_p6, %s1067_s24, 3 }
  0x12   : > { %s940_s30 = sshll.u32 %s1262_s1, 5  ;;  %s945_s8 = sshll.u32 %s1262_s1, 3  ;;  %503 = vst.msk [vmem:[#allocation3] sm:$0xff] (%p493_p7), %vm502_vm0, %v1085_v0  ;;  %504 = vst.msk [vmem:[#allocation3 + $0x8] sm:$0xff] (%p493_p7), %vm502_vm0, %v1085_v0 }
  0x13   : > { %s939_s9 = sshll.u32 %s429_s29, 3  ;;  %s944_s10 = sshll.u32 %s429_s29, 1  ;;  %505 = vst.msk [vmem:[#allocation4] sm:$0xff] (%p493_p7), %vm502_vm0, %v1085_v0  ;;  %506 = vst.msk [vmem:[#allocation4 + $0x8] sm:$0xff] (%p493_p7), %vm502_vm0, %v1085_v0 }
  0x14   : > { %s438_s11 = sadd.s32 %s940_s30, %s939_s9  ;;  %s1167_s14 = scalar_lea.vmem %s1244_s3, %s939_s9 }
  0x15   : > { %s941_s15 = sshll.u32 %s438_s11, 2  ;;  %s479_s16 = sadd.s32 %s945_s8, %s944_s10 }
  0x16   : > { %s1172_s19 = scalar_lea.vmem %s1241_s0, %s941_s15  ;;  %s946_s20 = sshll.u32 %s479_s16, 2 }
  0x17   : > { %s1177_s23 = scalar_lea.vmem %s1246_s5, %s946_s20  ;;  %s966_s29 = sshll.u32 %s1262_s1, 4 }
  0x18   : > { %s1182_s12 = scalar_lea.vmem %s1247_s6, %s966_s29  ;;  %s1187_s8 = scalar_lea.vmem %s1248_s7, %s966_s29 }
  0x19   : > { %501 = sbr.rel (!%p493_p7) target bundleno = 32 (0x20), region = 44 }
  0x20 PF: > { %v1036_v1 = vld [vmem:[%s1172_s19] sm:$0xff]   ;;  %v1086_v2 = vmov 0.0   ;;  %v1037_v3 = vld [vmem:[%s1172_s19 + $0x8] sm:$0xff]   ;;  %vm1087_vm1 = vmmov 0   ;;  %v1088_v4 = vmov 0   ;;  %v1038_v6 = vld [vmem:[%s1172_s19 + $0x10] sm:$0xff]  }
  0x21   : > { %979 = vmatprep.subr.bf16.mxu0 %v1086_v2  ;;  %987 = vmatprep.mubr.msk.bf16.mxu0 %vm1087_vm1, %v1086_v2  ;;  %v594_v5 = vld [vmem:[%s1245_s4] sm:$0xff]  ;;  %v595_v7 = vld [vmem:[%s1245_s4 + $0x8] sm:$0xff]  ;;  %v1039_v8 = vld [vmem:[%s1172_s19 + $0x18] sm:$0xff]   ;;  %vm546_vm2 = vcmask 523264   ;;  %vm660_vm3 = vcmask 519168   ;;  %p663_p8 = scmp.eq.s32.totalorder %s1067_s24, 3 }
  0x22   : > { %980 = vmatpush3.bf16.msra.mxu0 %v1036_v1  ;;  %1035 = vset.pattern.permute.xlu0 %v1088_v4  ;;  %v1040_v9 = vld [vmem:[%s1167_s14] sm:$0xff]   ;;  %v625_v28 = vld [vmem:[#allocation3] sm:$0xff]  ;;  %vm635_vm4 = vcmask 7168   ;;  %v626_v33 = vld [vmem:[#allocation3 + $0x8] sm:$0xff] }
  0x23   : > { %981 = vmatprep.subr.bf16.mxu0 %v1086_v2  ;;  %598 = vperm.xlu0 %1035, %v594_v5   ;;  %v638_v30 = vld [vmem:[#allocation4] sm:$0xff]  ;;  %v639_v37 = vld [vmem:[#allocation4 + $0x8] sm:$0xff] }
  0x26   : > { %982 = vmatpush3.bf16.msra.mxu0 %v1037_v3 }
  0x27   : > { %983 = vmatprep.subr.bf16.mxu0 %v1086_v2  ;;  %603 = vperm.xlu0 %1035, %v595_v7  }
  0x2a   : > { %984 = vmatpush3.bf16.msra.mxu0 %v1038_v6 }
  0x2b   : > { %985 = vmatprep.subr.bf16.mxu0 %v1086_v2 }
  0x2e   : > { %986 = vmatpush3.bf16.msra.mxu0 %v1039_v8 }
  0x31   : > { %988 = vmatmul.mubr.msk.bf16.vlgmr.msra.gmra.mrb[0].mxu0 %vm546_vm2, %v1040_v9 }
  0xa2   : > { %v599_v10 = vpop.permute.xlu0 %598 }
  0xa6   : > { %v604_v14 = vpop.permute.xlu0 %603 }
 0x104   : > { %v584_v11 = vpop.f32.mrb[0].mxu0 }
 0x105   : > { %v606_v12 = vadd.f32 %v599_v10, %v584_v11  ;;  %v989_v13 = vpop.f32.mrb[1].mxu0 }
 0x106   : > { %v587_v15 = vpop.f32.mrb[2].mxu0 }
 0x107   : > { %608 = vst.msk [vmem:[#allocation2] sm:$0xff] %vm546_vm2, %v606_v12  ;;  %v607_v16 = vadd.f32 %v604_v14, %v587_v15  ;;  %v990_v17 = vpop.f32.mrb[3].mxu0 }
 0x109   : > { %609 = vst.msk [vmem:[#allocation2 + $0x8] sm:$0xff] %vm546_vm2, %v607_v16 }
 0x10e   : > { %v623_v18 = vld [vmem:[#allocation2] sm:$0xff] }
 0x10f   : > { %v627_v19 = vsel %vm546_vm2, %v623_v18, 0.0  ;;  %v970_v20 = vpack.c.bf16 %v623_v18, %v623_v18  ;;  %v640_v21 = vmul.f32 %v623_v18, %v623_v18 }
 0x110   : > { %628 = vadd.xlane.f32.xlu1 %v627_v19  ;;  %v624_v22 = vld [vmem:[#allocation2 + $0x8] sm:$0xff] }
 0x111   : > { %661 = vst.msk [vmem:[%s1177_s23] sm:$0xf] %vm660_vm3, %v970_v20  ;;  %v642_v23 = vsel %vm546_vm2, %v640_v21, 0.0  ;;  %v971_v24 = vpack.c.bf16 %v624_v22, %v624_v22  ;;  %v630_v25 = vsel %vm546_vm2, %v624_v22, 0.0  ;;  %v641_v26 = vmul.f32 %v624_v22, %v624_v22 }
 0x112   : > { %643 = vadd.xlane.f32.xlu0 %v642_v23 }
 0x113   : > { %662 = vst.msk [vmem:[%s1177_s23 + $0x4] sm:$0xf] %vm660_vm3, %v971_v24  ;;  %v645_v27 = vsel %vm546_vm2, %v641_v26, 0.0 }
 0x114   : > { %631 = vadd.xlane.f32.xlu1 %v630_v25 }
 0x118   : > { %646 = vadd.xlane.f32.xlu1 %v645_v27 }
 0x19d   : > { %v629_v29 = vpop.xlane.xlu1 %628 }
 0x19e   : > { %v633_v31 = vadd.f32 %v629_v29, %v625_v28 }
 0x19f   : > { %v644_v32 = vpop.xlane.xlu0 %643 }
 0x1a0   : > { %636 = vst.msk [vmem:[#allocation3] sm:$0xff] %vm635_vm4, %v633_v31  ;;  %v648_v34 = vadd.f32 %v644_v32, %v638_v30 }
 0x1a1   : > { %v632_v35 = vpop.xlane.xlu1 %631 }
 0x1a2   : > { %650 = vst.msk [vmem:[#allocation4] sm:$0xff] %vm635_vm4, %v648_v34  ;;  %v634_v36 = vadd.f32 %v632_v35, %v626_v33  ;;  %669 = sbr.rel (!%p663_p8) target bundleno = 454 (0x1c6), region = 60 }
 0x1a4   : > { %637 = vst.msk [vmem:[#allocation3 + $0x8] sm:$0xff] %vm635_vm4, %v634_v36 }
 0x1a5   : > { %v647_v38 = vpop.xlane.xlu1 %646 }
 0x1a6   : > { %v649_v39 = vadd.f32 %v647_v38, %v639_v37 }
 0x1a7   : > { %v670_v40 = vld [vmem:[#allocation3] sm:$0xff] (%p663_p8) }
 0x1a8   : > { %651 = vst.msk [vmem:[#allocation4 + $0x8] sm:$0xff] %vm635_vm4, %v649_v39  ;;  %v672_v43 = vmul.f32 (%p663_p8), 0.00390625, %v670_v40 }
 0x1a9   : > { %v674_v41 = vld [vmem:[#allocation4] sm:$0xff] }
 0x1aa   : > { %v676_v44 = vmul.f32 0.00390625, %v674_v41  ;;  %v678_v48 = vmul.f32 %v672_v43, %v672_v43  ;;  %v691_v56 = vsub.f32 0.0, %v672_v43 }
 0x1ab   : > { %v671_v42 = vld [vmem:[#allocation3 + $0x8] sm:$0xff] }
 0x1ac   : > { %v673_v45 = vmul.f32 0.00390625, %v671_v42  ;;  %v680_v50 = vsub.f32 %v676_v44, %v678_v48 }
 0x1ae   : > { %v679_v49 = vmul.f32 %v673_v45, %v673_v45  ;;  %v682_v52 = vmax.f32 %v680_v50, 0.0  ;;  %v692_v57 = vsub.f32 0.0, %v673_v45 }
 0x1af   : > { %v675_v46 = vld [vmem:[#allocation4 + $0x8] sm:$0xff] }
 0x1b0   : > { %v677_v47 = vmul.f32 0.00390625, %v675_v46  ;;  %v684_v54 = vadd.f32 1e-05, %v682_v52 }
 0x1b2   : > { %v681_v51 = vsub.f32 %v677_v47, %v679_v49  ;;  %1041 = vrsqrt.f32 %v684_v54 }
 0x1b4   : > { %v683_v53 = vmax.f32 %v681_v51, 0.0 }
 0x1b6   : > { %v685_v55 = vadd.f32 1e-05, %v683_v53 }
 0x1b8   : > { %1043 = vrsqrt.f32 %v685_v55 }
 0x1bc   : > { %v1042_v58 = vpop.eup %1041 }
 0x1bd   : > { %689 = vst.msk [vmem:[%s1182_s12] sm:$0xff] %vm635_vm4, %v1042_v58  ;;  %v693_v60 = vmul.f32 %v1042_v58, %v691_v56 }
 0x1bf   : > { %695 = vst.msk [vmem:[%s1187_s8] sm:$0xff] %vm635_vm4, %v693_v60 }
 0x1c2   : > { %v1044_v59 = vpop.eup %1043 }
 0x1c3   : > { %690 = vst.msk [vmem:[%s1182_s12 + $0x8] sm:$0xff] %vm635_vm4, %v1044_v59  ;;  %v694_v61 = vmul.f32 %v1044_v59, %v692_v57 }
 0x1c5   : > { %696 = vst.msk [vmem:[%s1187_s8 + $0x8] sm:$0xff] %vm635_vm4, %v694_v61 }
 0x1c6 PF: > { %s18_s26 = sadd.s32 1, %s1083_s26   ;;  %s1250_s14 = sld [smem:[#allocation5_spill]] }
 0x1c7   : > { %p15_p9 = scmp.ge.s32.totalorder %s18_s26, 10   ;;  %s1251_s24 = smov %s1075_s2 }
 0x1c8   : > { %s1252_s1 = smov %s1079_s25  ;;  %s1253_s2 = smov %s1256_s27 }
 0x1c9   :  { %17 = sbr.rel (!%p15_p9) target bundleno = 3 (0x3), region = 123 }
 0x1cc   : > { %s1254_s25 = smov %s1250_s14 }

// kernel: vit_head_forward.16
= control target key start
LH: loop header
LB: loop body
LE: loop exit
PB: predicated region body
PF: predicated region fallthrough
CT: control target
= control target key end

     0   :  { %s1087_s24 = smov 0   ;;  %s1089_s1 = smov 0   ;;  %s1183_s0 = inlined_call_operand.vmem [shape: bf16[2,4,64,256], index: 0, kind: input, shape index: {}]   ;;  %s1184_s1 = inlined_call_operand.vmem [shape: f32[2,64,1], index: 1, kind: input, shape index: {}]   ;;  %s1185_s2 = inlined_call_operand.vmem [shape: f32[2,64,1], index: 2, kind: input, shape index: {}]   ;;  %s1186_s3 = inlined_call_operand.vmem [shape: bf16[4,8,64], index: 3, kind: input, shape index: {}]   ;;  %s1187_s4 = inlined_call_operand.vmem [shape: f32[8,1], index: 4, kind: input, shape index: {}]   ;;  %s1188_s5 = inlined_call_operand.vmem [shape: bf16[2,4,8,256], index: 5, kind: output, shape index: {0}]   ;;  %s1189_s6 = inlined_call_operand.vmem [shape: f32[2,8,1], index: 6, kind: output, shape index: {1}]   ;;  %s1190_s7 = inlined_call_operand.vmem [shape: f32[2,8,1], index: 7, kind: output, shape index: {2}]  }
   0x1   :  { %s1091_s2 = smov 0   ;;  %s1093_s25 = smov 0  }
   0x2   :  { %s1095_s26 = smov 0  }
   0x3 LB: > { %s40_s27 = sadd.s32 1, %s1035_s2  ;;  %s44_s28 = sadd.s32 1, %s1039_s25  ;;  %s1043_s26 = sphi %s1095_s26, %s18_s26   ;;  %s1039_s25 = sphi %s1093_s25, %s1198_s25   ;;  %s1035_s2 = sphi %s1091_s2, %s1197_s2   ;;  %s1031_s1 = sphi %s1089_s1, %s1196_s1   ;;  %s1027_s24 = sphi %s1087_s24, %s1195_s24  }
   0x4   : > { %p42_p0 = scmp.ge.s32.totalorder %s40_s27, 4  ;;  %p917_p1 = scmp.ge.s32.totalorder %s1043_s26, 1 }
   0x5   : > { %p341_p2 = scmp.lt.s32.totalorder %s1043_s26, 9 }
   0x6   : > { %s1200_s27 = smov (%p42_p0, %s40_s27), 0  ;;  %s1202_s28 = smov (!%p42_p0, %s44_s28), %s1039_s25 }
   0x7   : > { %1191 = sst [smem:[#allocation5_spill]] %s1200_s27  ;;  %p342_p3 = pnand %p917_p1, %p341_p2 }
   0x8   : > { %p46_p4 = scmp.ge.s32.totalorder %s1202_s28, 2  ;;  %p429_p5 = scmp.lt.s32.totalorder (!%p342_p3), %s1031_s1, 1 }
   0x9   : > { %345 = sbr.rel (%p342_p3) target bundleno = 443 (0x1bb), region = 40  ;;  %p431_p6 = scmp.lt.s32.totalorder (!%p342_p3), %s1027_s24, 3 }
   0xa   : > { %s1204_s28 = smov (%p46_p4, %s1202_s28), 0  ;;  %p497_p7 = scmp.eq.s32.totalorder (!%p342_p3), %s1027_s24, 0 }
   0xb   : > { %1192 = sst [smem:[#allocation6_spill]] %s1204_s28 }
  0x10   : > { %s1206_s1 = smov (!%p429_p5, %s1031_s1), 1  ;;  %vm506_vm0 = vcmask (%p497_p7), 7168   ;;  %v1045_v0 = vmov (%p497_p7), 0.0  }
  0x11   : > { %s432_s29 = scalar_select %p431_p6, %s1027_s24, 3 }
  0x12   : > { %s919_s30 = sshll.u32 %s1206_s1, 6  ;;  %s1122_s8 = sshll.u32 %s1206_s1, 3  ;;  %507 = vst.msk [vmem:[#allocation3] sm:$0xff] (%p497_p7), %vm506_vm0, %v1045_v0  ;;  %508 = vst.msk [vmem:[#allocation4] sm:$0xff] (%p497_p7), %vm506_vm0, %v1045_v0 }
  0x13   : > { %s918_s9 = sshll.u32 %s432_s29, 4  ;;  %s921_s10 = sshll.u32 %s432_s29, 2 }
  0x14   : > { %s442_s11 = sadd.s32 %s919_s30, %s918_s9  ;;  %s1127_s14 = scalar_lea.vmem %s1186_s3, %s921_s10 }
  0x15   : > { %s920_s15 = sshll.u32 %s442_s11, 2  ;;  %s922_s16 = sshll.u32 %s432_s29, 1 }
  0x16   : > { %s444_s19 = scalar_lea.vmem %s1183_s0, %s920_s15  ;;  %s484_s20 = sadd.s32 %s1122_s8, %s922_s16 }
  0x17   : > { %s924_s21 = sshll.u32 %s484_s20, 2  ;;  %s491_s1 = scalar_lea.vmem %s1189_s6, %s1122_s8 }
  0x18   : > { %s1140_s30 = scalar_lea.vmem %s1188_s5, %s924_s21  ;;  %s495_s11 = scalar_lea.vmem %s1190_s7, %s1122_s8 }
  0x19   : > { %505 = sbr.rel (!%p497_p7) target bundleno = 32 (0x20), region = 44 }
  0x20 PF: > { %v991_v1 = vld [vmem:[%s444_s19 + $0x4] ss:$8 sps:$4 sm:$0xff]   ;;  %v993_v2 = vld [vmem:[%s444_s19] ss:$8 sps:$4 sm:$0xff]   ;;  %v1046_v3 = vmov 0   ;;  %vm558_vm1 = vcmask 523264  }
  0x21   : > { %594 = vmatprep.mubr.bf16.mxu0 %v1046_v3  ;;  %990 = vset.pattern.permute.xlu0 %v1046_v3  ;;  %v994_v4 = vld [vmem:[%s444_s19 + $0x14] ss:$8 sps:$4 sm:$0xff]   ;;  %v996_v5 = vld [vmem:[%s444_s19 + $0x10] ss:$8 sps:$4 sm:$0xff]   ;;  %v997_v6 = vld [vmem:[%s444_s19 + $0x24] ss:$8 sps:$4 sm:$0xff]  }
  0x22   : > { %562 = vmatprep.subr.bf16.mxu0 %v991_v1  ;;  %v606_v7 = vld [vmem:[%s1187_s4] sm:$0xff]  ;;  %v1000_v9 = vld [vmem:[%s444_s19 + $0x34] ss:$8 sps:$4 sm:$0xff]   ;;  %v1002_v10 = vld [vmem:[%s444_s19 + $0x30] ss:$8 sps:$4 sm:$0xff]   ;;  %p655_p8 = scmp.eq.s32.totalorder %s1027_s24, 3 }
  0x23   : > { %563 = vmatpush1.bf16.msra.mxu0 %v993_v2  ;;  %609 = vperm.xlu0 %990, %v606_v7   ;;  %v999_v8 = vld [vmem:[%s444_s19 + $0x20] ss:$8 sps:$4 sm:$0xff]   ;;  %vm636_vm2 = vcmask 7168  }
  0x24   : > { %564 = vmatprep.subr.bf16.mxu0 %v994_v4  ;;  %v517_v11 = vld [vmem:[%s1127_s14] sm:$0xf]  ;;  %v638_v26 = vld [vmem:[#allocation4] sm:$0xff] }
  0x25   : > { %v631_v24 = vld [vmem:[#allocation3] sm:$0xff] }
  0x27   : > { %565 = vmatpush1.bf16.msra.mxu0 %v996_v5 }
  0x28   : > { %566 = vmatprep.subr.bf16.mxu0 %v997_v6 }
  0x2b   : > { %567 = vmatpush1.bf16.msra.mxu0 %v999_v8 }
  0x2c   : > { %568 = vmatprep.subr.bf16.mxu0 %v1000_v9 }
  0x2f   : > { %569 = vmatpush1.bf16.msra.mxu0 %v1002_v10 }
  0x32   : > { %937 = vmatmul.mubr.msk.bf16.vlgmr.msra.gmra.mrb[0].mxu0 %vm558_vm1, %v517_v11 }
  0xa2   : > { %v610_v12 = vpop.permute.xlu0 %609 }
 0x105   : > { %v596_v13 = vpop.f32.mrb[0].mxu0 }
 0x106   : > { %v612_v14 = vadd.f32 %v610_v12, %v596_v13  ;;  %v598_v15 = vpop.f32.mrb[1].mxu0 }
 0x107   : > { %v613_v16 = vadd.f32 %v610_v12, %v598_v15  ;;  %v600_v17 = vpop.f32.mrb[2].mxu0 }
 0x108   : > { %v601_v18 = vpop.f32.mrb[3].mxu0  ;;  %v639_v19 = vmul.f32 %v612_v14, %v612_v14 }
 0x109   : > { %v945_v20 = vpack.c.bf16 %v613_v16, %v612_v14  ;;  %v632_v21 = vadd.f32 %v613_v16, %v612_v14  ;;  %v640_v22 = vmul.f32 %v613_v16, %v613_v16 }
 0x10b   : > { %654 = vst [vmem:[%s1140_s30] sm:$0xff] %v945_v20  ;;  %633 = vadd.xlane.f32.xlu0 %v632_v21  ;;  %v641_v23 = vadd.f32 %v640_v22, %v639_v19 }
 0x10d   : > { %642 = vadd.xlane.f32.xlu1 %v641_v23 }
 0x197   : > { %661 = sbr.rel (!%p655_p8) target bundleno = 443 (0x1bb), region = 60 }
 0x198   : > { %v634_v25 = vpop.xlane.xlu0 %633 }
 0x199   : > { %v635_v27 = vadd.f32 %v634_v25, %v631_v24 }
 0x19a   : > { %v643_v28 = vpop.xlane.xlu1 %642 }
 0x19b   : > { %637 = vst.msk [vmem:[#allocation3] sm:$0xff] %vm636_vm2, %v635_v27  ;;  %v644_v29 = vadd.f32 %v643_v28, %v638_v26 }
 0x19d   : > { %645 = vst.msk [vmem:[#allocation4] sm:$0xff] %vm636_vm2, %v644_v29 }
 0x1a2   : > { %v662_v30 = vld [vmem:[#allocation3] sm:$0xff] }
 0x1a3   : > { %v663_v32 = vmul.f32 0.0009765625, %v662_v30 }
 0x1a4   : > { %v664_v31 = vld [vmem:[#allocation4] sm:$0xff] }
 0x1a5   : > { %v665_v33 = vmul.f32 0.0009765625, %v664_v31  ;;  %v666_v34 = vmul.f32 %v663_v32, %v663_v32  ;;  %v673_v38 = vsub.f32 0.0, %v663_v32 }
 0x1a7   : > { %v667_v35 = vsub.f32 %v665_v33, %v666_v34 }
 0x1a9   : > { %v668_v36 = vmax.f32 %v667_v35, 0.0 }
 0x1ab   : > { %v669_v37 = vadd.f32 1e-05, %v668_v36 }
 0x1ad   : > { %1003 = vrsqrt.f32 %v669_v37 }
 0x1b7   : > { %v1004_v39 = vpop.eup %1003 }
 0x1b8   : > { %672 = vst.msk [vmem:[%s491_s1] sm:$0xff] %vm636_vm2, %v1004_v39  ;;  %v674_v40 = vmul.f32 %v1004_v39, %v673_v38 }
 0x1ba   : > { %675 = vst.msk [vmem:[%s495_s11] sm:$0xff] %vm636_vm2, %v674_v40 }
 0x1bb PF: > { %s18_s26 = sadd.s32 1, %s1043_s26   ;;  %s1193_s14 = sld [smem:[#allocation5_spill]] }
 0x1bc   : > { %p15_p9 = scmp.ge.s32.totalorder %s18_s26, 10   ;;  %s1194_s15 = sld [smem:[#allocation6_spill]] }
 0x1bd   : > { %s1195_s24 = smov %s1035_s2  ;;  %s1196_s1 = smov %s1039_s25 }
 0x1be   :  { %17 = sbr.rel (!%p15_p9) target bundleno = 3 (0x3), region = 123 }
 0x1c1   : > { %s1197_s2 = smov %s1193_s14 }
 0x1c2   : > { %s1198_s25 = smov %s1194_s15 }

// kernel: vit_head_forward.17
= control target key start
LH: loop header
LB: loop body
LE: loop exit
PB: predicated region body
PF: predicated region fallthrough
CT: control target
= control target key end

     0   :  { %s582_s12 = smov 0   ;;  %s584_s13 = smov 0   ;;  %s642_s0 = inlined_call_operand.vmem [shape: bf16[2,4,8,256], index: 0, kind: input, shape index: {}]   ;;  %s643_s1 = inlined_call_operand.vmem [shape: f32[2,8,1], index: 1, kind: input, shape index: {}]   ;;  %s644_s2 = inlined_call_operand.vmem [shape: f32[2,8,1], index: 2, kind: input, shape index: {}]   ;;  %s645_s3 = inlined_call_operand.vmem [shape: bf16[2,4,8,256], index: 3, kind: output, shape index: {}]  }
   0x1   :  { %s586_s14 = smov 0   ;;  %s588_s15 = smov 0  }
   0x2   :  { %s590_s16 = smov 0  }
   0x3 LB: > { %s28_s17 = sadd.s32 1, %s551_s14  ;;  %s32_s18 = sadd.s32 1, %s555_s15  ;;  %s559_s16 = sphi %s590_s16, %s13_s16   ;;  %s555_s15 = sphi %s588_s15, %s649_s15   ;;  %s551_s14 = sphi %s586_s14, %s648_s14   ;;  %s547_s13 = sphi %s584_s13, %s647_s13   ;;  %s543_s12 = sphi %s582_s12, %s646_s12  }
   0x4   : > { %p30_p0 = scmp.ge.s32.totalorder %s28_s17, 4  ;;  %p458_p1 = scmp.ge.s32.totalorder %s559_s16, 1 }
   0x5   : > { %p191_p2 = scmp.lt.s32.totalorder %s559_s16, 9 }
   0x6   : > { %s651_s17 = smov (%p30_p0, %s28_s17), 0  ;;  %s653_s18 = smov (!%p30_p0, %s32_s18), %s555_s15 }
   0x7   : > { %p192_p3 = pnand %p458_p1, %p191_p2  ;;  %p34_p4 = scmp.ge.s32.totalorder %s653_s18, 2 }
   0x8   : > { %p240_p5 = scmp.lt.s32.totalorder (!%p192_p3), %s547_s13, 1  ;;  %v561_v0 = vmov (!%p192_p3), 0   ;;  %p242_p6 = scmp.lt.s32.totalorder (!%p192_p3), %s543_s12, 3 }
   0x9   : > { %s655_s18 = smov (%p34_p4, %s653_s18), 0  ;;  %195 = sbr.rel (%p192_p3) target bundleno = 188 (0xbc), region = 32 }
   0xa   : > { %512 = vset.pattern.permute.xlu0 (!%p192_p3), %v561_v0 }
  0x10   : > { %s657_s13 = smov (!%p240_p5, %s547_s13), 1  ;;  %s659_s12 = smov (!%p242_p6, %s543_s12), 3 }
  0x11   : > { %s460_s19 = sshll.u32 %s657_s13, 3  ;;  %s459_s26 = sshll.u32 %s659_s12, 1 }
  0x12   : > { %s256_s22 = scalar_lea.vmem %s643_s1, %s460_s19  ;;  %s260_s25 = scalar_lea.vmem %s644_s2, %s460_s19 }
  0x13   : > { %v278_v1 = vld [vmem:[%s256_s22] sm:$0xff]  ;;  %s618_s27 = sadd.s32 %s460_s19, %s459_s26 }
  0x14   : > { %281 = vperm.xlu0 %512, %v278_v1   ;;  %v286_v2 = vld [vmem:[%s260_s25] sm:$0xff]  ;;  %s461_s28 = sshll.u32 %s618_s27, 2 }
  0x15   : > { %s251_s4 = scalar_lea.vmem %s642_s0, %s461_s28  ;;  %s273_s7 = scalar_lea.vmem %s645_s3, %s461_s28 }
  0x16   : > { %v275_v3 = vld [vmem:[%s251_s4] sm:$0xff] }
  0x17   : > { %v276_v4 = vunpack.c.l.bf16 %v275_v3  ;;  %v277_v5 = vunpack.c.h.bf16 %v275_v3 }
  0x18   : > { %289 = vperm.xlu0 %512, %v286_v2  }
  0x93   : > { %v282_v6 = vpop.permute.xlu0 %281 }
  0x94   : > { %v284_v7 = vmul.f32 %v282_v6, %v276_v4  ;;  %v285_v8 = vmul.f32 %v282_v6, %v277_v5 }
  0x97   : > { %v290_v9 = vpop.permute.xlu0 %289 }
  0x98   : > { %v292_v10 = vadd.f32 %v290_v9, %v284_v7  ;;  %v293_v11 = vadd.f32 %v290_v9, %v285_v8 }
  0x9a   : > { %v294_v12 = vsub.f32 0.0, %v292_v10  ;;  %v295_v13 = vsub.f32 0.0, %v293_v11 }
  0x9c   : > { %v296_v14 = vmul.f32 1.442695, %v294_v12  ;;  %v298_v15 = vmul.f32 1.442695, %v295_v13 }
  0x9e   : > { %513 = vpow2.f32 %v296_v14 }
  0x9f   : > { %515 = vpow2.f32 %v298_v15 }
  0xa8   : > { %v514_v16 = vpop.eup %513 }
  0xa9   : > { %v516_v17 = vpop.eup %515  ;;  %v300_v18 = vadd.f32 1.0, %v514_v16 }
  0xaa   : > { %v301_v19 = vadd.f32 1.0, %v516_v17 }
  0xab   : > { %517 = vrcp.f32 %v300_v18 }
  0xac   : > { %519 = vrcp.f32 %v301_v19 }
  0xb5   : > { %v518_v20 = vpop.eup %517 }
  0xb6   : > { %v520_v21 = vpop.eup %519  ;;  %v304_v22 = vmul.f32 %v518_v20, %v292_v10 }
  0xb7   : > { %v305_v23 = vmul.f32 %v520_v21, %v293_v11 }
  0xb9   : > { %v470_v24 = vpack.c.bf16 %v305_v23, %v304_v22 }
  0xbb   : > { %314 = vst [vmem:[%s273_s7] sm:$0xff] %v470_v24 }
  0xbc PF: > { %s13_s16 = sadd.s32 1, %s559_s16   ;;  %s646_s12 = smov %s551_s14 }
  0xbd   : > { %p10_p7 = scmp.ge.s32.totalorder %s13_s16, 10   ;;  %s647_s13 = smov %s555_s15 }
  0xbe   : > { %s648_s14 = smov %s651_s17  ;;  %s649_s15 = smov %s655_s18 }
  0xbf   :  { %12 = sbr.rel (!%p10_p7) target bundleno = 3 (0x3), region = 68 }

// kernel: vit_head_forward.18
= control target key start
LH: loop header
LB: loop body
LE: loop exit
PB: predicated region body
PF: predicated region fallthrough
CT: control target
= control target key end

     0   :  { %s1344_s24 = smov 0   ;;  %s1346_s1 = smov 0   ;;  %s1456_s0 = inlined_call_operand.vmem [shape: bf16[2,4,32,1024], index: 0, kind: input, shape index: {}]   ;;  %s1457_s1 = inlined_call_operand.vmem [shape: f32[2,32,1], index: 1, kind: input, shape index: {}]   ;;  %s1458_s2 = inlined_call_operand.vmem [shape: f32[2,32,1], index: 2, kind: input, shape index: {}]   ;;  %s1459_s3 = inlined_call_operand.vmem [shape: bf16[4,8,32], index: 3, kind: input, shape index: {}]   ;;  %s1460_s4 = inlined_call_operand.vmem [shape: f32[8,1], index: 4, kind: input, shape index: {}]   ;;  %s1461_s5 = inlined_call_operand.vmem [shape: bf16[2,4,8,1024], index: 5, kind: output, shape index: {0}]   ;;  %s1462_s6 = inlined_call_operand.vmem [shape: f32[2,8,1], index: 6, kind: output, shape index: {1}]   ;;  %s1463_s7 = inlined_call_operand.vmem [shape: f32[2,8,1], index: 7, kind: output, shape index: {2}]  }
   0x1   :  { %s1348_s2 = smov 0   ;;  %s1350_s25 = smov 0  }
   0x2   :  { %s1352_s26 = smov 0  }
   0x3 LB: > { %s40_s27 = sadd.s32 1, %s1292_s2  ;;  %s44_s28 = sadd.s32 1, %s1296_s25  ;;  %s1300_s26 = sphi %s1352_s26, %s18_s26   ;;  %s1296_s25 = sphi %s1350_s25, %s1471_s25   ;;  %s1292_s2 = sphi %s1348_s2, %s1470_s2   ;;  %s1288_s1 = sphi %s1346_s1, %s1469_s1   ;;  %s1284_s24 = sphi %s1344_s24, %s1468_s24  }
   0x4   : > { %p42_p0 = scmp.ge.s32.totalorder %s40_s27, 4  ;;  %p1169_p1 = scmp.ge.s32.totalorder %s1300_s26, 1 }
   0x5   : > { %p341_p2 = scmp.lt.s32.totalorder %s1300_s26, 9 }
   0x6   : > { %s1473_s27 = smov (%p42_p0, %s40_s27), 0  ;;  %s1475_s28 = smov (!%p42_p0, %s44_s28), %s1296_s25 }
   0x7   : > { %1464 = sst [smem:[#allocation5_spill]] %s1473_s27  ;;  %p342_p3 = pnand %p1169_p1, %p341_p2 }
   0x8   : > { %p46_p4 = scmp.ge.s32.totalorder %s1475_s28, 2  ;;  %p429_p5 = scmp.lt.s32.totalorder (!%p342_p3), %s1288_s1, 1 }
   0x9   : > { %345 = sbr.rel (%p342_p3) target bundleno = 450 (0x1c2), region = 40  ;;  %p431_p6 = scmp.lt.s32.totalorder (!%p342_p3), %s1284_s24, 3 }
   0xa   : > { %s1477_s28 = smov (%p46_p4, %s1475_s28), 0  ;;  %p497_p7 = scmp.eq.s32.totalorder (!%p342_p3), %s1284_s24, 0 }
   0xb   : > { %1465 = sst [smem:[#allocation6_spill]] %s1477_s28 }
  0x10   : > { %s1479_s1 = smov (!%p429_p5, %s1288_s1), 1  ;;  %vm506_vm0 = vcmask (%p497_p7), 7168   ;;  %v1302_v0 = vmov (%p497_p7), 0.0  }
  0x11   : > { %s432_s29 = scalar_select %p431_p6, %s1284_s24, 3 }
  0x12   : > { %s1171_s30 = sshll.u32 %s1479_s1, 7  ;;  %s1175_s8 = sshll.u32 %s1479_s1, 5  ;;  %507 = vst.msk [vmem:[#allocation3] sm:$0xff] (%p497_p7), %vm506_vm0, %v1302_v0  ;;  %508 = vst.msk [vmem:[#allocation4] sm:$0xff] (%p497_p7), %vm506_vm0, %v1302_v0 }
  0x13   : > { %s1170_s9 = sshll.u32 %s432_s29, 5  ;;  %s1173_s10 = sshll.u32 %s432_s29, 2 }
  0x14   : > { %s442_s11 = sadd.s32 %s1171_s30, %s1170_s9  ;;  %s1382_s14 = scalar_lea.vmem %s1459_s3, %s1173_s10 }
  0x15   : > { %s1172_s15 = sshll.u32 %s442_s11, 2  ;;  %s1174_s16 = sshll.u32 %s432_s29, 3 }
  0x16   : > { %s1387_s19 = scalar_lea.vmem %s1456_s0, %s1172_s15  ;;  %s484_s20 = sadd.s32 %s1175_s8, %s1174_s16 }
  0x17   : > { %s1176_s21 = sshll.u32 %s484_s20, 2  ;;  %s1177_s22 = sshll.u32 %s1479_s1, 3 }
  0x18   : > { %s1392_s27 = scalar_lea.vmem %s1461_s5, %s1176_s21  ;;  %s1397_s10 = scalar_lea.vmem %s1462_s6, %s1177_s22 }
  0x19   : > { %s1402_s12 = scalar_lea.vmem %s1463_s7, %s1177_s22  ;;  %505 = sbr.rel (!%p497_p7) target bundleno = 32 (0x20), region = 44 }
  0x20 PF: > { %v509_v1 = vld [vmem:[%s1387_s19] sm:$0xff]  ;;  %v510_v3 = vld [vmem:[%s1387_s19 + $0x8] sm:$0xff]  ;;  %v1303_v9 = vmov 0   ;;  %v511_v16 = vld [vmem:[%s1387_s19 + $0x10] sm:$0xff]  ;;  %vm606_vm1 = vcmask 261120   ;;  %p907_p8 = scmp.eq.s32.totalorder %s1284_s24, 3 }
  0x21   : > { %v513_v2 = vld [vmem:[%s1387_s19 + $0x20] sm:$0xff]  ;;  %v514_v5 = vld [vmem:[%s1387_s19 + $0x28] sm:$0xff]  ;;  %642 = vmatprep.mubr.bf16.mxu0 %v1303_v9  ;;  %683 = vmatprep.mubr.bf16.mxu1 %v1303_v9  ;;  %v515_v17 = vld [vmem:[%s1387_s19 + $0x30] sm:$0xff]  ;;  %vm849_vm2 = vcmask 7168  }
  0x22   : > { %v1182_v4 = vcombine.high %v509_v1, %v513_v2  ;;  %v1181_v6 = vcombine.low %v509_v1, %v513_v2  ;;  %v517_v7 = vld [vmem:[%s1387_s19 + $0x40] sm:$0xff]  ;;  %v1184_v10 = vcombine.high %v510_v3, %v514_v5  ;;  %v1183_v11 = vcombine.low %v510_v3, %v514_v5  ;;  %v518_v13 = vld [vmem:[%s1387_s19 + $0x48] sm:$0xff]  ;;  %1259 = vset.pattern.permute.xlu0 %v1303_v9  ;;  %v512_v18 = vld [vmem:[%s1387_s19 + $0x18] sm:$0xff] }
  0x23   : > { %v521_v8 = vld [vmem:[%s1387_s19 + $0x60] sm:$0xff]  ;;  %v522_v14 = vld [vmem:[%s1387_s19 + $0x68] sm:$0xff]  ;;  %v516_v20 = vld [vmem:[%s1387_s19 + $0x38] sm:$0xff]  ;;  %v1186_v22 = vcombine.high %v511_v16, %v515_v17  ;;  %v1185_v30 = vcombine.low %v511_v16, %v515_v17 }
  0x24   : > { %v1190_v12 = vcombine.high %v517_v7, %v521_v8  ;;  %610 = vmatprep.subr.bf16.mxu0 %v1182_v4  ;;  %v1192_v15 = vcombine.high %v518_v13, %v522_v14  ;;  %651 = vmatprep.subr.bf16.mxu1 %v1184_v10  ;;  %v1189_v19 = vcombine.low %v517_v7, %v521_v8  ;;  %v777_v23 = vld [vmem:[%s1460_s4] sm:$0xff]  ;;  %v519_v25 = vld [vmem:[%s1387_s19 + $0x50] sm:$0xff]  ;;  %v520_v27 = vld [vmem:[%s1387_s19 + $0x58] sm:$0xff] }
  0x25   : > { %611 = vmatpush1.bf16.msra.mxu0 %v1181_v6  ;;  %652 = vmatpush1.bf16.msra.mxu1 %v1183_v11  ;;  %v1191_v21 = vcombine.low %v518_v13, %v522_v14  ;;  %v1188_v24 = vcombine.high %v512_v18, %v516_v20  ;;  %v523_v26 = vld [vmem:[%s1387_s19 + $0x70] sm:$0xff]  ;;  %v524_v28 = vld [vmem:[%s1387_s19 + $0x78] sm:$0xff]  ;;  %v525_v29 = vld [vmem:[%s1382_s14] sm:$0xf]  ;;  %v1187_v31 = vcombine.low %v512_v18, %v516_v20 }
  0x26   : > { %612 = vmatprep.subr.bf16.mxu0 %v1190_v12  ;;  %653 = vmatprep.subr.bf16.mxu1 %v1192_v15  ;;  %v1194_v32 = vcombine.high %v519_v25, %v523_v26  ;;  %v1196_v33 = vcombine.high %v520_v27, %v524_v28  ;;  %v1193_v34 = vcombine.low %v519_v25, %v523_v26  ;;  %v851_v25 = vld [vmem:[#allocation4] sm:$0xff] }
  0x27   : > { %780 = vperm.xlu0 %1259, %v777_v23   ;;  %v1195_v35 = vcombine.low %v520_v27, %v524_v28  ;;  %v838_v23 = vld [vmem:[#allocation3] sm:$0xff] }
  0x29   : > { %613 = vmatpush1.bf16.msra.mxu0 %v1189_v19  ;;  %654 = vmatpush1.bf16.msra.mxu1 %v1191_v21 }
  0x2a   : > { %692 = vmatprep.subr.bf16.mxu0 %v1186_v22  ;;  %733 = vmatprep.subr.bf16.mxu1 %v1188_v24 }
  0x2c   : > { %1197 = vmatmul.mubr.msk.bf16.vlgmr.msra.gmra.mrb[0].mxu0 %vm606_vm1, %v525_v29  ;;  %1198 = vmatmul.mubr.msk.bf16.vlgmr.msra.gmra.mrb[0].mxu1 %vm606_vm1, %v525_v29 }
  0x2d   : > { %693 = vmatpush1.bf16.msra.mxu0 %v1185_v30  ;;  %734 = vmatpush1.bf16.msra.mxu1 %v1187_v31 }
  0x2e   : > { %694 = vmatprep.subr.bf16.mxu0 %v1194_v32  ;;  %735 = vmatprep.subr.bf16.mxu1 %v1196_v33 }
  0x2f   : > { %724 = vmatprep.mubr.bf16.mxu0 %v1303_v9  ;;  %765 = vmatprep.mubr.bf16.mxu1 %v1303_v9 }
  0x31   : > { %695 = vmatpush1.bf16.msra.mxu0 %v1193_v34  ;;  %736 = vmatpush1.bf16.msra.mxu1 %v1195_v35 }
  0x34   : > { %1199 = vmatmul.mubr.msk.bf16.vlgmr.msra.gmra.mrb[4].mxu0 %vm606_vm1, %v525_v29  ;;  %1200 = vmatmul.mubr.msk.bf16.vlgmr.msra.gmra.mrb[4].mxu1 %vm606_vm1, %v525_v29 }
  0xa6   : > { %v781_v36 = vpop.permute.xlu0 %780 }
  0xff   : > { %v644_v37 = vpop.f32.mrb[0].mxu0  ;;  %v685_v40 = vpop.f32.mrb[0].mxu1 }
 0x100   : > { %v646_v38 = vpop.f32.mrb[1].mxu0  ;;  %v783_v39 = vadd.f32 %v781_v36, %v644_v37  ;;  %v785_v43 = vadd.f32 %v781_v36, %v685_v40  ;;  %v687_v44 = vpop.f32.mrb[1].mxu1 }
 0x101   : > { %v784_v41 = vadd.f32 %v781_v36, %v646_v38  ;;  %v648_v42 = vpop.f32.mrb[2].mxu0  ;;  %v786_v47 = vadd.f32 %v781_v36, %v687_v44  ;;  %v689_v48 = vpop.f32.mrb[2].mxu1 }
 0x102   : > { %v852_v45 = vmul.f32 %v783_v39, %v783_v39  ;;  %v649_v46 = vpop.f32.mrb[3].mxu0  ;;  %v854_v52 = vmul.f32 %v785_v43, %v785_v43  ;;  %v690_v53 = vpop.f32.mrb[3].mxu1 }
 0x103   : > { %v839_v49 = vadd.f32 %v784_v41, %v783_v39  ;;  %v853_v50 = vmul.f32 %v784_v41, %v784_v41  ;;  %v1211_v51 = vpack.c.bf16 %v784_v41, %v783_v39  ;;  %v1212_v54 = vpack.c.bf16 %v786_v47, %v785_v43 }
 0x104   : > { %v855_v59 = vmul.f32 %v786_v47, %v786_v47 }
 0x105   : > { %v860_v55 = vadd.f32 %v853_v50, %v852_v45  ;;  %903 = vst [vmem:[%s1392_s27] sm:$0xff] %v1211_v51  ;;  %v840_v56 = vadd.f32 %v839_v49, %v785_v43  ;;  %904 = vst [vmem:[%s1392_s27 + $0x8] sm:$0xff] %v1212_v54 }
 0x107   : > { %v861_v57 = vadd.f32 %v860_v55, %v854_v52  ;;  %v841_v58 = vadd.f32 %v840_v56, %v786_v47  ;;  %v726_v60 = vpop.f32.mrb[4].mxu0  ;;  %v767_v62 = vpop.f32.mrb[4].mxu1 }
 0x108   : > { %v787_v61 = vadd.f32 %v781_v36, %v726_v60  ;;  %v728_v63 = vpop.f32.mrb[5].mxu0  ;;  %v789_v1 = vadd.f32 %v781_v36, %v767_v62  ;;  %v769_v3 = vpop.f32.mrb[5].mxu1 }
 0x109   : > { %v862_v0 = vadd.f32 %v861_v57, %v855_v59  ;;  %v788_v2 = vadd.f32 %v781_v36, %v728_v63  ;;  %v730_v4 = vpop.f32.mrb[6].mxu0  ;;  %v790_v7 = vadd.f32 %v781_v36, %v769_v3  ;;  %v771_v9 = vpop.f32.mrb[6].mxu1 }
 0x10a   : > { %v842_v5 = vadd.f32 %v841_v58, %v787_v61  ;;  %v856_v6 = vmul.f32 %v787_v61, %v787_v61  ;;  %v731_v8 = vpop.f32.mrb[7].mxu0  ;;  %v772_v12 = vpop.f32.mrb[7].mxu1  ;;  %v858_v17 = vmul.f32 %v789_v1, %v789_v1 }
 0x10b   : > { %v857_v10 = vmul.f32 %v788_v2, %v788_v2  ;;  %v1213_v11 = vpack.c.bf16 %v788_v2, %v787_v61  ;;  %v1214_v14 = vpack.c.bf16 %v790_v7, %v789_v1  ;;  %v859_v20 = vmul.f32 %v790_v7, %v790_v7 }
 0x10c   : > { %v843_v13 = vadd.f32 %v842_v5, %v788_v2  ;;  %v863_v15 = vadd.f32 %v862_v0, %v856_v6 }
 0x10d   : > { %905 = vst [vmem:[%s1392_s27 + $0x10] sm:$0xff] %v1213_v11  ;;  %906 = vst [vmem:[%s1392_s27 + $0x18] sm:$0xff] %v1214_v14 }
 0x10e   : > { %v844_v16 = vadd.f32 %v843_v13, %v789_v1  ;;  %v864_v18 = vadd.f32 %v863_v15, %v857_v10 }
 0x110   : > { %v845_v19 = vadd.f32 %v844_v16, %v790_v7  ;;  %v865_v21 = vadd.f32 %v864_v18, %v858_v17 }
 0x112   : > { %846 = vadd.xlane.f32.xlu0 %v845_v19  ;;  %v866_v22 = vadd.f32 %v865_v21, %v859_v20 }
 0x114   : > { %867 = vadd.xlane.f32.xlu1 %v866_v22 }
 0x19e   : > { %913 = sbr.rel (!%p907_p8) target bundleno = 450 (0x1c2), region = 60 }
 0x19f   : > { %v847_v24 = vpop.xlane.xlu0 %846 }
 0x1a0   : > { %v848_v26 = vadd.f32 %v847_v24, %v838_v23 }
 0x1a1   : > { %v868_v27 = vpop.xlane.xlu1 %867 }
 0x1a2   : > { %850 = vst.msk [vmem:[#allocation3] sm:$0xff] %vm849_vm2, %v848_v26  ;;  %v869_v28 = vadd.f32 %v868_v27, %v851_v25 }
 0x1a4   : > { %870 = vst.msk [vmem:[#allocation4] sm:$0xff] %vm849_vm2, %v869_v28 }
 0x1a9   : > { %v914_v29 = vld [vmem:[#allocation3] sm:$0xff] }
 0x1aa   : > { %v915_v31 = vmul.f32 0.00024414063, %v914_v29 }
 0x1ab   : > { %v916_v30 = vld [vmem:[#allocation4] sm:$0xff] }
 0x1ac   : > { %v917_v32 = vmul.f32 0.00024414063, %v916_v30  ;;  %v918_v33 = vmul.f32 %v915_v31, %v915_v31  ;;  %v925_v37 = vsub.f32 0.0, %v915_v31 }
 0x1ae   : > { %v919_v34 = vsub.f32 %v917_v32, %v918_v33 }
 0x1b0   : > { %v920_v35 = vmax.f32 %v919_v34, 0.0 }
 0x1b2   : > { %v921_v36 = vadd.f32 1e-05, %v920_v35 }
 0x1b4   : > { %1260 = vrsqrt.f32 %v921_v36 }
 0x1be   : > { %v1261_v38 = vpop.eup %1260 }
 0x1bf   : > { %924 = vst.msk [vmem:[%s1397_s10] sm:$0xff] %vm849_vm2, %v1261_v38  ;;  %v926_v39 = vmul.f32 %v1261_v38, %v925_v37 }
 0x1c1   : > { %927 = vst.msk [vmem:[%s1402_s12] sm:$0xff] %vm849_vm2, %v926_v39 }
 0x1c2 PF: > { %s18_s26 = sadd.s32 1, %s1300_s26   ;;  %s1466_s27 = sld [smem:[#allocation5_spill]] }
 0x1c3   : > { %p15_p9 = scmp.ge.s32.totalorder %s18_s26, 10   ;;  %s1467_s8 = sld [smem:[#allocation6_spill]] }
 0x1c4   : > { %s1468_s24 = smov %s1292_s2  ;;  %s1469_s1 = smov %s1296_s25 }
 0x1c5   :  { %17 = sbr.rel (!%p15_p9) target bundleno = 3 (0x3), region = 123 }
 0x1c8   : > { %s1470_s2 = smov %s1466_s27 }
 0x1c9   : > { %s1471_s25 = smov %s1467_s8 }

// kernel: vit_head_forward.19
= control target key start
LH: loop header
LB: loop body
LE: loop exit
PB: predicated region body
PF: predicated region fallthrough
CT: control target
= control target key end

     0   :  { %s1354_s24 = smov 0   ;;  %s1356_s25 = smov 0   ;;  %s1495_s0 = inlined_call_operand.vmem [shape: bf16[2,4,8,1024], index: 0, kind: input, shape index: {}]   ;;  %s1496_s1 = inlined_call_operand.vmem [shape: f32[2,8,1], index: 1, kind: input, shape index: {}]   ;;  %s1497_s2 = inlined_call_operand.vmem [shape: f32[2,8,1], index: 2, kind: input, shape index: {}]   ;;  %s1498_s3 = inlined_call_operand.vmem [shape: bf16[1,8,8], index: 3, kind: input, shape index: {}]   ;;  %s1499_s4 = inlined_call_operand.vmem [shape: f32[8,1], index: 4, kind: input, shape index: {}]   ;;  %s1500_s5 = inlined_call_operand.vmem [shape: bf16[2,4,8,1024], index: 5, kind: output, shape index: {0}]   ;;  %s1501_s6 = inlined_call_operand.vmem [shape: f32[2,8,1], index: 6, kind: output, shape index: {1}]   ;;  %s1502_s7 = inlined_call_operand.vmem [shape: f32[2,8,1], index: 7, kind: output, shape index: {2}]  }
   0x1   :  { %s1358_s26 = smov 0   ;;  %s1360_s27 = smov 0  }
   0x2   :  { %s1362_s28 = smov 0  }
   0x3 LB: > { %1504 = sst [smem:[#allocation5_spill]] %s1306_s27  ;;  %s40_s29 = sadd.s32 1, %s1302_s26  ;;  %s1310_s28 = sphi %s1362_s28, %s18_s28   ;;  %s1306_s27 = sphi %s1360_s27, %s1509_s27   ;;  %s1302_s26 = sphi %s1358_s26, %s1511_s26   ;;  %s1298_s25 = sphi %s1356_s25, %s1507_s25   ;;  %s1294_s24 = sphi %s1354_s24, %s1510_s24  }
   0x4   : > { %s44_s30 = sadd.s32 1, %s1306_s27  ;;  %p42_p0 = scmp.ge.s32.totalorder %s40_s29, 4 }
   0x5   : > { %p1157_p1 = scmp.ge.s32.totalorder %s1310_s28, 1  ;;  %p328_p2 = scmp.lt.s32.totalorder %s1310_s28, 9 }
   0x6   : > { %s1513_s29 = smov (%p42_p0, %s40_s29), 0  ;;  %s1515_s30 = smov (!%p42_p0, %s44_s30), %s1306_s27 }
   0x7   : > { %1505 = sst [smem:[#allocation6_spill]] %s1513_s29  ;;  %p329_p3 = pnand %p1157_p1, %p328_p2 }
   0x8   : > { %p46_p4 = scmp.ge.s32.totalorder %s1515_s30, 2  ;;  %p407_p5 = scmp.lt.s32.totalorder (!%p329_p3), %s1298_s25, 1 }
   0x9   : > { %332 = sbr.rel (%p329_p3) target bundleno = 610 (0x262), region = 40  ;;  %p409_p6 = scmp.lt.s32.totalorder (!%p329_p3), %s1294_s24, 3 }
   0xa   : > { %s1517_s30 = smov (%p46_p4, %s1515_s30), 0  ;;  %p465_p7 = scmp.eq.s32.totalorder (!%p329_p3), %s1294_s24, 0 }
   0xb   : > { %1506 = sst [smem:[#allocation7_spill]] %s1517_s30 }
  0x10   : > { %s1519_s25 = smov (!%p407_p5, %s1298_s25), 1  ;;  %vm474_vm0 = vcmask (%p465_p7), 7168   ;;  %v1312_v0 = vmov (%p465_p7), 0.0  }
  0x11   : > { %s410_s8 = scalar_select %p409_p6, %s1294_s24, 3 }
  0x12   : > { %s1159_s9 = sshll.u32 %s1519_s25, 5  ;;  %s1389_s10 = sshll.u32 %s1519_s25, 3  ;;  %475 = vst.msk [vmem:[#allocation3] sm:$0xff] (%p465_p7), %vm474_vm0, %v1312_v0  ;;  %476 = vst.msk [vmem:[#allocation4] sm:$0xff] (%p465_p7), %vm474_vm0, %v1312_v0 }
  0x13   : > { %s1158_s11 = sshll.u32 %s410_s8, 3  ;;  %s430_s14 = scalar_lea.vmem %s1496_s1, %s1389_s10 }
  0x14   : > { %s420_s15 = sadd.s32 %s1159_s9, %s1158_s11  ;;  %s437_s18 = scalar_lea.vmem %s1497_s2, %s1389_s10 }
  0x15   : > { %s1160_s19 = sshll.u32 %s420_s15, 2  ;;  %s459_s22 = scalar_lea.vmem %s1501_s6, %s1389_s10 }
  0x16   : > { %s422_s30 = scalar_lea.vmem %s1495_s0, %s1160_s19  ;;  %s1409_s27 = scalar_lea.vmem %s1500_s5, %s1160_s19 }
  0x17   : > { %s463_s11 = scalar_lea.vmem %s1502_s7, %s1389_s10  ;;  %473 = sbr.rel (!%p465_p7) target bundleno = 30 (0x1e), region = 44 }
  0x1e PF: > { %v489_v1 = vld [vmem:[%s430_s14] sm:$0xff]  ;;  %v1313_v2 = vmov 0   ;;  %v478_v6 = vld [vmem:[%s422_s30 + $0x8] sm:$0xff]  ;;  %v479_v7 = vld [vmem:[%s422_s30 + $0x10] sm:$0xff]  ;;  %vm578_vm1 = vcmask 1043456   ;;  %vm574_vm2 = vcmask 64512  }
  0x1f   : > { %1236 = vset.pattern.permute.xlu0 %v1313_v2  ;;  %635 = vmatprep.mubr.bf16.mxu0 %v1313_v2  ;;  %v503_v3 = vld [vmem:[%s437_s18] sm:$0xff]  ;;  %v480_v8 = vld [vmem:[%s422_s30 + $0x18] sm:$0xff]  ;;  %v484_v10 = vunpack.c.h.bf16 %v478_v6  ;;  %v483_v12 = vunpack.c.l.bf16 %v478_v6  ;;  %v486_v14 = vunpack.c.h.bf16 %v479_v7  ;;  %v485_v16 = vunpack.c.l.bf16 %v479_v7  ;;  %p900_p8 = scmp.eq.s32.totalorder %s1294_s24, 3 }
  0x20   : > { %492 = vperm.xlu0 %1236, %v489_v1   ;;  %676 = vmatprep.mubr.bf16.mxu1 %v1313_v2  ;;  %v770_v4 = vld [vmem:[%s1499_s4] sm:$0xff]  ;;  %v488_v15 = vunpack.c.h.bf16 %v480_v8  ;;  %v487_v17 = vunpack.c.l.bf16 %v480_v8  ;;  %vm842_vm3 = vcmask 7168  }
  0x21   : > { %1237 = vset.pattern.permute.xlu1 %v1313_v2  ;;  %v477_v5 = vld [vmem:[%s422_s30] sm:$0xff] }
  0x22   : > { %773 = vperm.xlu1 %1237, %v770_v4   ;;  %v482_v9 = vunpack.c.h.bf16 %v477_v5  ;;  %v481_v11 = vunpack.c.l.bf16 %v477_v5 }
  0x24   : > { %506 = vperm.xlu0 %1236, %v503_v3  }
  0x9f   : > { %v493_v13 = vpop.permute.xlu0 %492 }
  0xa0   : > { %v496_v18 = vmul.f32 %v493_v13, %v482_v9  ;;  %v498_v19 = vmul.f32 %v493_v13, %v484_v10  ;;  %v495_v20 = vmul.f32 %v493_v13, %v481_v11  ;;  %v497_v21 = vmul.f32 %v493_v13, %v483_v12 }
  0xa1   : > { %v500_v23 = vmul.f32 %v493_v13, %v486_v14  ;;  %v502_v24 = vmul.f32 %v493_v13, %v488_v15  ;;  %v499_v25 = vmul.f32 %v493_v13, %v485_v16  ;;  %v501_v26 = vmul.f32 %v493_v13, %v487_v17 }
  0xa3   : > { %v507_v22 = vpop.permute.xlu0 %506 }
  0xa4   : > { %v510_v27 = vadd.f32 %v507_v22, %v496_v18  ;;  %v512_v28 = vadd.f32 %v507_v22, %v498_v19  ;;  %v509_v29 = vadd.f32 %v507_v22, %v495_v20  ;;  %v1424_v30 = vadd.f32 %v507_v22, %v497_v21 }
  0xa5   : > { %v1426_v31 = vadd.f32 %v507_v22, %v500_v23  ;;  %v1428_v32 = vadd.f32 %v507_v22, %v502_v24  ;;  %v1430_v33 = vadd.f32 %v507_v22, %v499_v25  ;;  %v1432_v34 = vadd.f32 %v507_v22, %v501_v26 }
  0xa6   : > { %v518_v35 = vsub.f32 0.0, %v510_v27  ;;  %v520_v36 = vsub.f32 0.0, %v512_v28  ;;  %v517_v37 = vsub.f32 0.0, %v509_v29  ;;  %v519_v38 = vsub.f32 0.0, %v1424_v30 }
  0xa7   : > { %v522_v39 = vsub.f32 0.0, %v1426_v31  ;;  %v524_v40 = vsub.f32 0.0, %v1428_v32  ;;  %v521_v41 = vsub.f32 0.0, %v1430_v33  ;;  %v523_v46 = vsub.f32 0.0, %v1432_v34 }
  0xa8   : > { %v527_v42 = vmul.f32 1.442695, %v518_v35  ;;  %v531_v43 = vmul.f32 1.442695, %v520_v36  ;;  %v525_v44 = vmul.f32 1.442695, %v517_v37 }
  0xa9   : > { %v529_v45 = vmul.f32 1.442695, %v519_v38  ;;  %v535_v47 = vmul.f32 1.442695, %v522_v39  ;;  %v539_v48 = vmul.f32 1.442695, %v524_v40 }
  0xaa   : > { %1238 = vpow2.f32 %v527_v42  ;;  %v533_v49 = vmul.f32 1.442695, %v521_v41  ;;  %v537_v50 = vmul.f32 1.442695, %v523_v46 }
  0xab   : > { %1240 = vpow2.f32 %v531_v43 }
  0xac   : > { %1242 = vpow2.f32 %v525_v44 }
  0xad   : > { %1244 = vpow2.f32 %v529_v45 }
  0xae   : > { %1246 = vpow2.f32 %v535_v47 }
  0xaf   : > { %1248 = vpow2.f32 %v539_v48 }
  0xb0   : > { %1250 = vpow2.f32 %v533_v49 }
  0xb1   : > { %1252 = vpow2.f32 %v537_v50 }
  0xb4   : > { %v1239_v51 = vpop.eup %1238 }
  0xb5   : > { %v1241_v52 = vpop.eup %1240  ;;  %v542_v53 = vadd.f32 1.0, %v1239_v51 }
  0xb6   : > { %v1243_v54 = vpop.eup %1242  ;;  %v544_v55 = vadd.f32 1.0, %v1241_v52 }
  0xb7   : > { %v1245_v56 = vpop.eup %1244  ;;  %1254 = vrcp.f32 %v542_v53  ;;  %v541_v57 = vadd.f32 1.0, %v1243_v54 }
  0xb8   : > { %v1247_v58 = vpop.eup %1246  ;;  %1256 = vrcp.f32 %v544_v55  ;;  %v543_v59 = vadd.f32 1.0, %v1245_v56 }
  0xb9   : > { %v1249_v60 = vpop.eup %1248  ;;  %1258 = vrcp.f32 %v541_v57  ;;  %v546_v61 = vadd.f32 1.0, %v1247_v58 }
  0xba   : > { %v1251_v62 = vpop.eup %1250  ;;  %1260 = vrcp.f32 %v543_v59  ;;  %v548_v63 = vadd.f32 1.0, %v1249_v60 }
  0xbb   : > { %v1253_v0 = vpop.eup %1252  ;;  %1262 = vrcp.f32 %v546_v61  ;;  %v545_v1 = vadd.f32 1.0, %v1251_v62 }
  0xbc   : > { %1264 = vrcp.f32 %v548_v63  ;;  %v547_v3 = vadd.f32 1.0, %v1253_v0 }
  0xbd   : > { %1266 = vrcp.f32 %v545_v1 }
  0xbe   : > { %1268 = vrcp.f32 %v547_v3 }
  0xc1   : > { %v1255_v4 = vpop.eup %1254 }
  0xc2   : > { %v1257_v5 = vpop.eup %1256  ;;  %v558_v6 = vmul.f32 %v1255_v4, %v510_v27  ;;  %v573_v27 = vld [vmem:[%s1498_s3] sm:$0xf] }
  0xc3   : > { %v1259_v7 = vpop.eup %1258  ;;  %v560_v8 = vmul.f32 %v1257_v5, %v512_v28 }
  0xc4   : > { %v1261_v9 = vpop.eup %1260  ;;  %v566_v10 = vpack.c.bf16 %v558_v6, %v558_v6  ;;  %v557_v11 = vmul.f32 %v1259_v7, %v509_v29 }
  0xc5   : > { %v1263_v12 = vpop.eup %1262  ;;  %v568_v13 = vpack.c.bf16 %v560_v8, %v560_v8  ;;  %v559_v14 = vmul.f32 %v1261_v9, %v1424_v30 }
  0xc6   : > { %v1265_v15 = vpop.eup %1264  ;;  %1170 = vmatprep.subr.msk.bf16.mxu0 %vm578_vm1, %v566_v10  ;;  %v565_v16 = vpack.c.bf16 %v557_v11, %v557_v11  ;;  %v562_v17 = vmul.f32 %v1263_v12, %v1426_v31 }
  0xc7   : > { %v1267_v18 = vpop.eup %1266  ;;  %1172 = vmatprep.subr.msk.bf16.mxu1 %vm578_vm1, %v568_v13  ;;  %v567_v19 = vpack.c.bf16 %v559_v14, %v559_v14  ;;  %v564_v20 = vmul.f32 %v1265_v15, %v1428_v32 }
  0xc8   : > { %v1269_v21 = vpop.eup %1268  ;;  %v580_v22 = vsel %vm578_vm1, %v565_v16, 0  ;;  %v570_v23 = vpack.c.bf16 %v562_v17, %v562_v17  ;;  %v561_v24 = vmul.f32 %v1267_v18, %v1430_v33  ;;  %v774_v33 = vpop.permute.xlu1 %773 }
  0xc9   : > { %604 = vmatpush1.bf16.msra.mxu0 %v580_v22  ;;  %v586_v25 = vsel %vm578_vm1, %v567_v19, 0  ;;  %v572_v26 = vpack.c.bf16 %v564_v20, %v564_v20  ;;  %v563_v28 = vmul.f32 %v1269_v21, %v1432_v34  ;;  %v831_v20 = vld [vmem:[#allocation3] sm:$0xff]  ;;  %v844_v22 = vld [vmem:[#allocation4] sm:$0xff] }
  0xca   : > { %645 = vmatpush1.bf16.msra.mxu1 %v586_v25  ;;  %1174 = vmatprep.subr.msk.bf16.mxu0 %vm578_vm1, %v570_v23  ;;  %v569_v29 = vpack.c.bf16 %v561_v24, %v561_v24 }
  0xcb   : > { %1176 = vmatprep.subr.msk.bf16.mxu1 %vm578_vm1, %v572_v26  ;;  %v571_v30 = vpack.c.bf16 %v563_v28, %v563_v28 }
  0xcc   : > { %1171 = vmatmul.mubr.msk.bf16.vlgmr.msra.gmra.mrb[0].mxu0 %vm574_vm2, %v573_v27  ;;  %v592_v31 = vsel %vm578_vm1, %v569_v29, 0 }
  0xcd   : > { %1173 = vmatmul.mubr.msk.bf16.vlgmr.msra.gmra.mrb[0].mxu1 %vm574_vm2, %v573_v27  ;;  %686 = vmatpush1.bf16.msra.mxu0 %v592_v31  ;;  %v598_v32 = vsel %vm578_vm1, %v571_v30, 0 }
  0xce   : > { %727 = vmatpush1.bf16.msra.mxu1 %v598_v32  ;;  %717 = vmatprep.mubr.bf16.mxu0 %v1313_v2 }
  0xcf   : > { %758 = vmatprep.mubr.bf16.mxu1 %v1313_v2 }
  0xd4   : > { %1175 = vmatmul.mubr.msk.bf16.vlgmr.msra.gmra.mrb[4].mxu0 %vm574_vm2, %v573_v27 }
  0xd5   : > { %1177 = vmatmul.mubr.msk.bf16.vlgmr.msra.gmra.mrb[4].mxu1 %vm574_vm2, %v573_v27 }
 0x19f   : > { %v637_v34 = vpop.f32.mrb[0].mxu0 }
 0x1a0   : > { %v639_v35 = vpop.f32.mrb[1].mxu0  ;;  %v776_v36 = vadd.f32 %v774_v33, %v637_v34  ;;  %v678_v37 = vpop.f32.mrb[0].mxu1 }
 0x1a1   : > { %v777_v38 = vadd.f32 %v774_v33, %v639_v35  ;;  %v641_v39 = vpop.f32.mrb[2].mxu0  ;;  %v778_v40 = vadd.f32 %v774_v33, %v678_v37  ;;  %v680_v41 = vpop.f32.mrb[1].mxu1 }
 0x1a2   : > { %v845_v42 = vmul.f32 %v776_v36, %v776_v36  ;;  %v642_v43 = vpop.f32.mrb[3].mxu0  ;;  %v779_v44 = vadd.f32 %v774_v33, %v680_v41  ;;  %v682_v45 = vpop.f32.mrb[2].mxu1 }
 0x1a3   : > { %v832_v2 = vadd.f32 %v777_v38, %v776_v36  ;;  %v846_v46 = vmul.f32 %v777_v38, %v777_v38  ;;  %v1188_v47 = vpack.c.bf16 %v777_v38, %v776_v36  ;;  %v847_v48 = vmul.f32 %v778_v40, %v778_v40  ;;  %v683_v49 = vpop.f32.mrb[3].mxu1 }
 0x1a4   : > { %v1189_v50 = vpack.c.bf16 %v779_v44, %v778_v40  ;;  %v848_v55 = vmul.f32 %v779_v44, %v779_v44 }
 0x1a5   : > { %v853_v51 = vadd.f32 %v846_v46, %v845_v42  ;;  %896 = vst [vmem:[%s1409_s27] sm:$0xff] %v1188_v47  ;;  %v833_v52 = vadd.f32 %v832_v2, %v778_v40 }
 0x1a6   : > { %897 = vst [vmem:[%s1409_s27 + $0x8] sm:$0xff] %v1189_v50 }
 0x1a7   : > { %v854_v53 = vadd.f32 %v853_v51, %v847_v48  ;;  %v834_v54 = vadd.f32 %v833_v52, %v779_v44  ;;  %v719_v56 = vpop.f32.mrb[4].mxu0 }
 0x1a8   : > { %v780_v57 = vadd.f32 %v774_v33, %v719_v56  ;;  %v760_v58 = vpop.f32.mrb[4].mxu1  ;;  %v721_v59 = vpop.f32.mrb[5].mxu0 }
 0x1a9   : > { %v855_v60 = vadd.f32 %v854_v53, %v848_v55  ;;  %v782_v61 = vadd.f32 %v774_v33, %v760_v58  ;;  %v781_v62 = vadd.f32 %v774_v33, %v721_v59  ;;  %v762_v63 = vpop.f32.mrb[5].mxu1  ;;  %v723_v0 = vpop.f32.mrb[6].mxu0 }
 0x1aa   : > { %v835_v1 = vadd.f32 %v834_v54, %v780_v57  ;;  %v849_v3 = vmul.f32 %v780_v57, %v780_v57  ;;  %v783_v4 = vadd.f32 %v774_v33, %v762_v63  ;;  %v724_v5 = vpop.f32.mrb[7].mxu0  ;;  %v764_v6 = vpop.f32.mrb[6].mxu1 }
 0x1ab   : > { %v850_v7 = vmul.f32 %v781_v62, %v781_v62  ;;  %v1190_v8 = vpack.c.bf16 %v781_v62, %v780_v57  ;;  %v765_v9 = vpop.f32.mrb[7].mxu1  ;;  %v851_v13 = vmul.f32 %v782_v61, %v782_v61 }
 0x1ac   : > { %v856_v10 = vadd.f32 %v855_v60, %v849_v3  ;;  %v836_v11 = vadd.f32 %v835_v1, %v781_v62  ;;  %v1191_v12 = vpack.c.bf16 %v783_v4, %v782_v61  ;;  %v852_v17 = vmul.f32 %v783_v4, %v783_v4 }
 0x1ad   : > { %898 = vst [vmem:[%s1409_s27 + $0x10] sm:$0xff] %v1190_v8 }
 0x1ae   : > { %899 = vst [vmem:[%s1409_s27 + $0x18] sm:$0xff] %v1191_v12  ;;  %v837_v14 = vadd.f32 %v836_v11, %v782_v61  ;;  %v857_v15 = vadd.f32 %v856_v10, %v850_v7 }
 0x1b0   : > { %v838_v16 = vadd.f32 %v837_v14, %v783_v4  ;;  %v858_v18 = vadd.f32 %v857_v15, %v851_v13 }
 0x1b2   : > { %839 = vadd.xlane.f32.xlu1 %v838_v16  ;;  %v859_v19 = vadd.f32 %v858_v18, %v852_v17 }
 0x1b4   : > { %860 = vadd.xlane.f32.xlu0 %v859_v19 }
 0x23e   : > { %906 = sbr.rel (!%p900_p8) target bundleno = 610 (0x262), region = 60 }
 0x23f   : > { %v840_v21 = vpop.xlane.xlu1 %839 }
 0x240   : > { %v841_v23 = vadd.f32 %v840_v21, %v831_v20 }
 0x241   : > { %v861_v24 = vpop.xlane.xlu0 %860 }
 0x242   : > { %843 = vst.msk [vmem:[#allocation3] sm:$0xff] %vm842_vm3, %v841_v23  ;;  %v862_v25 = vadd.f32 %v861_v24, %v844_v22 }
 0x244   : > { %863 = vst.msk [vmem:[#allocation4] sm:$0xff] %vm842_vm3, %v862_v25 }
 0x249   : > { %v907_v26 = vld [vmem:[#allocation3] sm:$0xff] }
 0x24a   : > { %v908_v28 = vmul.f32 0.00024414063, %v907_v26 }
 0x24b   : > { %v909_v27 = vld [vmem:[#allocation4] sm:$0xff] }
 0x24c   : > { %v910_v29 = vmul.f32 0.00024414063, %v909_v27  ;;  %v911_v30 = vmul.f32 %v908_v28, %v908_v28  ;;  %v918_v34 = vsub.f32 0.0, %v908_v28 }
 0x24e   : > { %v912_v31 = vsub.f32 %v910_v29, %v911_v30 }
 0x250   : > { %v913_v32 = vmax.f32 %v912_v31, 0.0 }
 0x252   : > { %v914_v33 = vadd.f32 1e-05, %v913_v32 }
 0x254   : > { %1270 = vrsqrt.f32 %v914_v33 }
 0x25e   : > { %v1271_v35 = vpop.eup %1270 }
 0x25f   : > { %917 = vst.msk [vmem:[%s459_s22] sm:$0xff] %vm842_vm3, %v1271_v35  ;;  %v919_v36 = vmul.f32 %v1271_v35, %v918_v34 }
 0x261   : > { %920 = vst.msk [vmem:[%s463_s11] sm:$0xff] %vm842_vm3, %v919_v36 }
 0x262 PF: > { %s18_s28 = sadd.s32 1, %s1310_s28   ;;  %s1507_s25 = sld [smem:[#allocation5_spill]] }
 0x263   : > { %p15_p9 = scmp.ge.s32.totalorder %s18_s28, 10   ;;  %s1508_s17 = sld [smem:[#allocation6_spill]] }
 0x264   : > { %s1509_s27 = sld [smem:[#allocation7_spill]]  ;;  %s1510_s24 = smov %s1302_s26 }
 0x265   :  { %17 = sbr.rel (!%p15_p9) target bundleno = 3 (0x3), region = 123 }
 0x269   : > { %s1511_s26 = smov %s1508_s17 }

// kernel: vit_head_forward.23
= control target key start
LH: loop header
LB: loop body
LE: loop exit
PB: predicated region body
PF: predicated region fallthrough
CT: control target
= control target key end

     0   :  { %s1755_s0 = inlined_call_operand.vmem [shape: bf16[2,4,8,1024], index: 0, kind: input, shape index: {}]   ;;  %s1756_s1 = inlined_call_operand.vmem [shape: f32[2,8,1], index: 1, kind: input, shape index: {}]   ;;  %s1757_s2 = inlined_call_operand.vmem [shape: f32[2,8,1], index: 2, kind: input, shape index: {}]   ;;  %s1758_s3 = inlined_call_operand.vmem [shape: bf16[1,6,8], index: 3, kind: input, shape index: {}]   ;;  %s1759_s4 = inlined_call_operand.vmem [shape: f32[6,1], index: 4, kind: input, shape index: {}]   ;;  %s1760_s5 = inlined_call_operand.vmem [shape: f32[2,4,6,1024], index: 5, kind: output, shape index: {0}]   ;;  %s1761_s6 = inlined_call_operand.hbm [shape: f32[2,6,1], index: 6, kind: output, shape index: {1}]   ;;  %s1762_s7 = inlined_call_operand.hbm [shape: f32[2,6,1], index: 7, kind: output, shape index: {2}]  }
   0x1   :  { %1773 = sst [smem:[#allocation21_spill]] %s1762_s7 }
   0x2   :  { %13 = vsyncpa [#allocation6], 0 }
   0x3   :  { %15 = vsyncpa [#allocation6 + $0x1], 0 }
   0x4   :  { %16 = vsyncpa [#allocation8], 0 }
   0x5   :  { %18 = vsyncpa [#allocation8 + $0x1], 0  ;;  %s1503_s24 = smov 0   ;;  %s1505_s25 = smov 0  }
   0x6   :  { %s1507_s26 = smov 0   ;;  %s1509_s27 = smov 0  }
   0x7   :  { %s1511_s28 = smov 0   ;;  %s1513_s29 = smov 0  }
   0x8   :  { %s1515_s30 = smov 0   ;;  %s1517_s8 = smov 0  }
   0x9 LB: > { %1774 = sst [smem:[#allocation11_spill]] %s1429_s24  ;;  %s1179_s9 = sadd.s32 4294967295, %s1457_s8   ;;  %s1457_s8 = sphi %s1517_s8, %s24_s8   ;;  %s1453_s30 = sphi %s1515_s30, %s1797_s30   ;;  %s1449_s29 = sphi %s1513_s29, %s1796_s29   ;;  %s1445_s28 = sphi %s1511_s28, %s1795_s28   ;;  %s1441_s27 = sphi %s1509_s27, %s1794_s27   ;;  %s1437_s26 = sphi %s1507_s26, %s1793_s26   ;;  %s1433_s25 = sphi %s1505_s25, %s1792_s25   ;;  %s1429_s24 = sphi %s1503_s24, %s1791_s24  }
   0xa   : > { %1775 = sst [smem:[#allocation12_spill]] %s1433_s25  ;;  %s1180_s10 = sadd.s32 4294967294, %s1457_s8  }
   0xb   : > { %1776 = sst [smem:[#allocation13_spill]] %s1437_s26  ;;  %s46_s11 = sadd.s32 1, %s1449_s29 }
   0xc   : > { %1777 = sst [smem:[#allocation14_spill]] %s1449_s29  ;;  %p48_p0 = scmp.ge.s32.totalorder %s46_s11, 4 }
   0xd   : > { %1778 = sst [smem:[#allocation15_spill]] %s1453_s30  ;;  %s50_s12 = sadd.s32 1, %s1453_s30 }
   0xe   : > { %1779 = sst [smem:[#allocation16_spill]] %s1457_s8  ;;  %p232_p1 = scmp.ne.s32.totalorder %s1437_s26, %s1433_s25 }
   0xf   : > { %p233_p2 = scmp.eq.s32.totalorder %s1179_s9, 7  ;;  %s1799_s11 = smov (%p48_p0, %s46_s11), 0 }
  0x10   : > { %1780 = sst [smem:[#allocation17_spill]] %s1799_s11  ;;  %s1801_s12 = smov (!%p48_p0, %s50_s12), %s1453_s30 }
  0x11   : > { %p1552_p3 = por %p233_p2, %p232_p1  ;;  %p238_p4 = scmp.ne.s32.totalorder %s1433_s25, %s1429_s24 }
  0x12   : > { %p52_p5 = scmp.ge.s32.totalorder %s1801_s12, 2  ;;  %p239_p6 = scmp.eq.s32.totalorder %s1180_s10, 7 }
  0x13   : > { %p1184_p7 = scmp.ge.s32.totalorder %s1457_s8, 1  ;;  %p334_p8 = scmp.lt.s32.totalorder %s1457_s8, 9 }
  0x14   : > { %s1803_s12 = smov (%p52_p5, %s1801_s12), 0  ;;  %p1562_p9 = por %p239_p6, %p238_p4 }
  0x15   : > { %1782 = sst [smem:[#allocation18_spill]] %s1803_s12  ;;  %p335_p10 = pnand %p1184_p7, %p334_p8 }
  0x16   : > { %s1783_s14 = scalar_select %p1562_p9, 1, 0 }
  0x17   : > { %s219_s15 = ssub.s32 %s1453_s30, %s1803_s12  ;;  %s222_s16 = sadd.s32 1, %s1437_s26 }
  0x18   : > { %1784 = sst [smem:[#allocation19_spill]] %s1783_s14  ;;  %p220_p11 = scmp.eq.s32.totalorder %s219_s15, 0 }
  0x19   : > { %338 = sbr.rel (%p335_p10) target bundleno = 683 (0x2ab), region = 40  ;;  %s1573_s18 = sand.u32 (!%p335_p10), 1, %s1433_s25  }
  0x1a   : > { %s1570_s17 = scalar_select %p220_p11, %s1437_s26, %s222_s16  }
  0x1b   : > { %p415_p12 = scmp.lt.s32.totalorder (!%p335_p10), %s1445_s28, 1  ;;  %s1185_s19 = sshll.u32 (!%p335_p10), %s1573_s18, 3 }
  0x1c   : > { %1785 = sst [smem:[#allocation20_spill]] %s1570_s17  ;;  %p417_p13 = scmp.lt.s32.totalorder (!%p335_p10), %s1441_s27, 3 }
  0x1d   : > { %p465_p0 = scmp.eq.s32.totalorder (!%p335_p10), %s1441_s27, 0  ;;  %s1597_s10 = scalar_lea.vmem (!%p335_p10), [#allocation7], %s1185_s19 }
  0x20   : > { %s416_s20 = scalar_select %p415_p12, %s1445_s28, 1 }
  0x21   : > { %s418_s21 = scalar_select %p417_p13, %s1441_s27, 3 }
  0x22   : > { %s1188_s22 = sshll.u32 %s416_s20, 5  ;;  %s1190_s23 = sshll.u32 %s416_s20, 3  ;;  %vm474_vm0 = vcmask (%p465_p0), 5120   ;;  %v1459_v0 = vmov (%p465_p0), 0.0  }
  0x23   : > { %s1187_s9 = sshll.u32 %s418_s21, 3  ;;  %s438_s16 = scalar_lea.vmem %s1756_s1, %s1190_s23  ;;  %475 = vst.msk [vmem:[#allocation3] sm:$0x3f] (%p465_p0), %vm474_vm0, %v1459_v0  ;;  %476 = vst.msk [vmem:[#allocation4] sm:$0x3f] (%p465_p0), %vm474_vm0, %v1459_v0 }
  0x24   : > { %s428_s12 = sadd.s32 %s1188_s22, %s1187_s9  ;;  %s445_s29 = scalar_lea.vmem %s1757_s2, %s1190_s23 }
  0x25   : > { %s1189_s17 = sshll.u32 %s428_s12, 2  ;;  %s1194_s26 = sshll.u32 %s428_s12, 3 }
  0x26   : > { %s430_s24 = scalar_lea.vmem %s1755_s0, %s1189_s17  ;;  %s1592_s20 = scalar_lea.vmem %s1760_s5, %s1194_s26 }
  0x27   : > { %s1595_s21 = scalar_lea.vmem [#allocation5], %s1185_s19  ;;  %473 = sbr.rel (!%p465_p0) target bundleno = 46 (0x2e), region = 44 }
  0x2e PF: > { %v489_v1 = vld [vmem:[%s438_s16] sm:$0xff]  ;;  %v1460_v2 = vmov 0   ;;  %v478_v6 = vld [vmem:[%s430_s24 + $0x8] sm:$0xff]  ;;  %v479_v7 = vld [vmem:[%s430_s24 + $0x10] sm:$0xff]  ;;  %vm578_vm1 = vcmask 1043456   ;;  %vm574_vm2 = vcmask 64512  }
  0x2f   : > { %1295 = vset.pattern.permute.xlu0 %v1460_v2  ;;  %635 = vmatprep.mubr.bf16.mxu0 %v1460_v2  ;;  %v503_v3 = vld [vmem:[%s445_s29] sm:$0xff]  ;;  %v480_v8 = vld [vmem:[%s430_s24 + $0x18] sm:$0xff]  ;;  %v484_v10 = vunpack.c.h.bf16 %v478_v6  ;;  %v483_v12 = vunpack.c.l.bf16 %v478_v6  ;;  %v486_v14 = vunpack.c.h.bf16 %v479_v7  ;;  %v485_v16 = vunpack.c.l.bf16 %v479_v7  ;;  %p889_p1 = scmp.eq.s32.totalorder %s1441_s27, 3 }
  0x30   : > { %492 = vperm.xlu0 %1295, %v489_v1   ;;  %676 = vmatprep.mubr.bf16.mxu1 %v1460_v2  ;;  %v770_v4 = vld [vmem:[%s1759_s4] sm:$0x3f]  ;;  %v488_v15 = vunpack.c.h.bf16 %v480_v8  ;;  %v487_v17 = vunpack.c.l.bf16 %v480_v8  ;;  %vm832_vm3 = vcmask 1045504   ;;  %vm851_vm4 = vcmask 5120  }
  0x31   : > { %1296 = vset.pattern.permute.xlu1 %v1460_v2  ;;  %v477_v5 = vld [vmem:[%s430_s24] sm:$0xff] }
  0x32   : > { %773 = vperm.xlu1 %1296, %v770_v4   ;;  %v482_v9 = vunpack.c.h.bf16 %v477_v5  ;;  %v481_v11 = vunpack.c.l.bf16 %v477_v5 }
  0x34   : > { %506 = vperm.xlu0 %1295, %v503_v3  }
  0xaf   : > { %v493_v13 = vpop.permute.xlu0 %492 }
  0xb0   : > { %v496_v18 = vmul.f32 %v493_v13, %v482_v9  ;;  %v498_v19 = vmul.f32 %v493_v13, %v484_v10  ;;  %v495_v20 = vmul.f32 %v493_v13, %v481_v11  ;;  %v497_v21 = vmul.f32 %v493_v13, %v483_v12 }
  0xb1   : > { %v500_v23 = vmul.f32 %v493_v13, %v486_v14  ;;  %v502_v24 = vmul.f32 %v493_v13, %v488_v15  ;;  %v499_v25 = vmul.f32 %v493_v13, %v485_v16  ;;  %v501_v26 = vmul.f32 %v493_v13, %v487_v17 }
  0xb3   : > { %v507_v22 = vpop.permute.xlu0 %506 }
  0xb4   : > { %v510_v27 = vadd.f32 %v507_v22, %v496_v18  ;;  %v512_v28 = vadd.f32 %v507_v22, %v498_v19  ;;  %v509_v29 = vadd.f32 %v507_v22, %v495_v20  ;;  %v1606_v30 = vadd.f32 %v507_v22, %v497_v21 }
  0xb5   : > { %v1608_v31 = vadd.f32 %v507_v22, %v500_v23  ;;  %v1610_v32 = vadd.f32 %v507_v22, %v502_v24  ;;  %v1612_v33 = vadd.f32 %v507_v22, %v499_v25  ;;  %v1614_v34 = vadd.f32 %v507_v22, %v501_v26 }
  0xb6   : > { %v518_v35 = vsub.f32 0.0, %v510_v27  ;;  %v520_v36 = vsub.f32 0.0, %v512_v28  ;;  %v517_v37 = vsub.f32 0.0, %v509_v29  ;;  %v519_v38 = vsub.f32 0.0, %v1606_v30 }
  0xb7   : > { %v522_v39 = vsub.f32 0.0, %v1608_v31  ;;  %v524_v40 = vsub.f32 0.0, %v1610_v32  ;;  %v521_v41 = vsub.f32 0.0, %v1612_v33  ;;  %v523_v46 = vsub.f32 0.0, %v1614_v34 }
  0xb8   : > { %v527_v42 = vmul.f32 1.442695, %v518_v35  ;;  %v531_v43 = vmul.f32 1.442695, %v520_v36  ;;  %v525_v44 = vmul.f32 1.442695, %v517_v37 }
  0xb9   : > { %v529_v45 = vmul.f32 1.442695, %v519_v38  ;;  %v535_v47 = vmul.f32 1.442695, %v522_v39  ;;  %v539_v48 = vmul.f32 1.442695, %v524_v40 }
  0xba   : > { %1297 = vpow2.f32 %v527_v42  ;;  %v533_v49 = vmul.f32 1.442695, %v521_v41  ;;  %v537_v50 = vmul.f32 1.442695, %v523_v46 }
  0xbb   : > { %1299 = vpow2.f32 %v531_v43 }
  0xbc   : > { %1301 = vpow2.f32 %v525_v44 }
  0xbd   : > { %1303 = vpow2.f32 %v529_v45 }
  0xbe   : > { %1305 = vpow2.f32 %v535_v47 }
  0xbf   : > { %1307 = vpow2.f32 %v539_v48 }
  0xc0   : > { %1309 = vpow2.f32 %v533_v49 }
  0xc1   : > { %1311 = vpow2.f32 %v537_v50 }
  0xc4   : > { %v1298_v51 = vpop.eup %1297 }
  0xc5   : > { %v1300_v52 = vpop.eup %1299  ;;  %v542_v53 = vadd.f32 1.0, %v1298_v51 }
  0xc6   : > { %v1302_v54 = vpop.eup %1301  ;;  %v544_v55 = vadd.f32 1.0, %v1300_v52 }
  0xc7   : > { %v1304_v56 = vpop.eup %1303  ;;  %1313 = vrcp.f32 %v542_v53  ;;  %v541_v57 = vadd.f32 1.0, %v1302_v54 }
  0xc8   : > { %v1306_v58 = vpop.eup %1305  ;;  %1315 = vrcp.f32 %v544_v55  ;;  %v543_v59 = vadd.f32 1.0, %v1304_v56 }
  0xc9   : > { %v1308_v60 = vpop.eup %1307  ;;  %1317 = vrcp.f32 %v541_v57  ;;  %v546_v61 = vadd.f32 1.0, %v1306_v58 }
  0xca   : > { %v1310_v62 = vpop.eup %1309  ;;  %1319 = vrcp.f32 %v543_v59  ;;  %v548_v63 = vadd.f32 1.0, %v1308_v60 }
  0xcb   : > { %v1312_v0 = vpop.eup %1311  ;;  %1321 = vrcp.f32 %v546_v61  ;;  %v545_v1 = vadd.f32 1.0, %v1310_v62 }
  0xcc   : > { %1323 = vrcp.f32 %v548_v63  ;;  %v547_v3 = vadd.f32 1.0, %v1312_v0 }
  0xcd   : > { %1325 = vrcp.f32 %v545_v1 }
  0xce   : > { %1327 = vrcp.f32 %v547_v3 }
  0xd1   : > { %v1314_v4 = vpop.eup %1313 }
  0xd2   : > { %v1316_v5 = vpop.eup %1315  ;;  %v558_v6 = vmul.f32 %v1314_v4, %v510_v27  ;;  %v573_v27 = vld [vmem:[%s1758_s3] sm:$0x7] }
  0xd3   : > { %v1318_v7 = vpop.eup %1317  ;;  %v560_v8 = vmul.f32 %v1316_v5, %v512_v28 }
  0xd4   : > { %v1320_v9 = vpop.eup %1319  ;;  %v566_v10 = vpack.c.bf16 %v558_v6, %v558_v6  ;;  %v557_v11 = vmul.f32 %v1318_v7, %v509_v29 }
  0xd5   : > { %v1322_v12 = vpop.eup %1321  ;;  %v568_v13 = vpack.c.bf16 %v560_v8, %v560_v8  ;;  %v559_v14 = vmul.f32 %v1320_v9, %v1606_v30 }
  0xd6   : > { %v1324_v15 = vpop.eup %1323  ;;  %1197 = vmatprep.subr.msk.bf16.mxu0 %vm578_vm1, %v566_v10  ;;  %v565_v16 = vpack.c.bf16 %v557_v11, %v557_v11  ;;  %v562_v17 = vmul.f32 %v1322_v12, %v1608_v31 }
  0xd7   : > { %v1326_v18 = vpop.eup %1325  ;;  %1199 = vmatprep.subr.msk.bf16.mxu1 %vm578_vm1, %v568_v13  ;;  %v567_v19 = vpack.c.bf16 %v559_v14, %v559_v14  ;;  %v564_v20 = vmul.f32 %v1324_v15, %v1610_v32 }
  0xd8   : > { %v1328_v21 = vpop.eup %1327  ;;  %v580_v22 = vsel %vm578_vm1, %v565_v16, 0  ;;  %v570_v23 = vpack.c.bf16 %v562_v17, %v562_v17  ;;  %v561_v24 = vmul.f32 %v1326_v18, %v1612_v33  ;;  %v774_v33 = vpop.permute.xlu1 %773 }
  0xd9   : > { %604 = vmatpush1.bf16.msra.mxu0 %v580_v22  ;;  %v586_v25 = vsel %vm578_vm1, %v567_v19, 0  ;;  %v572_v26 = vpack.c.bf16 %v564_v20, %v564_v20  ;;  %v563_v28 = vmul.f32 %v1328_v21, %v1614_v34 }
  0xda   : > { %645 = vmatpush1.bf16.msra.mxu1 %v586_v25  ;;  %1201 = vmatprep.subr.msk.bf16.mxu0 %vm578_vm1, %v570_v23  ;;  %v569_v29 = vpack.c.bf16 %v561_v24, %v561_v24 }
  0xdb   : > { %1203 = vmatprep.subr.msk.bf16.mxu1 %vm578_vm1, %v572_v26  ;;  %v571_v30 = vpack.c.bf16 %v563_v28, %v563_v28 }
  0xdc   : > { %1198 = vmatmul.mubr.msk.bf16.vlgmr.msra.gmra.mrb[0].mxu0 %vm574_vm2, %v573_v27  ;;  %v592_v31 = vsel %vm578_vm1, %v569_v29, 0 }
  0xdd   : > { %1200 = vmatmul.mubr.msk.bf16.vlgmr.msra.gmra.mrb[0].mxu1 %vm574_vm2, %v573_v27  ;;  %686 = vmatpush1.bf16.msra.mxu0 %v592_v31  ;;  %v598_v32 = vsel %vm578_vm1, %v571_v30, 0 }
  0xde   : > { %727 = vmatpush1.bf16.msra.mxu1 %v598_v32  ;;  %717 = vmatprep.mubr.bf16.mxu0 %v1460_v2 }
  0xdf   : > { %758 = vmatprep.mubr.bf16.mxu1 %v1460_v2 }
  0xe4   : > { %1202 = vmatmul.mubr.msk.bf16.vlgmr.msra.gmra.mrb[4].mxu0 %vm574_vm2, %v573_v27 }
  0xe5   : > { %1204 = vmatmul.mubr.msk.bf16.vlgmr.msra.gmra.mrb[4].mxu1 %vm574_vm2, %v573_v27 }
 0x1af   : > { %v637_v34 = vpop.f32.mrb[0].mxu0 }
 0x1b0   : > { %v776_v35 = vadd.f32 %v774_v33, %v637_v34  ;;  %v639_v36 = vpop.f32.mrb[1].mxu0  ;;  %v678_v37 = vpop.f32.mrb[0].mxu1 }
 0x1b1   : > { %v777_v38 = vadd.f32 %v774_v33, %v639_v36  ;;  %v641_v39 = vpop.f32.mrb[2].mxu0  ;;  %v778_v40 = vadd.f32 %v774_v33, %v678_v37  ;;  %v680_v41 = vpop.f32.mrb[1].mxu1 }
 0x1b2   : > { %784 = vst [vmem:[#allocation2] sm:$0x3f] %v776_v35  ;;  %v642_v42 = vpop.f32.mrb[3].mxu0  ;;  %v779_v43 = vadd.f32 %v774_v33, %v680_v41  ;;  %v682_v44 = vpop.f32.mrb[2].mxu1 }
 0x1b3   : > { %785 = vst [vmem:[#allocation2 + $0x8] sm:$0x3f] %v777_v38  ;;  %786 = vst [vmem:[#allocation2 + $0x10] sm:$0x3f] %v778_v40  ;;  %v683_v2 = vpop.f32.mrb[3].mxu1 }
 0x1b4   : > { %787 = vst [vmem:[#allocation2 + $0x18] sm:$0x3f] %v779_v43  ;;  %v831_v40 = vld [vmem:[#allocation3] sm:$0x3f]  ;;  %v853_v42 = vld [vmem:[#allocation4] sm:$0x3f] }
 0x1b7   : > { %v719_v45 = vpop.f32.mrb[4].mxu0 }
 0x1b8   : > { %v780_v46 = vadd.f32 %v774_v33, %v719_v45  ;;  %v760_v47 = vpop.f32.mrb[4].mxu1  ;;  %v721_v48 = vpop.f32.mrb[5].mxu0 }
 0x1b9   : > { %v782_v49 = vadd.f32 %v774_v33, %v760_v47  ;;  %v781_v50 = vadd.f32 %v774_v33, %v721_v48  ;;  %v762_v51 = vpop.f32.mrb[5].mxu1  ;;  %v723_v52 = vpop.f32.mrb[6].mxu0  ;;  %v823_v53 = vld [vmem:[#allocation2] sm:$0x3f] }
 0x1ba   : > { %788 = vst [vmem:[#allocation2 + $0x20] sm:$0x3f] %v780_v46  ;;  %v783_v54 = vadd.f32 %v774_v33, %v762_v51  ;;  %v724_v55 = vpop.f32.mrb[7].mxu0  ;;  %v764_v56 = vpop.f32.mrb[6].mxu1  ;;  %v824_v57 = vld [vmem:[#allocation2 + $0x8] sm:$0x3f]  ;;  %v854_v59 = vmul.f32 %v823_v53, %v823_v53 }
 0x1bb   : > { %v825_v58 = vld [vmem:[#allocation2 + $0x10] sm:$0x3f]  ;;  %881 = vst [vmem:[%s1592_s20] sm:$0x3f] %v823_v53  ;;  %790 = vst [vmem:[#allocation2 + $0x30] sm:$0x3f] %v782_v49  ;;  %v765_v60 = vpop.f32.mrb[7].mxu1  ;;  %v855_v1 = vmul.f32 %v824_v57, %v824_v57 }
 0x1bc   : > { %789 = vst [vmem:[#allocation2 + $0x28] sm:$0x3f] %v781_v50  ;;  %v826_v61 = vld [vmem:[#allocation2 + $0x18] sm:$0x3f]  ;;  %v833_v62 = vsel %vm832_vm3, %v823_v53, 0.0  ;;  %v834_v63 = vsel %vm832_vm3, %v824_v57, 0.0  ;;  %v856_v4 = vmul.f32 %v825_v58, %v825_v58 }
 0x1bd   : > { %v836_v0 = vsel %vm832_vm3, %v825_v58, 0.0  ;;  %882 = vst [vmem:[%s1592_s20 + $0x8] sm:$0x3f] %v824_v57  ;;  %883 = vst [vmem:[%s1592_s20 + $0x10] sm:$0x3f] %v825_v58  ;;  %v835_v3 = vadd.f32 %v834_v63, %v833_v62  ;;  %v857_v5 = vmul.f32 %v826_v61, %v826_v61  ;;  %v862_v6 = vsel %vm832_vm3, %v854_v59, 0.0 }
 0x1be   : > { %791 = vst [vmem:[#allocation2 + $0x38] sm:$0x3f] %v783_v54  ;;  %884 = vst [vmem:[%s1592_s20 + $0x18] sm:$0x3f] %v826_v61  ;;  %v863_v7 = vsel %vm832_vm3, %v855_v1, 0.0  ;;  %v865_v10 = vsel %vm832_vm3, %v856_v4, 0.0 }
 0x1bf   : > { %v837_v8 = vadd.f32 %v836_v0, %v835_v3  ;;  %v864_v9 = vadd.f32 %v863_v7, %v862_v6  ;;  %v838_v11 = vsel %vm832_vm3, %v826_v61, 0.0  ;;  %v867_v15 = vsel %vm832_vm3, %v857_v5, 0.0 }
 0x1c1   : > { %v839_v12 = vadd.f32 %v838_v11, %v837_v8  ;;  %v866_v13 = vadd.f32 %v865_v10, %v864_v9  ;;  %v827_v14 = vld [vmem:[#allocation2 + $0x20] sm:$0x3f] }
 0x1c2   : > { %v829_v17 = vld [vmem:[#allocation2 + $0x30] sm:$0x3f]  ;;  %v840_v18 = vsel %vm832_vm3, %v827_v14, 0.0  ;;  %885 = vst [vmem:[%s1592_s20 + $0x20] sm:$0x3f] %v827_v14  ;;  %v858_v19 = vmul.f32 %v827_v14, %v827_v14 }
 0x1c3   : > { %v828_v16 = vld [vmem:[#allocation2 + $0x28] sm:$0x3f]  ;;  %v868_v20 = vadd.f32 %v867_v15, %v866_v13  ;;  %v841_v22 = vadd.f32 %v840_v18, %v839_v12  ;;  %887 = vst [vmem:[%s1592_s20 + $0x30] sm:$0x3f] %v829_v17  ;;  %v860_v25 = vmul.f32 %v829_v17, %v829_v17  ;;  %v844_v30 = vsel %vm832_vm3, %v829_v17, 0.0 }
 0x1c4   : > { %v842_v23 = vsel %vm832_vm3, %v828_v16, 0.0  ;;  %886 = vst [vmem:[%s1592_s20 + $0x28] sm:$0x3f] %v828_v16  ;;  %v859_v24 = vmul.f32 %v828_v16, %v828_v16  ;;  %v869_v26 = vsel %vm832_vm3, %v858_v19, 0.0 }
 0x1c5   : > { %v830_v21 = vld [vmem:[#allocation2 + $0x38] sm:$0x3f]  ;;  %v843_v27 = vadd.f32 %v842_v23, %v841_v22  ;;  %v870_v28 = vadd.f32 %v869_v26, %v868_v20  ;;  %v873_v35 = vsel %vm832_vm3, %v860_v25, 0.0 }
 0x1c6   : > { %888 = vst [vmem:[%s1592_s20 + $0x38] sm:$0x3f] %v830_v21  ;;  %v871_v29 = vsel %vm832_vm3, %v859_v24, 0.0  ;;  %v861_v31 = vmul.f32 %v830_v21, %v830_v21  ;;  %v846_v34 = vsel %vm832_vm3, %v830_v21, 0.0 }
 0x1c7   : > { %v845_v32 = vadd.f32 %v844_v30, %v843_v27  ;;  %v872_v33 = vadd.f32 %v871_v29, %v870_v28 }
 0x1c8   : > { %v875_v38 = vsel %vm832_vm3, %v861_v31, 0.0 }
 0x1c9   : > { %v847_v36 = vadd.f32 %v846_v34, %v845_v32  ;;  %v874_v37 = vadd.f32 %v873_v35, %v872_v33 }
 0x1cb   : > { %848 = vadd.xlane.f32.xlu1 %v847_v36  ;;  %v876_v39 = vadd.f32 %v875_v38, %v874_v37 }
 0x1cd   : > { %877 = vadd.xlane.f32.xlu0 %v876_v39 }
 0x257   : > { %895 = sbr.rel (!%p889_p1) target bundleno = 635 (0x27b), region = 60 }
 0x258   : > { %v849_v41 = vpop.xlane.xlu1 %848 }
 0x259   : > { %v850_v43 = vadd.f32 %v849_v41, %v831_v40 }
 0x25a   : > { %v878_v44 = vpop.xlane.xlu0 %877 }
 0x25b   : > { %852 = vst.msk [vmem:[#allocation3] sm:$0x3f] %vm851_vm4, %v850_v43  ;;  %v879_v2 = vadd.f32 %v878_v44, %v853_v42 }
 0x25d   : > { %880 = vst.msk [vmem:[#allocation4] sm:$0x3f] %vm851_vm4, %v879_v2 }
 0x262   : > { %v896_v45 = vld [vmem:[#allocation3] sm:$0x3f] }
 0x263   : > { %v897_v47 = vmul.f32 0.00024414063, %v896_v45 }
 0x264   : > { %v898_v46 = vld [vmem:[#allocation4] sm:$0x3f] }
 0x265   : > { %v899_v48 = vmul.f32 0.00024414063, %v898_v46  ;;  %v900_v49 = vmul.f32 %v897_v47, %v897_v47  ;;  %v907_v53 = vsub.f32 0.0, %v897_v47 }
 0x267   : > { %v901_v50 = vsub.f32 %v899_v48, %v900_v49 }
 0x269   : > { %v902_v51 = vmax.f32 %v901_v50, 0.0 }
 0x26b   : > { %v903_v52 = vadd.f32 1e-05, %v902_v51 }
 0x26d   : > { %1329 = vrsqrt.f32 %v903_v52 }
 0x277   : > { %v1330_v54 = vpop.eup %1329 }
 0x278   : > { %906 = vst.msk [vmem:[%s1595_s21] sm:$0x3f] %vm851_vm4, %v1330_v54  ;;  %v908_v55 = vmul.f32 %v1330_v54, %v907_v53 }
 0x27a   : > { %909 = vst.msk [vmem:[%s1597_s10] sm:$0x3f] %vm851_vm4, %v908_v55 }
 0x27b PF: > { %s1209_s27 = sshll.u32 %s1445_s28, 7  ;;  %s946_s11 = sshll.u32 %s1595_s21, 4  ;;  %s947_s11 = int_to_ptr.vmem [resolvable:$true] %s946_s11 }
 0x27c   : > { %s1680_s8 = scalar_lea.hbm %s1761_s6, %s1209_s27  ;;  %s924_s12 = scalar_lea.sflag [#allocation6], %s1573_s18 }
 0x27d   : > { %s1331_s14 = scalar_lea.vmem %s947_s11, 128  ;;  %s1461_s17 = smov [#allocation5]  }
 0x27e   : > { %p1332_p2 = scmp.ne.s32.totalorder %s947_s11, %s1331_s14  ;;  %s1335_s19 = sshll.u32 %s1461_s17, 4  ;;  %s1336_s19 = int_to_ptr.vmem [resolvable:$false] %s1335_s19 }
 0x27f   : > { %s1337_s22 = scalar_lea.vmem %s1336_s19, 256  ;;  %p1338_p6 = scmp.lt.s32.totalorder %s947_s11, %s1336_s19 }
 0x280   : > { %p1333_p4 = pnand %p1332_p2, %p1552_p3  ;;  %p1339_p7 = scmp.lt.s32.totalorder %s1337_s22, %s1331_s14 }
 0x282   : > { %p1334_p5 = pneg %p1333_p4  ;;  %p1340_p8 = por %p1339_p7, %p1338_p6 }
 0x284   : > { %p1341_p10 = pnand %p1340_p8, %p1334_p5 }
 0x286   : > { %1344 = shalt.err (!%p1341_p10)
}
 0x287   : > { %s1345_s23 = scalar_lea.hbm %s1680_s8, 128  ;;  %s1349_s16 = scalar_lea.hbm %s1761_s6, 256 }
 0x288   : > { %p1346_p11 = scmp.ne.s32.totalorder %s1680_s8, %s1345_s23  ;;  %p1350_p0 = scmp.lt.u32.totalorder %s1680_s8, %s1761_s6 }
 0x289   : > { %p1351_p1 = scmp.lt.u32.totalorder %s1349_s16, %s1345_s23  ;;  %p1353_p4 = scmp.lt.u32.totalorder %s1345_s23, %s1680_s8 }
 0x28a   : > { %p1347_p12 = pnand %p1346_p11, %p1552_p3 }
 0x28b   : > { %p1352_p2 = por %p1351_p1, %p1350_p0 }
 0x28c   : > { %p1348_p13 = pneg %p1347_p12 }
 0x28d   : > { %p1354_p5 = por %p1353_p4, %p1352_p2 }
 0x28f   : > { %p1355_p6 = pnand %p1354_p5, %p1348_p13 }
 0x291   : > { %1358 = shalt.err (!%p1355_p6)
}
 0x292   : > { %1217 = dma.vmem_to_hbm [thread:$0]  (%p1552_p3), %s947_s11, 128, %s1680_s8, %s924_s12  }
 0x293   : > { %s1786_s24 = sld [smem:[#allocation21_spill]]  ;;  %s959_s29 = sshll.u32 %s1597_s10, 4  ;;  %s960_s29 = int_to_ptr.vmem [resolvable:$true] %s959_s29 }
 0x294   : > { %s929_s30 = scalar_lea.sflag [#allocation8], %s1573_s18  ;;  %s1359_s17 = scalar_lea.vmem %s960_s29, 128 }
 0x295   : > { %p1360_p7 = scmp.ne.s32.totalorder %s960_s29, %s1359_s17  ;;  %s1462_s19 = smov [#allocation7]  }
 0x296   : > { %s1363_s22 = sshll.u32 %s1462_s19, 4  ;;  %s1364_s22 = int_to_ptr.vmem [resolvable:$false] %s1363_s22 }
 0x297   : > { %p1361_p8 = pnand %p1360_p7, %p1552_p3  ;;  %s1365_s23 = scalar_lea.vmem %s1364_s22, 256 }
 0x298   : > { %p1366_p11 = scmp.lt.s32.totalorder %s960_s29, %s1364_s22  ;;  %p1367_p12 = scmp.lt.s32.totalorder %s1365_s23, %s1359_s17 }
 0x299   : > { %s1787_s14 = smov %s1786_s24  ;;  %s1706_s26 = scalar_lea.hbm %s1786_s24, %s1209_s27 }
 0x29a   : > { %p1362_p10 = pneg %p1361_p8  ;;  %p1368_p13 = por %p1367_p12, %p1366_p11 }
 0x29c   : > { %p1369_p0 = pnand %p1368_p13, %p1362_p10 }
 0x29e   : > { %1372 = shalt.err (!%p1369_p0)
}
 0x29f   : > { %s1373_s28 = scalar_lea.hbm %s1706_s26, 128  ;;  %s1377_s27 = scalar_lea.hbm %s1787_s14, 256 }
 0x2a0   : > { %p1374_p1 = scmp.ne.s32.totalorder %s1706_s26, %s1373_s28  ;;  %p1378_p5 = scmp.lt.u32.totalorder %s1706_s26, %s1787_s14 }
 0x2a1   : > { %p1379_p6 = scmp.lt.u32.totalorder %s1377_s27, %s1373_s28  ;;  %p1381_p8 = scmp.lt.u32.totalorder %s1373_s28, %s1706_s26 }
 0x2a2   : > { %p1375_p2 = pnand %p1374_p1, %p1552_p3 }
 0x2a3   : > { %p1380_p7 = por %p1379_p6, %p1378_p5 }
 0x2a4   : > { %p1376_p4 = pneg %p1375_p2 }
 0x2a5   : > { %p1382_p10 = por %p1381_p8, %p1380_p7 }
 0x2a7   : > { %p1383_p11 = pnand %p1382_p10, %p1376_p4 }
 0x2a9   : > { %1386 = shalt.err (!%p1383_p11)
}
 0x2aa   : > { %1218 = dma.vmem_to_hbm [thread:$0]  (%p1552_p3), %s960_s29, 128, %s1706_s26, %s929_s30  }
 0x2ab PF: > { %s1788_s12 = sld [smem:[#allocation16_spill]]  ;;  %s1789_s9 = sld [smem:[#allocation11_spill]] }
 0x2b1   : > { %p1228_p12 = scmp.ge.s32.totalorder %s1788_s12, 2  ;;  %s987_s16 = sand.u32 1, %s1789_s9  }
 0x2b2   : > { %s988_s20 = scalar_lea.sflag [#allocation6], %s987_s16 }
 0x2b3   : > { %p1222_p13 = pnand %p1228_p12, %p1562_p9 }
 0x2b5   : > { %1420 = dma.done.wait (!%p1222_p13), %s988_s20, 128  }
 0x2b6   : > { %1422 = vsyncadd (!%p1222_p13), %s988_s20, 4294967168  ;;  %s997_s21 = scalar_lea.sflag [#allocation8], %s987_s16 }
 0x2b7   : > { %1424 = dma.done.wait (!%p1222_p13), %s997_s21, 128  }
 0x2b8   : > { %1426 = vsyncadd (!%p1222_p13), %s997_s21, 4294967168  ;;  %s24_s8 = sadd.s32 1, %s1788_s12   ;;  %s1791_s24 = sld [smem:[#allocation12_spill]] }
 0x2b9   : > { %p21_p0 = scmp.ge.s32.totalorder %s24_s8, 10   ;;  %s1792_s25 = sld [smem:[#allocation13_spill]] }
 0x2ba   : > { %s1793_s26 = sld [smem:[#allocation20_spill]]  ;;  %s1794_s27 = sld [smem:[#allocation14_spill]] }
 0x2bb   : > { %s1795_s28 = sld [smem:[#allocation15_spill]]  ;;  %s1796_s29 = sld [smem:[#allocation17_spill]] }
 0x2bc   : > { %s1797_s30 = sld [smem:[#allocation18_spill]]  ;;  %23 = sbr.rel (!%p21_p0) target bundleno = 9 (0x9), region = 133 }
 0x2c3   :  { %1002 = vsyncpa [#allocation6], 1 }
 0x2c4   :  { %1004 = vsyncpa [#allocation6 + $0x1], 1 }
 0x2c5   :  { %1005 = vsyncpa [#allocation8], 1 }
 0x2c6   :  { %1007 = vsyncpa [#allocation8 + $0x1], 1 }

</bundles_post_ra>
